<compile_context>
chip_gen: v7x
topology: tpu7x:2x2x1
jax: 0.10.0
libtpu: 0.0.40
codegen_flags: <defaults>
</compile_context>

<pallas_src>
import functools

import jax
import jax.numpy as jnp
from jax import lax
from jax.experimental import pallas as pl
from jax.experimental.pallas import tpu as pltpu

K = 7      # conv kernel size
PAD = 3    # conv "same" padding


def _spatial_attention_kernel(b_ref, wtab_ref, x_ref, o_ref, *, img_w):
    """One grid step: a (BN, C, H*W) tile of x.

    b_ref:    (1,)           f32 SMEM  conv bias
    wtab_ref: (2*K*K, H*W)   f32 VMEM  masked conv weights, row = ci*49 + di*7 + dj,
                                       wtab[r, p] = w[ci,di,dj] * rowmask[di][p] * colmask[dj][p]
    x_ref/o_ref: (BN, C, H*W)          input / output tiles (lane-dense, input dtype)
    """
    bn, _, hw = x_ref.shape
    n_taps = K * K

    x = x_ref[...]                                       # stay in the input dtype

    # Channel-wise mean / max (sublane-axis reduction); pooled rows in f32.
    avg = jnp.mean(x, axis=1, dtype=jnp.float32)         # (BN, HW)
    mx = jnp.max(x, axis=1).astype(jnp.float32)          # (BN, HW)

    # 7x7 "same" conv, 2 in-channels -> 1 out-channel, on the flat H*W axis.
    # Tap (di, dj) reads pooled[row+di-3, col+dj-3]; on the flat axis that is a
    # single circular roll by -((di-3)*W + (dj-3)); the precomputed masked
    # weight row zeroes every wrapped / zero-padded read (so the two rolls of
    # the factored formulation compose safely into one).  Four accumulators
    # keep the unrolled multiply-add chain from being one serial dependency.
    acc = [jnp.zeros((bn, hw), jnp.float32) for _ in range(4)]
    for t in range(n_taps):
        di, dj = divmod(t, K)
        shift = (-((di - PAD) * img_w + (dj - PAD))) % hw
        a_tap = avg if shift == 0 else pltpu.roll(avg, shift=shift, axis=1)
        m_tap = mx if shift == 0 else pltpu.roll(mx, shift=shift, axis=1)
        acc[t % 2] = acc[t % 2] + a_tap * wtab_ref[t:t + 1, :]
        acc[2 + t % 2] = acc[2 + t % 2] + m_tap * wtab_ref[n_taps + t:n_taps + t + 1, :]

    conv = (acc[0] + acc[1]) + (acc[2] + acc[3]) + b_ref[0]
    attn = jax.nn.sigmoid(conv)                          # (BN, HW) f32

    # Final scale in the input dtype (no full-tile f32 upcast).
    o_ref[...] = (x * attn.astype(x.dtype)[:, None, :]).astype(o_ref.dtype)


def _vmem_capacity_bytes():
    """Per-core VMEM capacity; conservative (small-VMEM) fallback on failure."""
    try:
        return int(pltpu.get_tpu_info().vmem_capacity_bytes)
    except Exception:
        return 64 * 1024 * 1024


def _choose_block_n(n, c, hw, itemsize, io_budget_bytes, min_block_bytes, min_steps):
    """Images per grid step, from what actually lives in VMEM."""
    # Per image: input + output tiles, each double-buffered by the pipeline
    # (4 copies), with the channel axis padded to the dtype's sublane multiple
    # and H*W padded to a lane multiple, plus ~12 f32 rows of length HW for the
    # in-kernel pooled maps / accumulators / attention.
    sublane = max(1, 32 // itemsize)
    c_pad = -(-c // sublane) * sublane
    hw_pad = -(-hw // 128) * 128
    per_image = 4 * c_pad * hw_pad * itemsize + 12 * hw_pad * 4

    bn = int(max(1, min(n, io_budget_bytes // per_image)))
    # TODO(synk): if one image exceeds the budget (large C*H*W, hit first on
    # 64-MiB-VMEM parts), add a channel-tiling grid axis ('arbitrary') with
    # running sum/max scratch plus a second pass for the scale instead of
    # relying on bn=1 fitting.

    # Prefer at least `min_steps` grid steps (DMA/compute overlap; >=2 per
    # TensorCore on megacore parts) as long as each step keeps at least
    # `min_block_bytes` of I/O.
    if n > 1 and bn > 1:
        split_bn = int(max(1, pl.cdiv(n, min_steps)))
        if split_bn < bn and split_bn * per_image >= min_block_bytes:
            bn = split_bn
    return bn


def spatial_attention(x, w, b):
    """x: (N, C, H, W); w: (1, 2, 7, 7); b: (1,). Returns x * sigmoid(conv(pool))."""
    N, C, H, W = x.shape
    HW = H * W

    x_flat = x.reshape(N, C, HW)                    # lane-dense view (contiguous, free)

    # Precompute the masked conv-weight table on the flat H*W axis:
    # wtab[ci*49 + di*7 + dj, p] = w[0,ci,di,dj] * rowmask[di][p] * colmask[dj][p],
    # where the masks zero taps whose (row+di-3, col+dj-3) lands in the padding.
    flat = jnp.arange(HW, dtype=jnp.int32)
    row, col = flat // W, flat % W
    rmask = jnp.stack([(row + (di - PAD) >= 0) & (row + (di - PAD) < H)
                       for di in range(K)]).astype(jnp.float32)          # (K, HW)
    cmask = jnp.stack([(col + (dj - PAD) >= 0) & (col + (dj - PAD) < W)
                       for dj in range(K)]).astype(jnp.float32)          # (K, HW)
    tap_mask = (rmask[:, None, :] * cmask[None, :, :]).reshape(K * K, HW)
    wtab = (w.reshape(2, K * K, 1).astype(jnp.float32)
            * tap_mask[None]).reshape(2 * K * K, HW)                     # (98, HW)
    b_flat = b.reshape(-1).astype(jnp.float32)                           # (1,)

    # Generation-aware VMEM budgeting: 64-MiB parts (v7x, 2 TensorCores) get a
    # smaller I/O budget / vmem limit but more grid steps; 128-MiB parts
    # (v5e/v6e, 1 TensorCore) get larger blocks and only enough steps for
    # pipeline overlap.
    vmem_cap = _vmem_capacity_bytes()
    small_vmem = vmem_cap <= 80 * 1024 * 1024
    io_budget = (14 if small_vmem else 36) * 1024 * 1024
    vmem_limit = (40 if small_vmem else 64) * 1024 * 1024
    min_steps = 4 if small_vmem else 3
    min_block_bytes = (2 if small_vmem else 1) * 1024 * 1024

    # The (double-buffered) weight table is resident VMEM: take it off the budget.
    hw_pad = -(-HW // 128) * 128
    wtab_vmem = 2 * (-(-(2 * K * K) // 8) * 8) * hw_pad * 4
    io_budget = max(io_budget - wtab_vmem, 2 * 1024 * 1024)
    # TODO(synk): for very large H*W (weight table >> a few MiB) fall back to the
    # factored rowmask/colmask + SMEM-scalar-weight formulation.

    itemsize = jnp.dtype(x.dtype).itemsize
    block_n = _choose_block_n(N, C, HW, itemsize, io_budget, min_block_bytes, min_steps)
    grid_n = int(pl.cdiv(N, block_n))               # ragged last block is padded/masked

    kernel = functools.partial(_spatial_attention_kernel, img_w=W)

    out_flat = pl.pallas_call(
        kernel,
        out_shape=jax.ShapeDtypeStruct((N, C, HW), x.dtype),
        grid=(grid_n,),
        in_specs=[
            pl.BlockSpec(memory_space=pltpu.MemorySpace.SMEM),     # conv bias
            pl.BlockSpec((2 * K * K, HW), lambda n: (0, 0)),       # masked weight table
            pl.BlockSpec((block_n, C, HW), lambda n: (n, 0, 0)),   # x tile
        ],
        out_specs=pl.BlockSpec((block_n, C, HW), lambda n: (n, 0, 0)),
        compiler_params=pltpu.CompilerParams(
            dimension_semantics=("parallel",),
            vmem_limit_bytes=vmem_limit,
        ),
    )(b_flat, wtab, x_flat)

    return out_flat.reshape(N, C, H, W)


def ref_forward(x, w, b):
    """Pure-JAX reference matching the PyTorch forward exactly."""
    avg = jnp.mean(x, axis=1, keepdims=True)
    mx = jnp.max(x, axis=1, keepdims=True)
    pool = jnp.concatenate([avg, mx], axis=1)                 # (N, 2, H, W)
    conv = lax.conv_general_dilated(
        pool, w, window_strides=(1, 1), padding=((PAD, PAD), (PAD, PAD)),
        dimension_numbers=("NCHW", "OIHW", "NCHW"))
    attn = jax.nn.sigmoid(conv + b.reshape(1, 1, 1, 1))
    return x * attn


if __name__ == "__main__":
    key = jax.random.PRNGKey(0)
    kx, kw, kb = jax.random.split(key, 3)

    N, C, H, W = 2, 4, 16, 16
    x = jax.random.normal(kx, (N, C, H, W), jnp.float32)

    # Deterministic init for nn.Conv2d(2, 1, kernel_size=7, padding=3):
    # uniform(-1/sqrt(fan_in), 1/sqrt(fan_in)), fan_in = 2*7*7.
    fan_in = 2 * K * K
    bound = 1.0 / (fan_in ** 0.5)
    w = jax.random.uniform(kw, (1, 2, K, K), jnp.float32, -bound, bound)
    b = jax.random.uniform(kb, (1,), jnp.float32, -bound, bound)

    out = jax.block_until_ready(spatial_attention(x, w, b))
    ref = ref_forward(x, w, b)

    assert out.shape == x.shape and out.dtype == x.dtype
    if not bool(jnp.allclose(out, ref, atol=1e-5, rtol=1e-5)):
        raise SystemExit("mismatch vs reference")
    print("KERNEL_OK")
</pallas_src>

<mosaic_0001>
module attributes {stable_mosaic.version = 11 : i64} {
  func.func @_spatial_attention_kernel(%arg0: i32, %arg1: memref<1xf32, #tpu.memory_space<smem>>, %arg2: memref<98x256xf32, #tpu.memory_space<vmem>>, %arg3: memref<2x4x256xf32, #tpu.memory_space<vmem>>, %arg4: memref<2x4x256xf32, #tpu.memory_space<vmem>>) attributes {dimension_semantics = [#tpu.dimension_semantics<parallel>], iteration_bounds = array<i64: 1>, scalar_prefetch = 0 : i64, scratch_operands = 0 : i64, tpu.core_type = #tpu.core_type<tc>, window_params = [{transform_indices = @transform_0, window_bounds = array<i64: 1>}, {pipeline_mode = #tpu.pipeline_mode<synchronous>, transform_indices = @transform_1, window_bounds = array<i64: 98, 256>}, {transform_indices = @transform_2, window_bounds = array<i64: 2, 4, 256>}, {transform_indices = @transform_3, window_bounds = array<i64: 2, 4, 256>}]} {
    %c0 = arith.constant 0 : index
    %c0_0 = arith.constant 0 : index
    %c0_1 = arith.constant 0 : index
    %0 = vector.load %arg3[%c0, %c0_0, %c0_1] : memref<2x4x256xf32, #tpu.memory_space<vmem>>, vector<2x4x256xf32>
    %cst = arith.constant dense<0.000000e+00> : vector<2x256xf32>
    %1 = vector.multi_reduction <add>, %0, %cst [1] : vector<2x4x256xf32> to vector<2x256xf32>
    %cst_2 = arith.constant 4.000000e+00 : f32
    %2 = vector.broadcast %cst_2 : f32 to vector<2x256xf32>
    %3 = arith.divf %1, %2 : vector<2x256xf32>
    %cst_3 = arith.constant dense<0xFF800000> : vector<2x256xf32>
    %4 = vector.multi_reduction <maximumf>, %0, %cst_3 [1] : vector<2x4x256xf32> to vector<2x256xf32>
    %cst_4 = arith.constant 0.000000e+00 : f32
    %5 = vector.broadcast %cst_4 : f32 to vector<2x256xf32>
    %cst_5 = arith.constant 0.000000e+00 : f32
    %6 = vector.broadcast %cst_5 : f32 to vector<2x256xf32>
    %cst_6 = arith.constant 0.000000e+00 : f32
    %7 = vector.broadcast %cst_6 : f32 to vector<2x256xf32>
    %cst_7 = arith.constant 0.000000e+00 : f32
    %8 = vector.broadcast %cst_7 : f32 to vector<2x256xf32>
    %c51_i32 = arith.constant 51 : i32
    %9 = tpu.dynamic_rotate %3 by %c51_i32 dim 1 : vector<2x256xf32>, i32 -> vector<2x256xf32>
    %c51_i32_8 = arith.constant 51 : i32
    %10 = tpu.dynamic_rotate %4 by %c51_i32_8 dim 1 : vector<2x256xf32>, i32 -> vector<2x256xf32>
    %c0_9 = arith.constant 0 : index
    %c0_10 = arith.constant 0 : index
    %11 = vector.load %arg2[%c0_9, %c0_10] : memref<98x256xf32, #tpu.memory_space<vmem>>, vector<1x256xf32>
    %12 = vector.broadcast %11 : vector<1x256xf32> to vector<2x256xf32>
    %13 = arith.mulf %9, %12 : vector<2x256xf32>
    %14 = arith.addf %5, %13 : vector<2x256xf32>
    %c49 = arith.constant 49 : index
    %c0_11 = arith.constant 0 : index
    %15 = vector.load %arg2[%c49, %c0_11] : memref<98x256xf32, #tpu.memory_space<vmem>>, vector<1x256xf32>
    %16 = vector.broadcast %15 : vector<1x256xf32> to vector<2x256xf32>
    %17 = arith.mulf %10, %16 : vector<2x256xf32>
    %18 = arith.addf %7, %17 : vector<2x256xf32>
    %c50_i32 = arith.constant 50 : i32
    %19 = tpu.dynamic_rotate %3 by %c50_i32 dim 1 : vector<2x256xf32>, i32 -> vector<2x256xf32>
    %c50_i32_12 = arith.constant 50 : i32
    %20 = tpu.dynamic_rotate %4 by %c50_i32_12 dim 1 : vector<2x256xf32>, i32 -> vector<2x256xf32>
    %c1 = arith.constant 1 : index
    %c0_13 = arith.constant 0 : index
    %21 = vector.load %arg2[%c1, %c0_13] : memref<98x256xf32, #tpu.memory_space<vmem>>, vector<1x256xf32>
    %22 = vector.broadcast %21 : vector<1x256xf32> to vector<2x256xf32>
    %23 = arith.mulf %19, %22 : vector<2x256xf32>
    %24 = arith.addf %6, %23 : vector<2x256xf32>
    %c50 = arith.constant 50 : index
    %c0_14 = arith.constant 0 : index
    %25 = vector.load %arg2[%c50, %c0_14] : memref<98x256xf32, #tpu.memory_space<vmem>>, vector<1x256xf32>
    %26 = vector.broadcast %25 : vector<1x256xf32> to vector<2x256xf32>
    %27 = arith.mulf %20, %26 : vector<2x256xf32>
    %28 = arith.addf %8, %27 : vector<2x256xf32>
    %c49_i32 = arith.constant 49 : i32
    %29 = tpu.dynamic_rotate %3 by %c49_i32 dim 1 : vector<2x256xf32>, i32 -> vector<2x256xf32>
    %c49_i32_15 = arith.constant 49 : i32
    %30 = tpu.dynamic_rotate %4 by %c49_i32_15 dim 1 : vector<2x256xf32>, i32 -> vector<2x256xf32>
    %c2 = arith.constant 2 : index
    %c0_16 = arith.constant 0 : index
    %31 = vector.load %arg2[%c2, %c0_16] : memref<98x256xf32, #tpu.memory_space<vmem>>, vector<1x256xf32>
    %32 = vector.broadcast %31 : vector<1x256xf32> to vector<2x256xf32>
    %33 = arith.mulf %29, %32 : vector<2x256xf32>
    %34 = arith.addf %14, %33 : vector<2x256xf32>
    %c51 = arith.constant 51 : index
    %c0_17 = arith.constant 0 : index
    %35 = vector.load %arg2[%c51, %c0_17] : memref<98x256xf32, #tpu.memory_space<vmem>>, vector<1x256xf32>
    %36 = vector.broadcast %35 : vector<1x256xf32> to vector<2x256xf32>
    %37 = arith.mulf %30, %36 : vector<2x256xf32>
    %38 = arith.addf %18, %37 : vector<2x256xf32>
    %c48_i32 = arith.constant 48 : i32
    %39 = tpu.dynamic_rotate %3 by %c48_i32 dim 1 : vector<2x256xf32>, i32 -> vector<2x256xf32>
    %c48_i32_18 = arith.constant 48 : i32
    %40 = tpu.dynamic_rotate %4 by %c48_i32_18 dim 1 : vector<2x256xf32>, i32 -> vector<2x256xf32>
    %c3 = arith.constant 3 : index
    %c0_19 = arith.constant 0 : index
    %41 = vector.load %arg2[%c3, %c0_19] : memref<98x256xf32, #tpu.memory_space<vmem>>, vector<1x256xf32>
    %42 = vector.broadcast %41 : vector<1x256xf32> to vector<2x256xf32>
    %43 = arith.mulf %39, %42 : vector<2x256xf32>
    %44 = arith.addf %24, %43 : vector<2x256xf32>
    %c52 = arith.constant 52 : index
    %c0_20 = arith.constant 0 : index
    %45 = vector.load %arg2[%c52, %c0_20] : memref<98x256xf32, #tpu.memory_space<vmem>>, vector<1x256xf32>
    %46 = vector.broadcast %45 : vector<1x256xf32> to vector<2x256xf32>
    %47 = arith.mulf %40, %46 : vector<2x256xf32>
    %48 = arith.addf %28, %47 : vector<2x256xf32>
    %c47_i32 = arith.constant 47 : i32
    %49 = tpu.dynamic_rotate %3 by %c47_i32 dim 1 : vector<2x256xf32>, i32 -> vector<2x256xf32>
    %c47_i32_21 = arith.constant 47 : i32
    %50 = tpu.dynamic_rotate %4 by %c47_i32_21 dim 1 : vector<2x256xf32>, i32 -> vector<2x256xf32>
    %c4 = arith.constant 4 : index
    %c0_22 = arith.constant 0 : index
    %51 = vector.load %arg2[%c4, %c0_22] : memref<98x256xf32, #tpu.memory_space<vmem>>, vector<1x256xf32>
    %52 = vector.broadcast %51 : vector<1x256xf32> to vector<2x256xf32>
    %53 = arith.mulf %49, %52 : vector<2x256xf32>
    %54 = arith.addf %34, %53 : vector<2x256xf32>
    %c53 = arith.constant 53 : index
    %c0_23 = arith.constant 0 : index
    %55 = vector.load %arg2[%c53, %c0_23] : memref<98x256xf32, #tpu.memory_space<vmem>>, vector<1x256xf32>
    %56 = vector.broadcast %55 : vector<1x256xf32> to vector<2x256xf32>
    %57 = arith.mulf %50, %56 : vector<2x256xf32>
    %58 = arith.addf %38, %57 : vector<2x256xf32>
    %c46_i32 = arith.constant 46 : i32
    %59 = tpu.dynamic_rotate %3 by %c46_i32 dim 1 : vector<2x256xf32>, i32 -> vector<2x256xf32>
    %c46_i32_24 = arith.constant 46 : i32
    %60 = tpu.dynamic_rotate %4 by %c46_i32_24 dim 1 : vector<2x256xf32>, i32 -> vector<2x256xf32>
    %c5 = arith.constant 5 : index
    %c0_25 = arith.constant 0 : index
    %61 = vector.load %arg2[%c5, %c0_25] : memref<98x256xf32, #tpu.memory_space<vmem>>, vector<1x256xf32>
    %62 = vector.broadcast %61 : vector<1x256xf32> to vector<2x256xf32>
    %63 = arith.mulf %59, %62 : vector<2x256xf32>
    %64 = arith.addf %44, %63 : vector<2x256xf32>
    %c54 = arith.constant 54 : index
    %c0_26 = arith.constant 0 : index
    %65 = vector.load %arg2[%c54, %c0_26] : memref<98x256xf32, #tpu.memory_space<vmem>>, vector<1x256xf32>
    %66 = vector.broadcast %65 : vector<1x256xf32> to vector<2x256xf32>
    %67 = arith.mulf %60, %66 : vector<2x256xf32>
    %68 = arith.addf %48, %67 : vector<2x256xf32>
    %c45_i32 = arith.constant 45 : i32
    %69 = tpu.dynamic_rotate %3 by %c45_i32 dim 1 : vector<2x256xf32>, i32 -> vector<2x256xf32>
    %c45_i32_27 = arith.constant 45 : i32
    %70 = tpu.dynamic_rotate %4 by %c45_i32_27 dim 1 : vector<2x256xf32>, i32 -> vector<2x256xf32>
    %c6 = arith.constant 6 : index
    %c0_28 = arith.constant 0 : index
    %71 = vector.load %arg2[%c6, %c0_28] : memref<98x256xf32, #tpu.memory_space<vmem>>, vector<1x256xf32>
    %72 = vector.broadcast %71 : vector<1x256xf32> to vector<2x256xf32>
    %73 = arith.mulf %69, %72 : vector<2x256xf32>
    %74 = arith.addf %54, %73 : vector<2x256xf32>
    %c55 = arith.constant 55 : index
    %c0_29 = arith.constant 0 : index
    %75 = vector.load %arg2[%c55, %c0_29] : memref<98x256xf32, #tpu.memory_space<vmem>>, vector<1x256xf32>
    %76 = vector.broadcast %75 : vector<1x256xf32> to vector<2x256xf32>
    %77 = arith.mulf %70, %76 : vector<2x256xf32>
    %78 = arith.addf %58, %77 : vector<2x256xf32>
    %c35_i32 = arith.constant 35 : i32
    %79 = tpu.dynamic_rotate %3 by %c35_i32 dim 1 : vector<2x256xf32>, i32 -> vector<2x256xf32>
    %c35_i32_30 = arith.constant 35 : i32
    %80 = tpu.dynamic_rotate %4 by %c35_i32_30 dim 1 : vector<2x256xf32>, i32 -> vector<2x256xf32>
    %c7 = arith.constant 7 : index
    %c0_31 = arith.constant 0 : index
    %81 = vector.load %arg2[%c7, %c0_31] : memref<98x256xf32, #tpu.memory_space<vmem>>, vector<1x256xf32>
    %82 = vector.broadcast %81 : vector<1x256xf32> to vector<2x256xf32>
    %83 = arith.mulf %79, %82 : vector<2x256xf32>
    %84 = arith.addf %64, %83 : vector<2x256xf32>
    %c56 = arith.constant 56 : index
    %c0_32 = arith.constant 0 : index
    %85 = vector.load %arg2[%c56, %c0_32] : memref<98x256xf32, #tpu.memory_space<vmem>>, vector<1x256xf32>
    %86 = vector.broadcast %85 : vector<1x256xf32> to vector<2x256xf32>
    %87 = arith.mulf %80, %86 : vector<2x256xf32>
    %88 = arith.addf %68, %87 : vector<2x256xf32>
    %c34_i32 = arith.constant 34 : i32
    %89 = tpu.dynamic_rotate %3 by %c34_i32 dim 1 : vector<2x256xf32>, i32 -> vector<2x256xf32>
    %c34_i32_33 = arith.constant 34 : i32
    %90 = tpu.dynamic_rotate %4 by %c34_i32_33 dim 1 : vector<2x256xf32>, i32 -> vector<2x256xf32>
    %c8 = arith.constant 8 : index
    %c0_34 = arith.constant 0 : index
    %91 = vector.load %arg2[%c8, %c0_34] : memref<98x256xf32, #tpu.memory_space<vmem>>, vector<1x256xf32>
    %92 = vector.broadcast %91 : vector<1x256xf32> to vector<2x256xf32>
    %93 = arith.mulf %89, %92 : vector<2x256xf32>
    %94 = arith.addf %74, %93 : vector<2x256xf32>
    %c57 = arith.constant 57 : index
    %c0_35 = arith.constant 0 : index
    %95 = vector.load %arg2[%c57, %c0_35] : memref<98x256xf32, #tpu.memory_space<vmem>>, vector<1x256xf32>
    %96 = vector.broadcast %95 : vector<1x256xf32> to vector<2x256xf32>
    %97 = arith.mulf %90, %96 : vector<2x256xf32>
    %98 = arith.addf %78, %97 : vector<2x256xf32>
    %c33_i32 = arith.constant 33 : i32
    %99 = tpu.dynamic_rotate %3 by %c33_i32 dim 1 : vector<2x256xf32>, i32 -> vector<2x256xf32>
    %c33_i32_36 = arith.constant 33 : i32
    %100 = tpu.dynamic_rotate %4 by %c33_i32_36 dim 1 : vector<2x256xf32>, i32 -> vector<2x256xf32>
    %c9 = arith.constant 9 : index
    %c0_37 = arith.constant 0 : index
    %101 = vector.load %arg2[%c9, %c0_37] : memref<98x256xf32, #tpu.memory_space<vmem>>, vector<1x256xf32>
    %102 = vector.broadcast %101 : vector<1x256xf32> to vector<2x256xf32>
    %103 = arith.mulf %99, %102 : vector<2x256xf32>
    %104 = arith.addf %84, %103 : vector<2x256xf32>
    %c58 = arith.constant 58 : index
    %c0_38 = arith.constant 0 : index
    %105 = vector.load %arg2[%c58, %c0_38] : memref<98x256xf32, #tpu.memory_space<vmem>>, vector<1x256xf32>
    %106 = vector.broadcast %105 : vector<1x256xf32> to vector<2x256xf32>
    %107 = arith.mulf %100, %106 : vector<2x256xf32>
    %108 = arith.addf %88, %107 : vector<2x256xf32>
    %c32_i32 = arith.constant 32 : i32
    %109 = tpu.dynamic_rotate %3 by %c32_i32 dim 1 : vector<2x256xf32>, i32 -> vector<2x256xf32>
    %c32_i32_39 = arith.constant 32 : i32
    %110 = tpu.dynamic_rotate %4 by %c32_i32_39 dim 1 : vector<2x256xf32>, i32 -> vector<2x256xf32>
    %c10 = arith.constant 10 : index
    %c0_40 = arith.constant 0 : index
    %111 = vector.load %arg2[%c10, %c0_40] : memref<98x256xf32, #tpu.memory_space<vmem>>, vector<1x256xf32>
    %112 = vector.broadcast %111 : vector<1x256xf32> to vector<2x256xf32>
    %113 = arith.mulf %109, %112 : vector<2x256xf32>
    %114 = arith.addf %94, %113 : vector<2x256xf32>
    %c59 = arith.constant 59 : index
    %c0_41 = arith.constant 0 : index
    %115 = vector.load %arg2[%c59, %c0_41] : memref<98x256xf32, #tpu.memory_space<vmem>>, vector<1x256xf32>
    %116 = vector.broadcast %115 : vector<1x256xf32> to vector<2x256xf32>
    %117 = arith.mulf %110, %116 : vector<2x256xf32>
    %118 = arith.addf %98, %117 : vector<2x256xf32>
    %c31_i32 = arith.constant 31 : i32
    %119 = tpu.dynamic_rotate %3 by %c31_i32 dim 1 : vector<2x256xf32>, i32 -> vector<2x256xf32>
    %c31_i32_42 = arith.constant 31 : i32
    %120 = tpu.dynamic_rotate %4 by %c31_i32_42 dim 1 : vector<2x256xf32>, i32 -> vector<2x256xf32>
    %c11 = arith.constant 11 : index
    %c0_43 = arith.constant 0 : index
    %121 = vector.load %arg2[%c11, %c0_43] : memref<98x256xf32, #tpu.memory_space<vmem>>, vector<1x256xf32>
    %122 = vector.broadcast %121 : vector<1x256xf32> to vector<2x256xf32>
    %123 = arith.mulf %119, %122 : vector<2x256xf32>
    %124 = arith.addf %104, %123 : vector<2x256xf32>
    %c60 = arith.constant 60 : index
    %c0_44 = arith.constant 0 : index
    %125 = vector.load %arg2[%c60, %c0_44] : memref<98x256xf32, #tpu.memory_space<vmem>>, vector<1x256xf32>
    %126 = vector.broadcast %125 : vector<1x256xf32> to vector<2x256xf32>
    %127 = arith.mulf %120, %126 : vector<2x256xf32>
    %128 = arith.addf %108, %127 : vector<2x256xf32>
    %c30_i32 = arith.constant 30 : i32
    %129 = tpu.dynamic_rotate %3 by %c30_i32 dim 1 : vector<2x256xf32>, i32 -> vector<2x256xf32>
    %c30_i32_45 = arith.constant 30 : i32
    %130 = tpu.dynamic_rotate %4 by %c30_i32_45 dim 1 : vector<2x256xf32>, i32 -> vector<2x256xf32>
    %c12 = arith.constant 12 : index
    %c0_46 = arith.constant 0 : index
    %131 = vector.load %arg2[%c12, %c0_46] : memref<98x256xf32, #tpu.memory_space<vmem>>, vector<1x256xf32>
    %132 = vector.broadcast %131 : vector<1x256xf32> to vector<2x256xf32>
    %133 = arith.mulf %129, %132 : vector<2x256xf32>
    %134 = arith.addf %114, %133 : vector<2x256xf32>
    %c61 = arith.constant 61 : index
    %c0_47 = arith.constant 0 : index
    %135 = vector.load %arg2[%c61, %c0_47] : memref<98x256xf32, #tpu.memory_space<vmem>>, vector<1x256xf32>
    %136 = vector.broadcast %135 : vector<1x256xf32> to vector<2x256xf32>
    %137 = arith.mulf %130, %136 : vector<2x256xf32>
    %138 = arith.addf %118, %137 : vector<2x256xf32>
    %c29_i32 = arith.constant 29 : i32
    %139 = tpu.dynamic_rotate %3 by %c29_i32 dim 1 : vector<2x256xf32>, i32 -> vector<2x256xf32>
    %c29_i32_48 = arith.constant 29 : i32
    %140 = tpu.dynamic_rotate %4 by %c29_i32_48 dim 1 : vector<2x256xf32>, i32 -> vector<2x256xf32>
    %c13 = arith.constant 13 : index
    %c0_49 = arith.constant 0 : index
    %141 = vector.load %arg2[%c13, %c0_49] : memref<98x256xf32, #tpu.memory_space<vmem>>, vector<1x256xf32>
    %142 = vector.broadcast %141 : vector<1x256xf32> to vector<2x256xf32>
    %143 = arith.mulf %139, %142 : vector<2x256xf32>
    %144 = arith.addf %124, %143 : vector<2x256xf32>
    %c62 = arith.constant 62 : index
    %c0_50 = arith.constant 0 : index
    %145 = vector.load %arg2[%c62, %c0_50] : memref<98x256xf32, #tpu.memory_space<vmem>>, vector<1x256xf32>
    %146 = vector.broadcast %145 : vector<1x256xf32> to vector<2x256xf32>
    %147 = arith.mulf %140, %146 : vector<2x256xf32>
    %148 = arith.addf %128, %147 : vector<2x256xf32>
    %c19_i32 = arith.constant 19 : i32
    %149 = tpu.dynamic_rotate %3 by %c19_i32 dim 1 : vector<2x256xf32>, i32 -> vector<2x256xf32>
    %c19_i32_51 = arith.constant 19 : i32
    %150 = tpu.dynamic_rotate %4 by %c19_i32_51 dim 1 : vector<2x256xf32>, i32 -> vector<2x256xf32>
    %c14 = arith.constant 14 : index
    %c0_52 = arith.constant 0 : index
    %151 = vector.load %arg2[%c14, %c0_52] : memref<98x256xf32, #tpu.memory_space<vmem>>, vector<1x256xf32>
    %152 = vector.broadcast %151 : vector<1x256xf32> to vector<2x256xf32>
    %153 = arith.mulf %149, %152 : vector<2x256xf32>
    %154 = arith.addf %134, %153 : vector<2x256xf32>
    %c63 = arith.constant 63 : index
    %c0_53 = arith.constant 0 : index
    %155 = vector.load %arg2[%c63, %c0_53] : memref<98x256xf32, #tpu.memory_space<vmem>>, vector<1x256xf32>
    %156 = vector.broadcast %155 : vector<1x256xf32> to vector<2x256xf32>
    %157 = arith.mulf %150, %156 : vector<2x256xf32>
    %158 = arith.addf %138, %157 : vector<2x256xf32>
    %c18_i32 = arith.constant 18 : i32
    %159 = tpu.dynamic_rotate %3 by %c18_i32 dim 1 : vector<2x256xf32>, i32 -> vector<2x256xf32>
    %c18_i32_54 = arith.constant 18 : i32
    %160 = tpu.dynamic_rotate %4 by %c18_i32_54 dim 1 : vector<2x256xf32>, i32 -> vector<2x256xf32>
    %c15 = arith.constant 15 : index
    %c0_55 = arith.constant 0 : index
    %161 = vector.load %arg2[%c15, %c0_55] : memref<98x256xf32, #tpu.memory_space<vmem>>, vector<1x256xf32>
    %162 = vector.broadcast %161 : vector<1x256xf32> to vector<2x256xf32>
    %163 = arith.mulf %159, %162 : vector<2x256xf32>
    %164 = arith.addf %144, %163 : vector<2x256xf32>
    %c64 = arith.constant 64 : index
    %c0_56 = arith.constant 0 : index
    %165 = vector.load %arg2[%c64, %c0_56] : memref<98x256xf32, #tpu.memory_space<vmem>>, vector<1x256xf32>
    %166 = vector.broadcast %165 : vector<1x256xf32> to vector<2x256xf32>
    %167 = arith.mulf %160, %166 : vector<2x256xf32>
    %168 = arith.addf %148, %167 : vector<2x256xf32>
    %c17_i32 = arith.constant 17 : i32
    %169 = tpu.dynamic_rotate %3 by %c17_i32 dim 1 : vector<2x256xf32>, i32 -> vector<2x256xf32>
    %c17_i32_57 = arith.constant 17 : i32
    %170 = tpu.dynamic_rotate %4 by %c17_i32_57 dim 1 : vector<2x256xf32>, i32 -> vector<2x256xf32>
    %c16 = arith.constant 16 : index
    %c0_58 = arith.constant 0 : index
    %171 = vector.load %arg2[%c16, %c0_58] : memref<98x256xf32, #tpu.memory_space<vmem>>, vector<1x256xf32>
    %172 = vector.broadcast %171 : vector<1x256xf32> to vector<2x256xf32>
    %173 = arith.mulf %169, %172 : vector<2x256xf32>
    %174 = arith.addf %154, %173 : vector<2x256xf32>
    %c65 = arith.constant 65 : index
    %c0_59 = arith.constant 0 : index
    %175 = vector.load %arg2[%c65, %c0_59] : memref<98x256xf32, #tpu.memory_space<vmem>>, vector<1x256xf32>
    %176 = vector.broadcast %175 : vector<1x256xf32> to vector<2x256xf32>
    %177 = arith.mulf %170, %176 : vector<2x256xf32>
    %178 = arith.addf %158, %177 : vector<2x256xf32>
    %c16_i32 = arith.constant 16 : i32
    %179 = tpu.dynamic_rotate %3 by %c16_i32 dim 1 : vector<2x256xf32>, i32 -> vector<2x256xf32>
    %c16_i32_60 = arith.constant 16 : i32
    %180 = tpu.dynamic_rotate %4 by %c16_i32_60 dim 1 : vector<2x256xf32>, i32 -> vector<2x256xf32>
    %c17 = arith.constant 17 : index
    %c0_61 = arith.constant 0 : index
    %181 = vector.load %arg2[%c17, %c0_61] : memref<98x256xf32, #tpu.memory_space<vmem>>, vector<1x256xf32>
    %182 = vector.broadcast %181 : vector<1x256xf32> to vector<2x256xf32>
    %183 = arith.mulf %179, %182 : vector<2x256xf32>
    %184 = arith.addf %164, %183 : vector<2x256xf32>
    %c66 = arith.constant 66 : index
    %c0_62 = arith.constant 0 : index
    %185 = vector.load %arg2[%c66, %c0_62] : memref<98x256xf32, #tpu.memory_space<vmem>>, vector<1x256xf32>
    %186 = vector.broadcast %185 : vector<1x256xf32> to vector<2x256xf32>
    %187 = arith.mulf %180, %186 : vector<2x256xf32>
    %188 = arith.addf %168, %187 : vector<2x256xf32>
    %c15_i32 = arith.constant 15 : i32
    %189 = tpu.dynamic_rotate %3 by %c15_i32 dim 1 : vector<2x256xf32>, i32 -> vector<2x256xf32>
    %c15_i32_63 = arith.constant 15 : i32
    %190 = tpu.dynamic_rotate %4 by %c15_i32_63 dim 1 : vector<2x256xf32>, i32 -> vector<2x256xf32>
    %c18 = arith.constant 18 : index
    %c0_64 = arith.constant 0 : index
    %191 = vector.load %arg2[%c18, %c0_64] : memref<98x256xf32, #tpu.memory_space<vmem>>, vector<1x256xf32>
    %192 = vector.broadcast %191 : vector<1x256xf32> to vector<2x256xf32>
    %193 = arith.mulf %189, %192 : vector<2x256xf32>
    %194 = arith.addf %174, %193 : vector<2x256xf32>
    %c67 = arith.constant 67 : index
    %c0_65 = arith.constant 0 : index
    %195 = vector.load %arg2[%c67, %c0_65] : memref<98x256xf32, #tpu.memory_space<vmem>>, vector<1x256xf32>
    %196 = vector.broadcast %195 : vector<1x256xf32> to vector<2x256xf32>
    %197 = arith.mulf %190, %196 : vector<2x256xf32>
    %198 = arith.addf %178, %197 : vector<2x256xf32>
    %c14_i32 = arith.constant 14 : i32
    %199 = tpu.dynamic_rotate %3 by %c14_i32 dim 1 : vector<2x256xf32>, i32 -> vector<2x256xf32>
    %c14_i32_66 = arith.constant 14 : i32
    %200 = tpu.dynamic_rotate %4 by %c14_i32_66 dim 1 : vector<2x256xf32>, i32 -> vector<2x256xf32>
    %c19 = arith.constant 19 : index
    %c0_67 = arith.constant 0 : index
    %201 = vector.load %arg2[%c19, %c0_67] : memref<98x256xf32, #tpu.memory_space<vmem>>, vector<1x256xf32>
    %202 = vector.broadcast %201 : vector<1x256xf32> to vector<2x256xf32>
    %203 = arith.mulf %199, %202 : vector<2x256xf32>
    %204 = arith.addf %184, %203 : vector<2x256xf32>
    %c68 = arith.constant 68 : index
    %c0_68 = arith.constant 0 : index
    %205 = vector.load %arg2[%c68, %c0_68] : memref<98x256xf32, #tpu.memory_space<vmem>>, vector<1x256xf32>
    %206 = vector.broadcast %205 : vector<1x256xf32> to vector<2x256xf32>
    %207 = arith.mulf %200, %206 : vector<2x256xf32>
    %208 = arith.addf %188, %207 : vector<2x256xf32>
    %c13_i32 = arith.constant 13 : i32
    %209 = tpu.dynamic_rotate %3 by %c13_i32 dim 1 : vector<2x256xf32>, i32 -> vector<2x256xf32>
    %c13_i32_69 = arith.constant 13 : i32
    %210 = tpu.dynamic_rotate %4 by %c13_i32_69 dim 1 : vector<2x256xf32>, i32 -> vector<2x256xf32>
    %c20 = arith.constant 20 : index
    %c0_70 = arith.constant 0 : index
    %211 = vector.load %arg2[%c20, %c0_70] : memref<98x256xf32, #tpu.memory_space<vmem>>, vector<1x256xf32>
    %212 = vector.broadcast %211 : vector<1x256xf32> to vector<2x256xf32>
    %213 = arith.mulf %209, %212 : vector<2x256xf32>
    %214 = arith.addf %194, %213 : vector<2x256xf32>
    %c69 = arith.constant 69 : index
    %c0_71 = arith.constant 0 : index
    %215 = vector.load %arg2[%c69, %c0_71] : memref<98x256xf32, #tpu.memory_space<vmem>>, vector<1x256xf32>
    %216 = vector.broadcast %215 : vector<1x256xf32> to vector<2x256xf32>
    %217 = arith.mulf %210, %216 : vector<2x256xf32>
    %218 = arith.addf %198, %217 : vector<2x256xf32>
    %c3_i32 = arith.constant 3 : i32
    %219 = tpu.dynamic_rotate %3 by %c3_i32 dim 1 : vector<2x256xf32>, i32 -> vector<2x256xf32>
    %c3_i32_72 = arith.constant 3 : i32
    %220 = tpu.dynamic_rotate %4 by %c3_i32_72 dim 1 : vector<2x256xf32>, i32 -> vector<2x256xf32>
    %c21 = arith.constant 21 : index
    %c0_73 = arith.constant 0 : index
    %221 = vector.load %arg2[%c21, %c0_73] : memref<98x256xf32, #tpu.memory_space<vmem>>, vector<1x256xf32>
    %222 = vector.broadcast %221 : vector<1x256xf32> to vector<2x256xf32>
    %223 = arith.mulf %219, %222 : vector<2x256xf32>
    %224 = arith.addf %204, %223 : vector<2x256xf32>
    %c70 = arith.constant 70 : index
    %c0_74 = arith.constant 0 : index
    %225 = vector.load %arg2[%c70, %c0_74] : memref<98x256xf32, #tpu.memory_space<vmem>>, vector<1x256xf32>
    %226 = vector.broadcast %225 : vector<1x256xf32> to vector<2x256xf32>
    %227 = arith.mulf %220, %226 : vector<2x256xf32>
    %228 = arith.addf %208, %227 : vector<2x256xf32>
    %c2_i32 = arith.constant 2 : i32
    %229 = tpu.dynamic_rotate %3 by %c2_i32 dim 1 : vector<2x256xf32>, i32 -> vector<2x256xf32>
    %c2_i32_75 = arith.constant 2 : i32
    %230 = tpu.dynamic_rotate %4 by %c2_i32_75 dim 1 : vector<2x256xf32>, i32 -> vector<2x256xf32>
    %c22 = arith.constant 22 : index
    %c0_76 = arith.constant 0 : index
    %231 = vector.load %arg2[%c22, %c0_76] : memref<98x256xf32, #tpu.memory_space<vmem>>, vector<1x256xf32>
    %232 = vector.broadcast %231 : vector<1x256xf32> to vector<2x256xf32>
    %233 = arith.mulf %229, %232 : vector<2x256xf32>
    %234 = arith.addf %214, %233 : vector<2x256xf32>
    %c71 = arith.constant 71 : index
    %c0_77 = arith.constant 0 : index
    %235 = vector.load %arg2[%c71, %c0_77] : memref<98x256xf32, #tpu.memory_space<vmem>>, vector<1x256xf32>
    %236 = vector.broadcast %235 : vector<1x256xf32> to vector<2x256xf32>
    %237 = arith.mulf %230, %236 : vector<2x256xf32>
    %238 = arith.addf %218, %237 : vector<2x256xf32>
    %c1_i32 = arith.constant 1 : i32
    %239 = tpu.dynamic_rotate %3 by %c1_i32 dim 1 : vector<2x256xf32>, i32 -> vector<2x256xf32>
    %c1_i32_78 = arith.constant 1 : i32
    %240 = tpu.dynamic_rotate %4 by %c1_i32_78 dim 1 : vector<2x256xf32>, i32 -> vector<2x256xf32>
    %c23 = arith.constant 23 : index
    %c0_79 = arith.constant 0 : index
    %241 = vector.load %arg2[%c23, %c0_79] : memref<98x256xf32, #tpu.memory_space<vmem>>, vector<1x256xf32>
    %242 = vector.broadcast %241 : vector<1x256xf32> to vector<2x256xf32>
    %243 = arith.mulf %239, %242 : vector<2x256xf32>
    %244 = arith.addf %224, %243 : vector<2x256xf32>
    %c72 = arith.constant 72 : index
    %c0_80 = arith.constant 0 : index
    %245 = vector.load %arg2[%c72, %c0_80] : memref<98x256xf32, #tpu.memory_space<vmem>>, vector<1x256xf32>
    %246 = vector.broadcast %245 : vector<1x256xf32> to vector<2x256xf32>
    %247 = arith.mulf %240, %246 : vector<2x256xf32>
    %248 = arith.addf %228, %247 : vector<2x256xf32>
    %c24 = arith.constant 24 : index
    %c0_81 = arith.constant 0 : index
    %249 = vector.load %arg2[%c24, %c0_81] : memref<98x256xf32, #tpu.memory_space<vmem>>, vector<1x256xf32>
    %250 = vector.broadcast %249 : vector<1x256xf32> to vector<2x256xf32>
    %251 = arith.mulf %3, %250 : vector<2x256xf32>
    %252 = arith.addf %234, %251 : vector<2x256xf32>
    %c73 = arith.constant 73 : index
    %c0_82 = arith.constant 0 : index
    %253 = vector.load %arg2[%c73, %c0_82] : memref<98x256xf32, #tpu.memory_space<vmem>>, vector<1x256xf32>
    %254 = vector.broadcast %253 : vector<1x256xf32> to vector<2x256xf32>
    %255 = arith.mulf %4, %254 : vector<2x256xf32>
    %256 = arith.addf %238, %255 : vector<2x256xf32>
    %c255_i32 = arith.constant 255 : i32
    %257 = tpu.dynamic_rotate %3 by %c255_i32 dim 1 : vector<2x256xf32>, i32 -> vector<2x256xf32>
    %c255_i32_83 = arith.constant 255 : i32
    %258 = tpu.dynamic_rotate %4 by %c255_i32_83 dim 1 : vector<2x256xf32>, i32 -> vector<2x256xf32>
    %c25 = arith.constant 25 : index
    %c0_84 = arith.constant 0 : index
    %259 = vector.load %arg2[%c25, %c0_84] : memref<98x256xf32, #tpu.memory_space<vmem>>, vector<1x256xf32>
    %260 = vector.broadcast %259 : vector<1x256xf32> to vector<2x256xf32>
    %261 = arith.mulf %257, %260 : vector<2x256xf32>
    %262 = arith.addf %244, %261 : vector<2x256xf32>
    %c74 = arith.constant 74 : index
    %c0_85 = arith.constant 0 : index
    %263 = vector.load %arg2[%c74, %c0_85] : memref<98x256xf32, #tpu.memory_space<vmem>>, vector<1x256xf32>
    %264 = vector.broadcast %263 : vector<1x256xf32> to vector<2x256xf32>
    %265 = arith.mulf %258, %264 : vector<2x256xf32>
    %266 = arith.addf %248, %265 : vector<2x256xf32>
    %c254_i32 = arith.constant 254 : i32
    %267 = tpu.dynamic_rotate %3 by %c254_i32 dim 1 : vector<2x256xf32>, i32 -> vector<2x256xf32>
    %c254_i32_86 = arith.constant 254 : i32
    %268 = tpu.dynamic_rotate %4 by %c254_i32_86 dim 1 : vector<2x256xf32>, i32 -> vector<2x256xf32>
    %c26 = arith.constant 26 : index
    %c0_87 = arith.constant 0 : index
    %269 = vector.load %arg2[%c26, %c0_87] : memref<98x256xf32, #tpu.memory_space<vmem>>, vector<1x256xf32>
    %270 = vector.broadcast %269 : vector<1x256xf32> to vector<2x256xf32>
    %271 = arith.mulf %267, %270 : vector<2x256xf32>
    %272 = arith.addf %252, %271 : vector<2x256xf32>
    %c75 = arith.constant 75 : index
    %c0_88 = arith.constant 0 : index
    %273 = vector.load %arg2[%c75, %c0_88] : memref<98x256xf32, #tpu.memory_space<vmem>>, vector<1x256xf32>
    %274 = vector.broadcast %273 : vector<1x256xf32> to vector<2x256xf32>
    %275 = arith.mulf %268, %274 : vector<2x256xf32>
    %276 = arith.addf %256, %275 : vector<2x256xf32>
    %c253_i32 = arith.constant 253 : i32
    %277 = tpu.dynamic_rotate %3 by %c253_i32 dim 1 : vector<2x256xf32>, i32 -> vector<2x256xf32>
    %c253_i32_89 = arith.constant 253 : i32
    %278 = tpu.dynamic_rotate %4 by %c253_i32_89 dim 1 : vector<2x256xf32>, i32 -> vector<2x256xf32>
    %c27 = arith.constant 27 : index
    %c0_90 = arith.constant 0 : index
    %279 = vector.load %arg2[%c27, %c0_90] : memref<98x256xf32, #tpu.memory_space<vmem>>, vector<1x256xf32>
    %280 = vector.broadcast %279 : vector<1x256xf32> to vector<2x256xf32>
    %281 = arith.mulf %277, %280 : vector<2x256xf32>
    %282 = arith.addf %262, %281 : vector<2x256xf32>
    %c76 = arith.constant 76 : index
    %c0_91 = arith.constant 0 : index
    %283 = vector.load %arg2[%c76, %c0_91] : memref<98x256xf32, #tpu.memory_space<vmem>>, vector<1x256xf32>
    %284 = vector.broadcast %283 : vector<1x256xf32> to vector<2x256xf32>
    %285 = arith.mulf %278, %284 : vector<2x256xf32>
    %286 = arith.addf %266, %285 : vector<2x256xf32>
    %c243_i32 = arith.constant 243 : i32
    %287 = tpu.dynamic_rotate %3 by %c243_i32 dim 1 : vector<2x256xf32>, i32 -> vector<2x256xf32>
    %c243_i32_92 = arith.constant 243 : i32
    %288 = tpu.dynamic_rotate %4 by %c243_i32_92 dim 1 : vector<2x256xf32>, i32 -> vector<2x256xf32>
    %c28 = arith.constant 28 : index
    %c0_93 = arith.constant 0 : index
    %289 = vector.load %arg2[%c28, %c0_93] : memref<98x256xf32, #tpu.memory_space<vmem>>, vector<1x256xf32>
    %290 = vector.broadcast %289 : vector<1x256xf32> to vector<2x256xf32>
    %291 = arith.mulf %287, %290 : vector<2x256xf32>
    %292 = arith.addf %272, %291 : vector<2x256xf32>
    %c77 = arith.constant 77 : index
    %c0_94 = arith.constant 0 : index
    %293 = vector.load %arg2[%c77, %c0_94] : memref<98x256xf32, #tpu.memory_space<vmem>>, vector<1x256xf32>
    %294 = vector.broadcast %293 : vector<1x256xf32> to vector<2x256xf32>
    %295 = arith.mulf %288, %294 : vector<2x256xf32>
    %296 = arith.addf %276, %295 : vector<2x256xf32>
    %c242_i32 = arith.constant 242 : i32
    %297 = tpu.dynamic_rotate %3 by %c242_i32 dim 1 : vector<2x256xf32>, i32 -> vector<2x256xf32>
    %c242_i32_95 = arith.constant 242 : i32
    %298 = tpu.dynamic_rotate %4 by %c242_i32_95 dim 1 : vector<2x256xf32>, i32 -> vector<2x256xf32>
    %c29 = arith.constant 29 : index
    %c0_96 = arith.constant 0 : index
    %299 = vector.load %arg2[%c29, %c0_96] : memref<98x256xf32, #tpu.memory_space<vmem>>, vector<1x256xf32>
    %300 = vector.broadcast %299 : vector<1x256xf32> to vector<2x256xf32>
    %301 = arith.mulf %297, %300 : vector<2x256xf32>
    %302 = arith.addf %282, %301 : vector<2x256xf32>
    %c78 = arith.constant 78 : index
    %c0_97 = arith.constant 0 : index
    %303 = vector.load %arg2[%c78, %c0_97] : memref<98x256xf32, #tpu.memory_space<vmem>>, vector<1x256xf32>
    %304 = vector.broadcast %303 : vector<1x256xf32> to vector<2x256xf32>
    %305 = arith.mulf %298, %304 : vector<2x256xf32>
    %306 = arith.addf %286, %305 : vector<2x256xf32>
    %c241_i32 = arith.constant 241 : i32
    %307 = tpu.dynamic_rotate %3 by %c241_i32 dim 1 : vector<2x256xf32>, i32 -> vector<2x256xf32>
    %c241_i32_98 = arith.constant 241 : i32
    %308 = tpu.dynamic_rotate %4 by %c241_i32_98 dim 1 : vector<2x256xf32>, i32 -> vector<2x256xf32>
    %c30 = arith.constant 30 : index
    %c0_99 = arith.constant 0 : index
    %309 = vector.load %arg2[%c30, %c0_99] : memref<98x256xf32, #tpu.memory_space<vmem>>, vector<1x256xf32>
    %310 = vector.broadcast %309 : vector<1x256xf32> to vector<2x256xf32>
    %311 = arith.mulf %307, %310 : vector<2x256xf32>
    %312 = arith.addf %292, %311 : vector<2x256xf32>
    %c79 = arith.constant 79 : index
    %c0_100 = arith.constant 0 : index
    %313 = vector.load %arg2[%c79, %c0_100] : memref<98x256xf32, #tpu.memory_space<vmem>>, vector<1x256xf32>
    %314 = vector.broadcast %313 : vector<1x256xf32> to vector<2x256xf32>
    %315 = arith.mulf %308, %314 : vector<2x256xf32>
    %316 = arith.addf %296, %315 : vector<2x256xf32>
    %c240_i32 = arith.constant 240 : i32
    %317 = tpu.dynamic_rotate %3 by %c240_i32 dim 1 : vector<2x256xf32>, i32 -> vector<2x256xf32>
    %c240_i32_101 = arith.constant 240 : i32
    %318 = tpu.dynamic_rotate %4 by %c240_i32_101 dim 1 : vector<2x256xf32>, i32 -> vector<2x256xf32>
    %c31 = arith.constant 31 : index
    %c0_102 = arith.constant 0 : index
    %319 = vector.load %arg2[%c31, %c0_102] : memref<98x256xf32, #tpu.memory_space<vmem>>, vector<1x256xf32>
    %320 = vector.broadcast %319 : vector<1x256xf32> to vector<2x256xf32>
    %321 = arith.mulf %317, %320 : vector<2x256xf32>
    %322 = arith.addf %302, %321 : vector<2x256xf32>
    %c80 = arith.constant 80 : index
    %c0_103 = arith.constant 0 : index
    %323 = vector.load %arg2[%c80, %c0_103] : memref<98x256xf32, #tpu.memory_space<vmem>>, vector<1x256xf32>
    %324 = vector.broadcast %323 : vector<1x256xf32> to vector<2x256xf32>
    %325 = arith.mulf %318, %324 : vector<2x256xf32>
    %326 = arith.addf %306, %325 : vector<2x256xf32>
    %c239_i32 = arith.constant 239 : i32
    %327 = tpu.dynamic_rotate %3 by %c239_i32 dim 1 : vector<2x256xf32>, i32 -> vector<2x256xf32>
    %c239_i32_104 = arith.constant 239 : i32
    %328 = tpu.dynamic_rotate %4 by %c239_i32_104 dim 1 : vector<2x256xf32>, i32 -> vector<2x256xf32>
    %c32 = arith.constant 32 : index
    %c0_105 = arith.constant 0 : index
    %329 = vector.load %arg2[%c32, %c0_105] : memref<98x256xf32, #tpu.memory_space<vmem>>, vector<1x256xf32>
    %330 = vector.broadcast %329 : vector<1x256xf32> to vector<2x256xf32>
    %331 = arith.mulf %327, %330 : vector<2x256xf32>
    %332 = arith.addf %312, %331 : vector<2x256xf32>
    %c81 = arith.constant 81 : index
    %c0_106 = arith.constant 0 : index
    %333 = vector.load %arg2[%c81, %c0_106] : memref<98x256xf32, #tpu.memory_space<vmem>>, vector<1x256xf32>
    %334 = vector.broadcast %333 : vector<1x256xf32> to vector<2x256xf32>
    %335 = arith.mulf %328, %334 : vector<2x256xf32>
    %336 = arith.addf %316, %335 : vector<2x256xf32>
    %c238_i32 = arith.constant 238 : i32
    %337 = tpu.dynamic_rotate %3 by %c238_i32 dim 1 : vector<2x256xf32>, i32 -> vector<2x256xf32>
    %c238_i32_107 = arith.constant 238 : i32
    %338 = tpu.dynamic_rotate %4 by %c238_i32_107 dim 1 : vector<2x256xf32>, i32 -> vector<2x256xf32>
    %c33 = arith.constant 33 : index
    %c0_108 = arith.constant 0 : index
    %339 = vector.load %arg2[%c33, %c0_108] : memref<98x256xf32, #tpu.memory_space<vmem>>, vector<1x256xf32>
    %340 = vector.broadcast %339 : vector<1x256xf32> to vector<2x256xf32>
    %341 = arith.mulf %337, %340 : vector<2x256xf32>
    %342 = arith.addf %322, %341 : vector<2x256xf32>
    %c82 = arith.constant 82 : index
    %c0_109 = arith.constant 0 : index
    %343 = vector.load %arg2[%c82, %c0_109] : memref<98x256xf32, #tpu.memory_space<vmem>>, vector<1x256xf32>
    %344 = vector.broadcast %343 : vector<1x256xf32> to vector<2x256xf32>
    %345 = arith.mulf %338, %344 : vector<2x256xf32>
    %346 = arith.addf %326, %345 : vector<2x256xf32>
    %c237_i32 = arith.constant 237 : i32
    %347 = tpu.dynamic_rotate %3 by %c237_i32 dim 1 : vector<2x256xf32>, i32 -> vector<2x256xf32>
    %c237_i32_110 = arith.constant 237 : i32
    %348 = tpu.dynamic_rotate %4 by %c237_i32_110 dim 1 : vector<2x256xf32>, i32 -> vector<2x256xf32>
    %c34 = arith.constant 34 : index
    %c0_111 = arith.constant 0 : index
    %349 = vector.load %arg2[%c34, %c0_111] : memref<98x256xf32, #tpu.memory_space<vmem>>, vector<1x256xf32>
    %350 = vector.broadcast %349 : vector<1x256xf32> to vector<2x256xf32>
    %351 = arith.mulf %347, %350 : vector<2x256xf32>
    %352 = arith.addf %332, %351 : vector<2x256xf32>
    %c83 = arith.constant 83 : index
    %c0_112 = arith.constant 0 : index
    %353 = vector.load %arg2[%c83, %c0_112] : memref<98x256xf32, #tpu.memory_space<vmem>>, vector<1x256xf32>
    %354 = vector.broadcast %353 : vector<1x256xf32> to vector<2x256xf32>
    %355 = arith.mulf %348, %354 : vector<2x256xf32>
    %356 = arith.addf %336, %355 : vector<2x256xf32>
    %c227_i32 = arith.constant 227 : i32
    %357 = tpu.dynamic_rotate %3 by %c227_i32 dim 1 : vector<2x256xf32>, i32 -> vector<2x256xf32>
    %c227_i32_113 = arith.constant 227 : i32
    %358 = tpu.dynamic_rotate %4 by %c227_i32_113 dim 1 : vector<2x256xf32>, i32 -> vector<2x256xf32>
    %c35 = arith.constant 35 : index
    %c0_114 = arith.constant 0 : index
    %359 = vector.load %arg2[%c35, %c0_114] : memref<98x256xf32, #tpu.memory_space<vmem>>, vector<1x256xf32>
    %360 = vector.broadcast %359 : vector<1x256xf32> to vector<2x256xf32>
    %361 = arith.mulf %357, %360 : vector<2x256xf32>
    %362 = arith.addf %342, %361 : vector<2x256xf32>
    %c84 = arith.constant 84 : index
    %c0_115 = arith.constant 0 : index
    %363 = vector.load %arg2[%c84, %c0_115] : memref<98x256xf32, #tpu.memory_space<vmem>>, vector<1x256xf32>
    %364 = vector.broadcast %363 : vector<1x256xf32> to vector<2x256xf32>
    %365 = arith.mulf %358, %364 : vector<2x256xf32>
    %366 = arith.addf %346, %365 : vector<2x256xf32>
    %c226_i32 = arith.constant 226 : i32
    %367 = tpu.dynamic_rotate %3 by %c226_i32 dim 1 : vector<2x256xf32>, i32 -> vector<2x256xf32>
    %c226_i32_116 = arith.constant 226 : i32
    %368 = tpu.dynamic_rotate %4 by %c226_i32_116 dim 1 : vector<2x256xf32>, i32 -> vector<2x256xf32>
    %c36 = arith.constant 36 : index
    %c0_117 = arith.constant 0 : index
    %369 = vector.load %arg2[%c36, %c0_117] : memref<98x256xf32, #tpu.memory_space<vmem>>, vector<1x256xf32>
    %370 = vector.broadcast %369 : vector<1x256xf32> to vector<2x256xf32>
    %371 = arith.mulf %367, %370 : vector<2x256xf32>
    %372 = arith.addf %352, %371 : vector<2x256xf32>
    %c85 = arith.constant 85 : index
    %c0_118 = arith.constant 0 : index
    %373 = vector.load %arg2[%c85, %c0_118] : memref<98x256xf32, #tpu.memory_space<vmem>>, vector<1x256xf32>
    %374 = vector.broadcast %373 : vector<1x256xf32> to vector<2x256xf32>
    %375 = arith.mulf %368, %374 : vector<2x256xf32>
    %376 = arith.addf %356, %375 : vector<2x256xf32>
    %c225_i32 = arith.constant 225 : i32
    %377 = tpu.dynamic_rotate %3 by %c225_i32 dim 1 : vector<2x256xf32>, i32 -> vector<2x256xf32>
    %c225_i32_119 = arith.constant 225 : i32
    %378 = tpu.dynamic_rotate %4 by %c225_i32_119 dim 1 : vector<2x256xf32>, i32 -> vector<2x256xf32>
    %c37 = arith.constant 37 : index
    %c0_120 = arith.constant 0 : index
    %379 = vector.load %arg2[%c37, %c0_120] : memref<98x256xf32, #tpu.memory_space<vmem>>, vector<1x256xf32>
    %380 = vector.broadcast %379 : vector<1x256xf32> to vector<2x256xf32>
    %381 = arith.mulf %377, %380 : vector<2x256xf32>
    %382 = arith.addf %362, %381 : vector<2x256xf32>
    %c86 = arith.constant 86 : index
    %c0_121 = arith.constant 0 : index
    %383 = vector.load %arg2[%c86, %c0_121] : memref<98x256xf32, #tpu.memory_space<vmem>>, vector<1x256xf32>
    %384 = vector.broadcast %383 : vector<1x256xf32> to vector<2x256xf32>
    %385 = arith.mulf %378, %384 : vector<2x256xf32>
    %386 = arith.addf %366, %385 : vector<2x256xf32>
    %c224_i32 = arith.constant 224 : i32
    %387 = tpu.dynamic_rotate %3 by %c224_i32 dim 1 : vector<2x256xf32>, i32 -> vector<2x256xf32>
    %c224_i32_122 = arith.constant 224 : i32
    %388 = tpu.dynamic_rotate %4 by %c224_i32_122 dim 1 : vector<2x256xf32>, i32 -> vector<2x256xf32>
    %c38 = arith.constant 38 : index
    %c0_123 = arith.constant 0 : index
    %389 = vector.load %arg2[%c38, %c0_123] : memref<98x256xf32, #tpu.memory_space<vmem>>, vector<1x256xf32>
    %390 = vector.broadcast %389 : vector<1x256xf32> to vector<2x256xf32>
    %391 = arith.mulf %387, %390 : vector<2x256xf32>
    %392 = arith.addf %372, %391 : vector<2x256xf32>
    %c87 = arith.constant 87 : index
    %c0_124 = arith.constant 0 : index
    %393 = vector.load %arg2[%c87, %c0_124] : memref<98x256xf32, #tpu.memory_space<vmem>>, vector<1x256xf32>
    %394 = vector.broadcast %393 : vector<1x256xf32> to vector<2x256xf32>
    %395 = arith.mulf %388, %394 : vector<2x256xf32>
    %396 = arith.addf %376, %395 : vector<2x256xf32>
    %c223_i32 = arith.constant 223 : i32
    %397 = tpu.dynamic_rotate %3 by %c223_i32 dim 1 : vector<2x256xf32>, i32 -> vector<2x256xf32>
    %c223_i32_125 = arith.constant 223 : i32
    %398 = tpu.dynamic_rotate %4 by %c223_i32_125 dim 1 : vector<2x256xf32>, i32 -> vector<2x256xf32>
    %c39 = arith.constant 39 : index
    %c0_126 = arith.constant 0 : index
    %399 = vector.load %arg2[%c39, %c0_126] : memref<98x256xf32, #tpu.memory_space<vmem>>, vector<1x256xf32>
    %400 = vector.broadcast %399 : vector<1x256xf32> to vector<2x256xf32>
    %401 = arith.mulf %397, %400 : vector<2x256xf32>
    %402 = arith.addf %382, %401 : vector<2x256xf32>
    %c88 = arith.constant 88 : index
    %c0_127 = arith.constant 0 : index
    %403 = vector.load %arg2[%c88, %c0_127] : memref<98x256xf32, #tpu.memory_space<vmem>>, vector<1x256xf32>
    %404 = vector.broadcast %403 : vector<1x256xf32> to vector<2x256xf32>
    %405 = arith.mulf %398, %404 : vector<2x256xf32>
    %406 = arith.addf %386, %405 : vector<2x256xf32>
    %c222_i32 = arith.constant 222 : i32
    %407 = tpu.dynamic_rotate %3 by %c222_i32 dim 1 : vector<2x256xf32>, i32 -> vector<2x256xf32>
    %c222_i32_128 = arith.constant 222 : i32
    %408 = tpu.dynamic_rotate %4 by %c222_i32_128 dim 1 : vector<2x256xf32>, i32 -> vector<2x256xf32>
    %c40 = arith.constant 40 : index
    %c0_129 = arith.constant 0 : index
    %409 = vector.load %arg2[%c40, %c0_129] : memref<98x256xf32, #tpu.memory_space<vmem>>, vector<1x256xf32>
    %410 = vector.broadcast %409 : vector<1x256xf32> to vector<2x256xf32>
    %411 = arith.mulf %407, %410 : vector<2x256xf32>
    %412 = arith.addf %392, %411 : vector<2x256xf32>
    %c89 = arith.constant 89 : index
    %c0_130 = arith.constant 0 : index
    %413 = vector.load %arg2[%c89, %c0_130] : memref<98x256xf32, #tpu.memory_space<vmem>>, vector<1x256xf32>
    %414 = vector.broadcast %413 : vector<1x256xf32> to vector<2x256xf32>
    %415 = arith.mulf %408, %414 : vector<2x256xf32>
    %416 = arith.addf %396, %415 : vector<2x256xf32>
    %c221_i32 = arith.constant 221 : i32
    %417 = tpu.dynamic_rotate %3 by %c221_i32 dim 1 : vector<2x256xf32>, i32 -> vector<2x256xf32>
    %c221_i32_131 = arith.constant 221 : i32
    %418 = tpu.dynamic_rotate %4 by %c221_i32_131 dim 1 : vector<2x256xf32>, i32 -> vector<2x256xf32>
    %c41 = arith.constant 41 : index
    %c0_132 = arith.constant 0 : index
    %419 = vector.load %arg2[%c41, %c0_132] : memref<98x256xf32, #tpu.memory_space<vmem>>, vector<1x256xf32>
    %420 = vector.broadcast %419 : vector<1x256xf32> to vector<2x256xf32>
    %421 = arith.mulf %417, %420 : vector<2x256xf32>
    %422 = arith.addf %402, %421 : vector<2x256xf32>
    %c90 = arith.constant 90 : index
    %c0_133 = arith.constant 0 : index
    %423 = vector.load %arg2[%c90, %c0_133] : memref<98x256xf32, #tpu.memory_space<vmem>>, vector<1x256xf32>
    %424 = vector.broadcast %423 : vector<1x256xf32> to vector<2x256xf32>
    %425 = arith.mulf %418, %424 : vector<2x256xf32>
    %426 = arith.addf %406, %425 : vector<2x256xf32>
    %c211_i32 = arith.constant 211 : i32
    %427 = tpu.dynamic_rotate %3 by %c211_i32 dim 1 : vector<2x256xf32>, i32 -> vector<2x256xf32>
    %c211_i32_134 = arith.constant 211 : i32
    %428 = tpu.dynamic_rotate %4 by %c211_i32_134 dim 1 : vector<2x256xf32>, i32 -> vector<2x256xf32>
    %c42 = arith.constant 42 : index
    %c0_135 = arith.constant 0 : index
    %429 = vector.load %arg2[%c42, %c0_135] : memref<98x256xf32, #tpu.memory_space<vmem>>, vector<1x256xf32>
    %430 = vector.broadcast %429 : vector<1x256xf32> to vector<2x256xf32>
    %431 = arith.mulf %427, %430 : vector<2x256xf32>
    %432 = arith.addf %412, %431 : vector<2x256xf32>
    %c91 = arith.constant 91 : index
    %c0_136 = arith.constant 0 : index
    %433 = vector.load %arg2[%c91, %c0_136] : memref<98x256xf32, #tpu.memory_space<vmem>>, vector<1x256xf32>
    %434 = vector.broadcast %433 : vector<1x256xf32> to vector<2x256xf32>
    %435 = arith.mulf %428, %434 : vector<2x256xf32>
    %436 = arith.addf %416, %435 : vector<2x256xf32>
    %c210_i32 = arith.constant 210 : i32
    %437 = tpu.dynamic_rotate %3 by %c210_i32 dim 1 : vector<2x256xf32>, i32 -> vector<2x256xf32>
    %c210_i32_137 = arith.constant 210 : i32
    %438 = tpu.dynamic_rotate %4 by %c210_i32_137 dim 1 : vector<2x256xf32>, i32 -> vector<2x256xf32>
    %c43 = arith.constant 43 : index
    %c0_138 = arith.constant 0 : index
    %439 = vector.load %arg2[%c43, %c0_138] : memref<98x256xf32, #tpu.memory_space<vmem>>, vector<1x256xf32>
    %440 = vector.broadcast %439 : vector<1x256xf32> to vector<2x256xf32>
    %441 = arith.mulf %437, %440 : vector<2x256xf32>
    %442 = arith.addf %422, %441 : vector<2x256xf32>
    %c92 = arith.constant 92 : index
    %c0_139 = arith.constant 0 : index
    %443 = vector.load %arg2[%c92, %c0_139] : memref<98x256xf32, #tpu.memory_space<vmem>>, vector<1x256xf32>
    %444 = vector.broadcast %443 : vector<1x256xf32> to vector<2x256xf32>
    %445 = arith.mulf %438, %444 : vector<2x256xf32>
    %446 = arith.addf %426, %445 : vector<2x256xf32>
    %c209_i32 = arith.constant 209 : i32
    %447 = tpu.dynamic_rotate %3 by %c209_i32 dim 1 : vector<2x256xf32>, i32 -> vector<2x256xf32>
    %c209_i32_140 = arith.constant 209 : i32
    %448 = tpu.dynamic_rotate %4 by %c209_i32_140 dim 1 : vector<2x256xf32>, i32 -> vector<2x256xf32>
    %c44 = arith.constant 44 : index
    %c0_141 = arith.constant 0 : index
    %449 = vector.load %arg2[%c44, %c0_141] : memref<98x256xf32, #tpu.memory_space<vmem>>, vector<1x256xf32>
    %450 = vector.broadcast %449 : vector<1x256xf32> to vector<2x256xf32>
    %451 = arith.mulf %447, %450 : vector<2x256xf32>
    %452 = arith.addf %432, %451 : vector<2x256xf32>
    %c93 = arith.constant 93 : index
    %c0_142 = arith.constant 0 : index
    %453 = vector.load %arg2[%c93, %c0_142] : memref<98x256xf32, #tpu.memory_space<vmem>>, vector<1x256xf32>
    %454 = vector.broadcast %453 : vector<1x256xf32> to vector<2x256xf32>
    %455 = arith.mulf %448, %454 : vector<2x256xf32>
    %456 = arith.addf %436, %455 : vector<2x256xf32>
    %c208_i32 = arith.constant 208 : i32
    %457 = tpu.dynamic_rotate %3 by %c208_i32 dim 1 : vector<2x256xf32>, i32 -> vector<2x256xf32>
    %c208_i32_143 = arith.constant 208 : i32
    %458 = tpu.dynamic_rotate %4 by %c208_i32_143 dim 1 : vector<2x256xf32>, i32 -> vector<2x256xf32>
    %c45 = arith.constant 45 : index
    %c0_144 = arith.constant 0 : index
    %459 = vector.load %arg2[%c45, %c0_144] : memref<98x256xf32, #tpu.memory_space<vmem>>, vector<1x256xf32>
    %460 = vector.broadcast %459 : vector<1x256xf32> to vector<2x256xf32>
    %461 = arith.mulf %457, %460 : vector<2x256xf32>
    %462 = arith.addf %442, %461 : vector<2x256xf32>
    %c94 = arith.constant 94 : index
    %c0_145 = arith.constant 0 : index
    %463 = vector.load %arg2[%c94, %c0_145] : memref<98x256xf32, #tpu.memory_space<vmem>>, vector<1x256xf32>
    %464 = vector.broadcast %463 : vector<1x256xf32> to vector<2x256xf32>
    %465 = arith.mulf %458, %464 : vector<2x256xf32>
    %466 = arith.addf %446, %465 : vector<2x256xf32>
    %c207_i32 = arith.constant 207 : i32
    %467 = tpu.dynamic_rotate %3 by %c207_i32 dim 1 : vector<2x256xf32>, i32 -> vector<2x256xf32>
    %c207_i32_146 = arith.constant 207 : i32
    %468 = tpu.dynamic_rotate %4 by %c207_i32_146 dim 1 : vector<2x256xf32>, i32 -> vector<2x256xf32>
    %c46 = arith.constant 46 : index
    %c0_147 = arith.constant 0 : index
    %469 = vector.load %arg2[%c46, %c0_147] : memref<98x256xf32, #tpu.memory_space<vmem>>, vector<1x256xf32>
    %470 = vector.broadcast %469 : vector<1x256xf32> to vector<2x256xf32>
    %471 = arith.mulf %467, %470 : vector<2x256xf32>
    %472 = arith.addf %452, %471 : vector<2x256xf32>
    %c95 = arith.constant 95 : index
    %c0_148 = arith.constant 0 : index
    %473 = vector.load %arg2[%c95, %c0_148] : memref<98x256xf32, #tpu.memory_space<vmem>>, vector<1x256xf32>
    %474 = vector.broadcast %473 : vector<1x256xf32> to vector<2x256xf32>
    %475 = arith.mulf %468, %474 : vector<2x256xf32>
    %476 = arith.addf %456, %475 : vector<2x256xf32>
    %c206_i32 = arith.constant 206 : i32
    %477 = tpu.dynamic_rotate %3 by %c206_i32 dim 1 : vector<2x256xf32>, i32 -> vector<2x256xf32>
    %c206_i32_149 = arith.constant 206 : i32
    %478 = tpu.dynamic_rotate %4 by %c206_i32_149 dim 1 : vector<2x256xf32>, i32 -> vector<2x256xf32>
    %c47 = arith.constant 47 : index
    %c0_150 = arith.constant 0 : index
    %479 = vector.load %arg2[%c47, %c0_150] : memref<98x256xf32, #tpu.memory_space<vmem>>, vector<1x256xf32>
    %480 = vector.broadcast %479 : vector<1x256xf32> to vector<2x256xf32>
    %481 = arith.mulf %477, %480 : vector<2x256xf32>
    %482 = arith.addf %462, %481 : vector<2x256xf32>
    %c96 = arith.constant 96 : index
    %c0_151 = arith.constant 0 : index
    %483 = vector.load %arg2[%c96, %c0_151] : memref<98x256xf32, #tpu.memory_space<vmem>>, vector<1x256xf32>
    %484 = vector.broadcast %483 : vector<1x256xf32> to vector<2x256xf32>
    %485 = arith.mulf %478, %484 : vector<2x256xf32>
    %486 = arith.addf %466, %485 : vector<2x256xf32>
    %c205_i32 = arith.constant 205 : i32
    %487 = tpu.dynamic_rotate %3 by %c205_i32 dim 1 : vector<2x256xf32>, i32 -> vector<2x256xf32>
    %c205_i32_152 = arith.constant 205 : i32
    %488 = tpu.dynamic_rotate %4 by %c205_i32_152 dim 1 : vector<2x256xf32>, i32 -> vector<2x256xf32>
    %c48 = arith.constant 48 : index
    %c0_153 = arith.constant 0 : index
    %489 = vector.load %arg2[%c48, %c0_153] : memref<98x256xf32, #tpu.memory_space<vmem>>, vector<1x256xf32>
    %490 = vector.broadcast %489 : vector<1x256xf32> to vector<2x256xf32>
    %491 = arith.mulf %487, %490 : vector<2x256xf32>
    %492 = arith.addf %472, %491 : vector<2x256xf32>
    %c97 = arith.constant 97 : index
    %c0_154 = arith.constant 0 : index
    %493 = vector.load %arg2[%c97, %c0_154] : memref<98x256xf32, #tpu.memory_space<vmem>>, vector<1x256xf32>
    %494 = vector.broadcast %493 : vector<1x256xf32> to vector<2x256xf32>
    %495 = arith.mulf %488, %494 : vector<2x256xf32>
    %496 = arith.addf %476, %495 : vector<2x256xf32>
    %497 = arith.addf %492, %482 : vector<2x256xf32>
    %498 = arith.addf %496, %486 : vector<2x256xf32>
    %499 = arith.addf %497, %498 : vector<2x256xf32>
    %c0_155 = arith.constant 0 : index
    %500 = memref.load %arg1[%c0_155] : memref<1xf32, #tpu.memory_space<smem>>
    %501 = vector.broadcast %500 : f32 to vector<2x256xf32>
    %502 = arith.addf %499, %501 : vector<2x256xf32>
    %503 = arith.negf %502 : vector<2x256xf32>
    %504 = math.exp %503 : vector<2x256xf32>
    %cst_156 = arith.constant 1.000000e+00 : f32
    %505 = vector.broadcast %cst_156 : f32 to vector<2x256xf32>
    %506 = arith.addf %505, %504 : vector<2x256xf32>
    %507 = arith.divf %505, %506 : vector<2x256xf32>
    %508 = vector.shape_cast %507 : vector<2x256xf32> to vector<2x1x256xf32>
    %509 = vector.broadcast %508 : vector<2x1x256xf32> to vector<2x4x256xf32>
    %510 = arith.mulf %0, %509 : vector<2x4x256xf32>
    %c0_157 = arith.constant 0 : index
    %c0_158 = arith.constant 0 : index
    %c0_159 = arith.constant 0 : index
    %511 = vector.load %arg4[%c0_157, %c0_158, %c0_159] : memref<2x4x256xf32, #tpu.memory_space<vmem>>, vector<2x4x256xf32>
    tpu.vector_store %arg4[%c0_157, %c0_158, %c0_159], %510 {strides = array<i32>} : memref<2x4x256xf32, #tpu.memory_space<vmem>>, vector<2x4x256xf32>,
    return
  }
  func.func @transform_0(%arg0: i32) -> i32 {
    %c0_i32 = arith.constant 0 : i32
    %c0_i32_0 = arith.constant 0 : i32
    return %c0_i32 : i32
  }
  func.func @transform_1(%arg0: i32) -> (i32, i32) {
    %c0_i32 = arith.constant 0 : i32
    %c0_i32_0 = arith.constant 0 : i32
    %c0_i32_1 = arith.constant 0 : i32
    return %c0_i32, %c0_i32_0 : i32, i32
  }
  func.func @transform_2(%arg0: i32) -> (i32, i32, i32) {
    %c0_i32 = arith.constant 0 : i32
    %c0_i32_0 = arith.constant 0 : i32
    %c0_i32_1 = arith.constant 0 : i32
    return %arg0, %c0_i32, %c0_i32_0 : i32, i32, i32
  }
  func.func @transform_3(%arg0: i32) -> (i32, i32, i32) {
    %c0_i32 = arith.constant 0 : i32
    %c0_i32_0 = arith.constant 0 : i32
    %c0_i32_1 = arith.constant 0 : i32
    return %arg0, %c0_i32, %c0_i32_0 : i32, i32, i32
  }
}

</mosaic_0001>

<bundles_post_ra>
// kernel: tpu_custom_call.1
= control target key start
LH: loop header
LB: loop body
LE: loop exit
PB: predicated region body
PF: predicated region fallthrough
CT: control target
= control target key end

     0   :  { %9 = vsyncpa [#allocation4], 0  ;;  %s4983_s0 = inlined_call_operand.<no memory space> [shape: f32[1], index: 0, kind: input, shape index: {}]   ;;  %s4984_s1 = inlined_call_operand.hbm [shape: f32[98,256], index: 1, kind: input, shape index: {}]   ;;  %s4985_s2 = inlined_call_operand.hbm [shape: f32[2,4,256], index: 2, kind: input, shape index: {}]   ;;  %s4986_s3 = inlined_call_operand.hbm [shape: f32[2,4,256], index: 3, kind: output, shape index: {}]  }
   0x1   :  { %10 = vsyncpa [#allocation7], 0 }
   0x2   :  { %11 = vsyncpa [#allocation5], 0  ;;  %s2676_s12 = smov [#allocation3]   ;;  %s2604_s16 = scalar_lea.hbm %s4984_s1, 3328 }
   0x3   :  { %s19_s13 = sshll.u32 %s2676_s12, 4  ;;  %p2605_p0 = scmp.ne.s32.totalorder %s4984_s1, %s2604_s16  ;;  %s20_s13 = int_to_ptr.vmem [resolvable:$true] %s19_s13 }
   0x4   :  { %p2608_p1 = scmp.lt.u32.totalorder %s2604_s16, %s4984_s1 }
   0x6   :  { %p2610_p2 = pnand %p2608_p1, %p2605_p0 }
   0x8   :  { %2613 = shalt.err (!%p2610_p2)
}
   0x9   :  { %s2614_s21 = scalar_lea.vmem %s20_s13, 3328  ;;  %p2619_p4 = scmp.lt.s32.totalorder %s20_s13, %s20_s13 }
   0xa   :  { %p2615_p3 = scmp.ne.s32.totalorder %s20_s13, %s2614_s21  ;;  %p2620_p5 = scmp.lt.s32.totalorder %s2614_s21, %s2614_s21 }
   0xc   :  { %p2621_p6 = por %p2620_p5, %p2619_p4 }
   0xe   :  { %p2622_p7 = pnand %p2621_p6, %p2615_p3 }
  0x10   :  { %2625 = shalt.err (!%p2622_p7)
}
  0x11   :  { %s2677_s22 = smov 256   ;;  %s2678_s23 = smov 16  }
  0x12   :  { %25 = dma.hbm_to_vmem [thread:$0]  %s4984_s1, 3328, %s20_s13, [#allocation4], %s2677_s22, %s2677_s22, %s2678_s23  }
  0x13   :  { %s2679_s26 = smov [#allocation6]   ;;  %s2626_s30 = scalar_lea.hbm %s4985_s2, 256 }
  0x14   :  { %s31_s27 = sshll.u32 %s2679_s26, 4  ;;  %p2627_p8 = scmp.ne.s32.totalorder %s4985_s2, %s2626_s30  ;;  %s32_s27 = int_to_ptr.vmem [resolvable:$true] %s31_s27 }
  0x15   :  { %p2630_p9 = scmp.lt.u32.totalorder %s2626_s30, %s4985_s2 }
  0x17   :  { %p2632_p10 = pnand %p2630_p9, %p2627_p8 }
  0x19   :  { %2635 = shalt.err (!%p2632_p10)
}
  0x1a   :  { %s2636_s8 = scalar_lea.vmem %s32_s27, 256  ;;  %p2641_p12 = scmp.lt.s32.totalorder %s32_s27, %s32_s27 }
  0x1b   :  { %p2637_p11 = scmp.ne.s32.totalorder %s32_s27, %s2636_s8  ;;  %p2642_p13 = scmp.lt.s32.totalorder %s2636_s8, %s2636_s8 }
  0x1d   :  { %p2643_p0 = por %p2642_p13, %p2641_p12 }
  0x1f   :  { %p2644_p1 = pnand %p2643_p0, %p2637_p11 }
  0x21   :  { %2647 = shalt.err (!%p2644_p1)
}
  0x22   :  { %s2680_s1 = smov 128   ;;  %s2681_s9 = smov 8  }
  0x23   :  { %37 = dma.hbm_to_vmem [thread:$0]  %s4985_s2, 256, %s32_s27, [#allocation7], %s2680_s1, %s2680_s1, %s2681_s9  }
  0x24   :  { %2670 = dma.done.wait [#allocation4], 3328  }
  0x25   :  { %2671 = vsyncadd [#allocation4], 4294963968 }
  0x26   :  { %2672 = dma.done.wait [#allocation7], 256  }
  0x27   :  { %2673 = vsyncadd [#allocation7], 4294967040  ;;  %vm52_vm0 = vcmask 1043456   ;;  %v44_v0 = vld [vmem:[#allocation6] sm:$0xff]  ;;  %v45_v1 = vld [vmem:[#allocation6 + $0x8] sm:$0xff]  ;;  %vm118_vm1 = vcmask 1041409  }
  0x28   :  { %v86_v2 = vsel %vm52_vm0, %v44_v0, -inf  ;;  %v100_v3 = vsel %vm52_vm0, %v45_v1, -inf  ;;  %v48_v4 = vcombine.high %v44_v0, %v44_v0  ;;  %v49_v5 = vcombine.high %v45_v1, %v45_v1  ;;  %s2682_s2 = smov 50   ;;  %s2683_s12 = smov 51  }
  0x29   :  { %v87_v6 = vrot.slane %v86_v2, 4  ;;  %v101_v7 = vrot.slane %v100_v3, 4  ;;  %v53_v8 = vsel %vm52_vm0, %v44_v0, 0.0  ;;  %v67_v9 = vsel %vm52_vm0, %v45_v1, 0.0  ;;  %s2684_s13 = smov 49   ;;  %s2685_s14 = smov 48  }
  0x2a   :  { %v93_v10 = vsel %vm52_vm0, %v48_v4, -inf  ;;  %v107_v11 = vsel %vm52_vm0, %v49_v5, -inf  ;;  %v54_v12 = vrot.slane %v53_v8, 4  ;;  %v68_v13 = vrot.slane %v67_v9, 4  ;;  %s2686_s15 = smov 47   ;;  %s2687_s16 = smov 46  }
  0x2b   :  { %v88_v14 = vmax.f32 %v86_v2, %v87_v6  ;;  %v102_v15 = vmax.f32 %v100_v3, %v101_v7  ;;  %v94_v16 = vrot.slane %v93_v10, 4  ;;  %v108_v17 = vrot.slane %v107_v11, 4  ;;  %s2688_s17 = smov 45   ;;  %s2689_s18 = smov 35  }
  0x2c   :  { %v55_v18 = vadd.f32 %v54_v12, %v53_v8  ;;  %v69_v19 = vadd.f32 %v68_v13, %v67_v9  ;;  %v60_v20 = vsel %vm52_vm0, %v48_v4, 0.0  ;;  %v74_v21 = vsel %vm52_vm0, %v49_v5, 0.0  ;;  %s2690_s19 = smov 34   ;;  %s2691_s20 = smov 33  }
  0x2d   :  { %v89_v22 = vrot.slane %v88_v14, 2  ;;  %v103_v23 = vrot.slane %v102_v15, 2  ;;  %v95_v24 = vmax.f32 %v93_v10, %v94_v16  ;;  %v109_v25 = vmax.f32 %v107_v11, %v108_v17  ;;  %s2692_s21 = smov 32   ;;  %s2693_s22 = smov 31  }
  0x2e   :  { %v56_v26 = vrot.slane %v55_v18, 2  ;;  %v70_v27 = vrot.slane %v69_v19, 2  ;;  %v61_v28 = vrot.slane %v60_v20, 4  ;;  %v75_v29 = vrot.slane %v74_v21, 4  ;;  %s2694_s24 = smov 30   ;;  %s2695_s25 = smov 29  }
  0x2f   :  { %v90_v30 = vmax.f32 %v88_v14, %v89_v22  ;;  %v104_v31 = vmax.f32 %v102_v15, %v103_v23  ;;  %v96_v32 = vrot.slane %v95_v24, 2  ;;  %v110_v33 = vrot.slane %v109_v25, 2  ;;  %s2696_s26 = smov 19   ;;  %s2697_s27 = smov 18  }
  0x30   :  { %v57_v34 = vadd.f32 %v56_v26, %v55_v18  ;;  %v71_v35 = vadd.f32 %v70_v27, %v69_v19  ;;  %v62_v36 = vadd.f32 %v61_v28, %v60_v20  ;;  %v76_v37 = vadd.f32 %v75_v29, %v74_v21  ;;  %s2698_s28 = smov 17   ;;  %s2699_s29 = smov 15  }
  0x31   :  { %v91_v38 = vrot.slane %v90_v30, 1  ;;  %v105_v39 = vrot.slane %v104_v31, 1  ;;  %v97_v40 = vmax.f32 %v95_v24, %v96_v32  ;;  %v111_v41 = vmax.f32 %v109_v25, %v110_v33  ;;  %s2701_s30 = smov 13   ;;  %s2702_s4 = smov 3  }
  0x32   :  { %v58_v42 = vrot.slane %v57_v34, 1  ;;  %v72_v43 = vrot.slane %v71_v35, 1  ;;  %v63_v44 = vrot.slane %v62_v36, 2  ;;  %v77_v45 = vrot.slane %v76_v37, 2  ;;  %s2703_s5 = smov 2   ;;  %s2704_s6 = smov 1  }
  0x33   :  { %v2787_v46 = vmax.f32 %v90_v30, %v91_v38  ;;  %v2789_v47 = vmax.f32 %v104_v31, %v105_v39  ;;  %v98_v48 = vrot.slane %v97_v40, 1  ;;  %v112_v49 = vrot.slane %v111_v41, 1  ;;  %s2705_s7 = smov 127   ;;  %s2706_s8 = smov 126  }
  0x34   :  { %v59_v50 = vadd.f32 %v58_v42, %v57_v34  ;;  %v73_v51 = vadd.f32 %v72_v43, %v71_v35  ;;  %v64_v52 = vadd.f32 %v63_v44, %v62_v36  ;;  %v78_v53 = vadd.f32 %v77_v45, %v76_v37  ;;  %s2707_s10 = smov 125   ;;  %s2708_s11 = smov 115  }
  0x35   :  { %5110 = vst [vmem:[#allocation12_spill] sm:$0xff] %v2787_v46  ;;  %5111 = vst [vmem:[#allocation13_spill] sm:$0xff] %v2789_v47  ;;  %v2794_v54 = vsel %vm118_vm1, %v2789_v47, %v2787_v46  ;;  %v2796_v55 = vmax.f32 %v97_v40, %v98_v48  ;;  %v2798_v56 = vmax.f32 %v111_v41, %v112_v49  ;;  %v3109_v46 = vld [vmem:[#allocation3 + $0x6] ss:$8 sm:$0x3] }
  0x36   :  { %186 = vrot.lane.b32.xlu0 %v2794_v54, %s2682_s2  ;;  %140 = vrot.lane.b32.xlu1 %v2794_v54, %s2683_s12  ;;  %v2802_v57 = vmul.f32 0.25, %v59_v50  ;;  %v2809_v59 = vmul.f32 0.25, %v73_v51  ;;  %v65_v60 = vrot.slane %v64_v52, 1  ;;  %v79_v61 = vrot.slane %v78_v53, 1  ;;  %5145 = vst [vmem:[#allocation47_spill] sm:$0xff] %v3109_v46 }
  0x37   :  { %5112 = vst [vmem:[#allocation14_spill] sm:$0xff] %v2796_v55  ;;  %5113 = vst [vmem:[#allocation15_spill] sm:$0xff] %v2798_v56  ;;  %v2807_v58 = vsel %vm118_vm1, %v2798_v56, %v2796_v55  ;;  %v3107_v55 = vld [vmem:[#allocation3 + $0x66] ss:$8 sm:$0x3] }
  0x38   :  { %5114 = vst [vmem:[#allocation16_spill] sm:$0xff] %v2802_v57  ;;  %v2816_v62 = vsel %vm118_vm1, %v2809_v59, %v2802_v57  ;;  %v66_v63 = vadd.f32 %v65_v60, %v64_v52  ;;  %v80_v0 = vadd.f32 %v79_v61, %v78_v53  ;;  %v127_v60 = vlaneseq  ;;  %v3134_v56 = vld [vmem:[#allocation3 + $0x70] ss:$8 sm:$0x3] }
  0x39   :  { %5147 = vst [vmem:[#allocation49_spill] sm:$0xff] %v3134_v56  ;;  %v3136_v47 = vld [vmem:[#allocation3 + $0x10] ss:$8 sm:$0x3] }
  0x3a   :  { %233 = vrot.lane.b32.xlu0 %v2794_v54, %s2684_s13  ;;  %142 = vrot.lane.b32.xlu1 %v2807_v58, %s2683_s12  ;;  %v2820_v1 = vmul.f32 0.25, %v66_v63  ;;  %v2822_v2 = vmul.f32 0.25, %v80_v0  ;;  %v3034_v0 = vshrl.u32 %v127_v60, 7  ;;  %5148 = vst [vmem:[#allocation50_spill] sm:$0xff] %v3136_v47 }
  0x3b   :  { %v3168_v57 = vld [vmem:[#allocation3 + $0x12] ss:$8 sm:$0x3]  ;;  %v3180_v46 = vld [vmem:[#allocation3 + $0x13] ss:$8 sm:$0x3] }
  0x3c   :  { %5115 = vst [vmem:[#allocation17_spill] sm:$0xff] %v2820_v1  ;;  %v2829_v3 = vsel %vm118_vm1, %v2822_v2, %v2820_v1  ;;  %5138 = vst [vmem:[#allocation40_spill] sm:$0xff] %v3034_v0  ;;  %v3166_v1 = vld [vmem:[#allocation3 + $0x72] ss:$8 sm:$0x3] }
  0x3d   :  { %5153 = vst [vmem:[#allocation55_spill] sm:$0xff] %v3166_v1  ;;  %5155 = vst [vmem:[#allocation57_spill] sm:$0xff] %v3180_v46  ;;  %v3204_v47 = vld [vmem:[#allocation3 + $0x14] ss:$8 sm:$0x3] }
  0x3e   :  { %123 = vrot.lane.b32.xlu0 %v2816_v62, %s2683_s12  ;;  %188 = vrot.lane.b32.xlu1 %v2807_v58, %s2682_s2  ;;  %5157 = vst [vmem:[#allocation59_spill] sm:$0xff] %v3204_v47  ;;  %v3220_v1 = vld [vmem:[#allocation3 + $0x15] ss:$8 sm:$0x3] }
  0x3f   :  { %5161 = vst [vmem:[#allocation63_spill] sm:$0xff] %v3220_v1  ;;  %v3244_v46 = vld [vmem:[#allocation3 + $0x77] ss:$8 sm:$0x3] }
  0x40   :  { %5164 = vst [vmem:[#allocation66_spill] sm:$0xff] %v3244_v46  ;;  %v3302_v56 = vld [vmem:[#allocation3 + $0x21] ss:$8 sm:$0x3] }
  0x42   :  { %179 = vrot.lane.b32.xlu0 %v2816_v62, %s2682_s2  ;;  %235 = vrot.lane.b32.xlu1 %v2807_v58, %s2684_s13 }
  0x46   :  { %226 = vrot.lane.b32.xlu0 %v2816_v62, %s2684_s13  ;;  %181 = vrot.lane.b32.xlu1 %v2829_v3, %s2682_s2  ;;  %s2709_s2 = smov 114  }
  0x4a   :  { %273 = vrot.lane.b32.xlu0 %v2816_v62, %s2685_s14  ;;  %228 = vrot.lane.b32.xlu1 %v2829_v3, %s2684_s13  ;;  %s2711_s13 = smov 112  }
  0x4e   :  { %275 = vrot.lane.b32.xlu1 %v2829_v3, %s2685_s14  ;;  %125 = vrot.lane.b32.xlu0 %v2829_v3, %s2683_s12  ;;  %s2710_s12 = smov 113  }
  0x52   :  { %282 = vrot.lane.b32.xlu1 %v2807_v58, %s2685_s14  ;;  %280 = vrot.lane.b32.xlu0 %v2794_v54, %s2685_s14  ;;  %s2712_s14 = smov 111  }
  0x56   :  { %322 = vrot.lane.b32.xlu1 %v2829_v3, %s2686_s15  ;;  %320 = vrot.lane.b32.xlu0 %v2816_v62, %s2686_s15 }
  0x5a   :  { %329 = vrot.lane.b32.xlu1 %v2807_v58, %s2686_s15  ;;  %327 = vrot.lane.b32.xlu0 %v2794_v54, %s2686_s15  ;;  %s2713_s15 = smov 110  }
  0x5e   :  { %369 = vrot.lane.b32.xlu1 %v2829_v3, %s2687_s16  ;;  %367 = vrot.lane.b32.xlu0 %v2816_v62, %s2687_s16 }
  0x62   :  { %376 = vrot.lane.b32.xlu1 %v2807_v58, %s2687_s16  ;;  %374 = vrot.lane.b32.xlu0 %v2794_v54, %s2687_s16  ;;  %s2714_s16 = smov 109  }
  0x66   :  { %416 = vrot.lane.b32.xlu1 %v2829_v3, %s2688_s17  ;;  %414 = vrot.lane.b32.xlu0 %v2816_v62, %s2688_s17 }
  0x6a   :  { %423 = vrot.lane.b32.xlu1 %v2807_v58, %s2688_s17  ;;  %421 = vrot.lane.b32.xlu0 %v2794_v54, %s2688_s17  ;;  %s2715_s17 = smov 99  }
  0x6e   :  { %463 = vrot.lane.b32.xlu1 %v2829_v3, %s2689_s18  ;;  %461 = vrot.lane.b32.xlu0 %v2816_v62, %s2689_s18 }
  0x72   :  { %470 = vrot.lane.b32.xlu1 %v2807_v58, %s2689_s18  ;;  %468 = vrot.lane.b32.xlu0 %v2794_v54, %s2689_s18  ;;  %s2716_s18 = smov 98  }
  0x76   :  { %510 = vrot.lane.b32.xlu1 %v2829_v3, %s2690_s19  ;;  %508 = vrot.lane.b32.xlu0 %v2816_v62, %s2690_s19 }
  0x7a   :  { %517 = vrot.lane.b32.xlu1 %v2807_v58, %s2690_s19  ;;  %515 = vrot.lane.b32.xlu0 %v2794_v54, %s2690_s19  ;;  %s2717_s19 = smov 97  }
  0x7e   :  { %557 = vrot.lane.b32.xlu1 %v2829_v3, %s2691_s20  ;;  %555 = vrot.lane.b32.xlu0 %v2816_v62, %s2691_s20 }
  0x82   :  { %564 = vrot.lane.b32.xlu1 %v2807_v58, %s2691_s20  ;;  %562 = vrot.lane.b32.xlu0 %v2794_v54, %s2691_s20  ;;  %s2718_s20 = smov 96  }
  0x86   :  { %604 = vrot.lane.b32.xlu1 %v2829_v3, %s2692_s21  ;;  %602 = vrot.lane.b32.xlu0 %v2816_v62, %s2692_s21 }
  0x8a   :  { %611 = vrot.lane.b32.xlu1 %v2807_v58, %s2692_s21  ;;  %609 = vrot.lane.b32.xlu0 %v2794_v54, %s2692_s21  ;;  %s2719_s21 = smov 95  }
  0x8e   :  { %651 = vrot.lane.b32.xlu1 %v2829_v3, %s2693_s22  ;;  %649 = vrot.lane.b32.xlu0 %v2816_v62, %s2693_s22 }
  0x92   :  { %658 = vrot.lane.b32.xlu1 %v2807_v58, %s2693_s22  ;;  %656 = vrot.lane.b32.xlu0 %v2794_v54, %s2693_s22  ;;  %s2720_s22 = smov 94  }
  0x96   :  { %698 = vrot.lane.b32.xlu1 %v2829_v3, %s2694_s24  ;;  %696 = vrot.lane.b32.xlu0 %v2816_v62, %s2694_s24 }
  0x9a   :  { %705 = vrot.lane.b32.xlu1 %v2807_v58, %s2694_s24  ;;  %703 = vrot.lane.b32.xlu0 %v2794_v54, %s2694_s24  ;;  %s2721_s24 = smov 93  }
  0x9e   :  { %745 = vrot.lane.b32.xlu1 %v2829_v3, %s2695_s25  ;;  %743 = vrot.lane.b32.xlu0 %v2816_v62, %s2695_s25 }
  0xa2   :  { %752 = vrot.lane.b32.xlu1 %v2807_v58, %s2695_s25  ;;  %750 = vrot.lane.b32.xlu0 %v2794_v54, %s2695_s25  ;;  %s2722_s25 = smov 83  }
  0xa6   :  { %792 = vrot.lane.b32.xlu1 %v2829_v3, %s2696_s26  ;;  %790 = vrot.lane.b32.xlu0 %v2816_v62, %s2696_s26 }
  0xa8   :  { %v2881_v4 = vpop.permute.xlu0 %186  ;;  %v2883_v5 = vpop.permute.xlu1 %140 }
  0xaa   :  { %799 = vrot.lane.b32.xlu1 %v2807_v58, %s2696_s26  ;;  %797 = vrot.lane.b32.xlu0 %v2794_v54, %s2696_s26  ;;  %s2723_s26 = smov 82  }
  0xac   :  { %v2887_v6 = vpop.permute.xlu0 %233  ;;  %v2889_v7 = vpop.permute.xlu1 %142 }
  0xae   :  { %839 = vrot.lane.b32.xlu1 %v2829_v3, %s2697_s27  ;;  %837 = vrot.lane.b32.xlu0 %v2816_v62, %s2697_s27 }
  0xb0   :  { %v2893_v8 = vpop.permute.xlu0 %123  ;;  %v2895_v9 = vpop.permute.xlu1 %188 }
  0xb2   :  { %846 = vrot.lane.b32.xlu1 %v2807_v58, %s2697_s27  ;;  %844 = vrot.lane.b32.xlu0 %v2794_v54, %s2697_s27  ;;  %s2724_s27 = smov 81  }
  0xb4   :  { %v2899_v10 = vpop.permute.xlu0 %179  ;;  %v2901_v11 = vpop.permute.xlu1 %235 }
  0xb6   :  { %886 = vrot.lane.b32.xlu1 %v2829_v3, %s2698_s28  ;;  %884 = vrot.lane.b32.xlu0 %v2816_v62, %s2698_s28 }
  0xb8   :  { %v2905_v12 = vpop.permute.xlu0 %226  ;;  %v2907_v13 = vpop.permute.xlu1 %181 }
  0xba   :  { %893 = vrot.lane.b32.xlu1 %v2807_v58, %s2698_s28  ;;  %891 = vrot.lane.b32.xlu0 %v2794_v54, %s2698_s28  ;;  %s2725_s28 = smov 80  }
  0xbc   :  { %v2911_v14 = vpop.permute.xlu0 %273  ;;  %v2913_v15 = vpop.permute.xlu1 %228 }
  0xbe   :  { %933 = vrot.lane.b32.xlu1 %v2829_v3, %s2678_s23  ;;  %931 = vrot.lane.b32.xlu0 %v2816_v62, %s2678_s23 }
  0xc0   :  { %v2919_v16 = vpop.permute.xlu1 %275  ;;  %v2921_v17 = vpop.permute.xlu0 %125 }
  0xc2   :  { %940 = vrot.lane.b32.xlu1 %v2807_v58, %s2678_s23  ;;  %938 = vrot.lane.b32.xlu0 %v2794_v54, %s2678_s23  ;;  %s2700_s23 = smov 14  }
  0xc4   :  { %v2927_v18 = vpop.permute.xlu1 %282  ;;  %v2929_v19 = vpop.permute.xlu0 %280 }
  0xc6   :  { %980 = vrot.lane.b32.xlu1 %v2829_v3, %s2699_s29  ;;  %978 = vrot.lane.b32.xlu0 %v2816_v62, %s2699_s29 }
  0xc8   :  { %v2933_v20 = vpop.permute.xlu1 %322  ;;  %v2935_v21 = vpop.permute.xlu0 %320 }
  0xca   :  { %987 = vrot.lane.b32.xlu1 %v2807_v58, %s2699_s29  ;;  %985 = vrot.lane.b32.xlu0 %v2794_v54, %s2699_s29  ;;  %s2726_s29 = smov 79  }
  0xcc   :  { %v2939_v22 = vpop.permute.xlu1 %329  ;;  %v2941_v23 = vpop.permute.xlu0 %327 }
  0xce   :  { %1027 = vrot.lane.b32.xlu1 %v2829_v3, %s2700_s23  ;;  %1025 = vrot.lane.b32.xlu0 %v2816_v62, %s2700_s23 }
  0xd0   :  { %v2945_v24 = vpop.permute.xlu1 %369  ;;  %v2947_v25 = vpop.permute.xlu0 %367 }
  0xd2   :  { %1034 = vrot.lane.b32.xlu1 %v2807_v58, %s2700_s23  ;;  %1032 = vrot.lane.b32.xlu0 %v2794_v54, %s2700_s23  ;;  %s2727_s23 = smov 78  }
  0xd4   :  { %v2951_v26 = vpop.permute.xlu1 %376  ;;  %v2953_v27 = vpop.permute.xlu0 %374 }
  0xd6   :  { %1074 = vrot.lane.b32.xlu1 %v2829_v3, %s2701_s30  ;;  %1072 = vrot.lane.b32.xlu0 %v2816_v62, %s2701_s30 }
  0xd8   :  { %v2957_v28 = vpop.permute.xlu1 %416  ;;  %v2959_v29 = vpop.permute.xlu0 %414 }
  0xda   :  { %1081 = vrot.lane.b32.xlu1 %v2807_v58, %s2701_s30  ;;  %1079 = vrot.lane.b32.xlu0 %v2794_v54, %s2701_s30  ;;  %s2728_s30 = smov 77  }
  0xdc   :  { %v2963_v30 = vpop.permute.xlu1 %423  ;;  %v2965_v31 = vpop.permute.xlu0 %421 }
  0xde   :  { %1121 = vrot.lane.b32.xlu1 %v2829_v3, %s2702_s4  ;;  %1119 = vrot.lane.b32.xlu0 %v2816_v62, %s2702_s4 }
  0xe0   :  { %v2969_v32 = vpop.permute.xlu1 %463  ;;  %v2971_v33 = vpop.permute.xlu0 %461 }
  0xe1   :  { %5116 = vst [vmem:[#allocation18_spill] sm:$0xff] %v2969_v32  ;;  %5117 = vst [vmem:[#allocation19_spill] sm:$0xff] %v2971_v33 }
  0xe2   :  { %1128 = vrot.lane.b32.xlu1 %v2807_v58, %s2702_s4  ;;  %1126 = vrot.lane.b32.xlu0 %v2794_v54, %s2702_s4 }
  0xe4   :  { %v2975_v34 = vpop.permute.xlu1 %470  ;;  %v2977_v35 = vpop.permute.xlu0 %468 }
  0xe5   :  { %5118 = vst [vmem:[#allocation20_spill] sm:$0xff] %v2975_v34  ;;  %5119 = vst [vmem:[#allocation21_spill] sm:$0xff] %v2977_v35  ;;  %v3149_v35 = vld [vmem:[#allocation3 + $0x71] ss:$8 sm:$0x3] }
  0xe6   :  { %1168 = vrot.lane.b32.xlu1 %v2829_v3, %s2703_s5  ;;  %1166 = vrot.lane.b32.xlu0 %v2816_v62, %s2703_s5  ;;  %5149 = vst [vmem:[#allocation51_spill] sm:$0xff] %v3149_v35  ;;  %v3151_v34 = vld [vmem:[#allocation3 + $0x11] ss:$8 sm:$0x3] }
  0xe7   :  { %5150 = vst [vmem:[#allocation52_spill] sm:$0xff] %v3151_v34  ;;  %v3222_v34 = vld [vmem:[#allocation3 + $0x76] ss:$8 sm:$0x3] }
  0xe8   :  { %v2981_v36 = vpop.permute.xlu1 %510  ;;  %v2983_v37 = vpop.permute.xlu0 %508  ;;  %5162 = vst [vmem:[#allocation64_spill] sm:$0xff] %v3222_v34 }
  0xe9   :  { %5120 = vst [vmem:[#allocation22_spill] sm:$0xff] %v2981_v36  ;;  %5121 = vst [vmem:[#allocation23_spill] sm:$0xff] %v2983_v37  ;;  %v3093_v37 = vld [vmem:[#allocation3 + $0x5] ss:$8 sm:$0x3] }
  0xea   :  { %1175 = vrot.lane.b32.xlu1 %v2807_v58, %s2703_s5  ;;  %1173 = vrot.lane.b32.xlu0 %v2794_v54, %s2703_s5 }
  0xec   :  { %v2987_v38 = vpop.permute.xlu1 %517  ;;  %v2989_v39 = vpop.permute.xlu0 %515 }
  0xed   :  { %5122 = vst [vmem:[#allocation24_spill] sm:$0xff] %v2987_v38  ;;  %5123 = vst [vmem:[#allocation25_spill] sm:$0xff] %v2989_v39  ;;  %v3178_v38 = vld [vmem:[#allocation3 + $0x73] ss:$8 sm:$0x3] }
  0xee   :  { %1215 = vrot.lane.b32.xlu1 %v2829_v3, %s2704_s6  ;;  %1213 = vrot.lane.b32.xlu0 %v2816_v62, %s2704_s6  ;;  %5154 = vst [vmem:[#allocation56_spill] sm:$0xff] %v3178_v38  ;;  %v3192_v39 = vld [vmem:[#allocation3 + $0x74] ss:$8 sm:$0x3] }
  0xef   :  { %5156 = vst [vmem:[#allocation58_spill] sm:$0xff] %v3192_v39 }
  0xf0   :  { %v2993_v40 = vpop.permute.xlu1 %557  ;;  %v2995_v41 = vpop.permute.xlu0 %555 }
  0xf1   :  { %5124 = vst [vmem:[#allocation26_spill] sm:$0xff] %v2993_v40  ;;  %5125 = vst [vmem:[#allocation27_spill] sm:$0xff] %v2995_v41  ;;  %v3080_v40 = vld [vmem:[#allocation3 + $0x4] ss:$8 sm:$0x3] }
  0xf2   :  { %1222 = vrot.lane.b32.xlu1 %v2807_v58, %s2704_s6  ;;  %1220 = vrot.lane.b32.xlu0 %v2794_v54, %s2704_s6  ;;  %v3122_v41 = vld [vmem:[#allocation3 + $0x7] ss:$8 sm:$0x3] }
  0xf3   :  { %5146 = vst [vmem:[#allocation48_spill] sm:$0xff] %v3122_v41 }
  0xf4   :  { %v2999_v42 = vpop.permute.xlu1 %564  ;;  %v3001_v43 = vpop.permute.xlu0 %562 }
  0xf5   :  { %5126 = vst [vmem:[#allocation28_spill] sm:$0xff] %v2999_v42  ;;  %5127 = vst [vmem:[#allocation29_spill] sm:$0xff] %v3001_v43  ;;  %v3065_v43 = vld [vmem:[#allocation3 + $0x3] ss:$8 sm:$0x3] }
  0xf6   :  { %1320 = vrot.lane.b32.xlu1 %v2829_v3, %s2705_s7  ;;  %1318 = vrot.lane.b32.xlu0 %v2816_v62, %s2705_s7  ;;  %v3067_v42 = vld [vmem:[#allocation3] ss:$8 sm:$0x3] }
  0xf8   :  { %v3005_v44 = vpop.permute.xlu1 %604  ;;  %v3007_v45 = vpop.permute.xlu0 %602 }
  0xf9   :  { %5128 = vst [vmem:[#allocation30_spill] sm:$0xff] %v3005_v44  ;;  %5129 = vst [vmem:[#allocation31_spill] sm:$0xff] %v3007_v45  ;;  %v3063_v44 = vld [vmem:[#allocation3 + $0x2] ss:$8 sm:$0x3] }
  0xfa   :  { %1327 = vrot.lane.b32.xlu1 %v2807_v58, %s2705_s7  ;;  %1325 = vrot.lane.b32.xlu0 %v2794_v54, %s2705_s7 }
  0xfc   :  { %v3011_v48 = vpop.permute.xlu1 %611  ;;  %v3013_v49 = vpop.permute.xlu0 %609 }
  0xfd   :  { %5130 = vst [vmem:[#allocation32_spill] sm:$0xff] %v3011_v48  ;;  %5131 = vst [vmem:[#allocation33_spill] sm:$0xff] %v3013_v49  ;;  %v3052_v49 = vld [vmem:[#allocation3 + $0x63] ss:$8 sm:$0x3] }
  0xfe   :  { %1367 = vrot.lane.b32.xlu1 %v2829_v3, %s2706_s8  ;;  %1365 = vrot.lane.b32.xlu0 %v2816_v62, %s2706_s8 }
 0x100   :  { %v3017_v50 = vpop.permute.xlu1 %651  ;;  %v3019_v51 = vpop.permute.xlu0 %649 }
 0x101   :  { %5132 = vst [vmem:[#allocation34_spill] sm:$0xff] %v3017_v50  ;;  %5133 = vst [vmem:[#allocation35_spill] sm:$0xff] %v3019_v51  ;;  %v3043_v50 = vld [vmem:[#allocation3 + $0x62] ss:$8 sm:$0x3] }
 0x102   :  { %1374 = vrot.lane.b32.xlu1 %v2807_v58, %s2706_s8  ;;  %1372 = vrot.lane.b32.xlu0 %v2794_v54, %s2706_s8 }
 0x104   :  { %v3023_v52 = vpop.permute.xlu1 %658  ;;  %v3025_v53 = vpop.permute.xlu0 %656 }
 0x105   :  { %5134 = vst [vmem:[#allocation36_spill] sm:$0xff] %v3023_v52  ;;  %5135 = vst [vmem:[#allocation37_spill] sm:$0xff] %v3025_v53  ;;  %v3041_v53 = vld [vmem:[#allocation3 + $0x61] ss:$8 sm:$0x3] }
 0x106   :  { %1414 = vrot.lane.b32.xlu1 %v2829_v3, %s2707_s10  ;;  %1412 = vrot.lane.b32.xlu0 %v2816_v62, %s2707_s10 }
 0x108   :  { %v3029_v61 = vpop.permute.xlu1 %698  ;;  %v3031_v63 = vpop.permute.xlu0 %696 }
 0x109   :  { %5136 = vst [vmem:[#allocation38_spill] sm:$0xff] %v3029_v61  ;;  %5137 = vst [vmem:[#allocation39_spill] sm:$0xff] %v3031_v63  ;;  %v3047_v61 = vsub.s32 0, %v3034_v0  ;;  %v3050_v63 = vsub.s32 1, %v3034_v0 }
 0x10a   :  { %1421 = vrot.lane.b32.xlu1 %v2807_v58, %s2707_s10  ;;  %1419 = vrot.lane.b32.xlu0 %v2794_v54, %s2707_s10  ;;  %v3069_v0 = vld [vmem:[#allocation3 + $0x64] ss:$8 sm:$0x3] }
 0x10c   :  { %v3037_v51 = vpop.permute.xlu1 %705  ;;  %v3039_v52 = vpop.permute.xlu0 %703 }
 0x10d   :  { %5139 = vst [vmem:[#allocation41_spill] sm:$0xff] %v3037_v51  ;;  %5140 = vst [vmem:[#allocation42_spill] sm:$0xff] %v3039_v52  ;;  %v3055_v51 = vand.u32 127, %v127_v60  ;;  %v3057_v52 = vld [vmem:[#allocation3 + $0x1] ss:$8 sm:$0x3] }
 0x10e   :  { %1461 = vrot.lane.b32.xlu1 %v2829_v3, %s2708_s11  ;;  %1459 = vrot.lane.b32.xlu0 %v2816_v62, %s2708_s11 }
 0x10f   :  { %vm230_vm2 = vcmp.lt.s32.totalorder %v3055_v51, 49  ;;  %vm129_vm3 = vcmp.lt.s32.totalorder %v3055_v51, 51  ;;  %vm183_vm4 = vcmp.lt.s32.totalorder %v3055_v51, 50  ;;  %vm277_vm5 = vcmp.lt.s32.totalorder %v3055_v51, 48 }
 0x110   :  { %v3059_v48 = vpop.permute.xlu1 %745  ;;  %v3061_v45 = vpop.permute.xlu0 %743  ;;  %v237_v39 = vsel %vm230_vm2, %v2887_v6, %v2901_v11  ;;  %vm324_vm6 = vcmp.lt.s32.totalorder %v3055_v51, 47  ;;  %v185_v38 = vsel %vm183_vm4, %v2907_v13, %v2899_v10  ;;  %vm371_vm7 = vcmp.lt.s32.totalorder %v3055_v51, 46 }
 0x111   :  { %5141 = vst [vmem:[#allocation43_spill] sm:$0xff] %v3059_v48  ;;  %5142 = vst [vmem:[#allocation44_spill] sm:$0xff] %v3061_v45  ;;  %v3091_v48 = vld [vmem:[#allocation3 + $0x65] ss:$8 sm:$0x3]  ;;  %vm418_vm8 = vcmp.lt.s32.totalorder %v3055_v51, 45 }
 0x112   :  { %1468 = vrot.lane.b32.xlu1 %v2807_v58, %s2708_s11  ;;  %1466 = vrot.lane.b32.xlu0 %v2794_v54, %s2708_s11  ;;  %vm465_vm9 = vcmp.lt.s32.totalorder %v3055_v51, 35  ;;  %vm512_vm10 = vcmp.lt.s32.totalorder %v3055_v51, 34  ;;  %vm559_vm11 = vcmp.lt.s32.totalorder %v3055_v51, 33  ;;  %vm606_vm12 = vcmp.lt.s32.totalorder %v3055_v51, 32 }
 0x113   :  { %vm653_vm13 = vcmp.lt.s32.totalorder %v3055_v51, 31  ;;  %vm700_vm14 = vcmp.lt.s32.totalorder %v3055_v51, 30  ;;  %vm747_vm15 = vcmp.lt.s32.totalorder %v3055_v51, 29  ;;  %vm794_vm0 = vcmp.lt.s32.totalorder %v3055_v51, 19 }
 0x114   :  { %v3095_v45 = vpop.permute.xlu1 %752  ;;  %v3097_v36 = vpop.permute.xlu0 %750 }
 0x115   :  { %5143 = vst [vmem:[#allocation45_spill] sm:$0xff] %v3095_v45  ;;  %5144 = vst [vmem:[#allocation46_spill] sm:$0xff] %v3097_v36  ;;  %v3120_v45 = vld [vmem:[#allocation3 + $0x67] ss:$8 sm:$0x3] }
 0x116   :  { %1508 = vrot.lane.b32.xlu1 %v2829_v3, %s2709_s2  ;;  %1506 = vrot.lane.b32.xlu0 %v2816_v62, %s2709_s2  ;;  %v3206_v36 = vld [vmem:[#allocation3 + $0x75] ss:$8 sm:$0x3] }
 0x117   :  { %5158 = vst [vmem:[#allocation60_spill] sm:$0xff] %v3206_v36  ;;  %v3261_v36 = vld [vmem:[#allocation3 + $0x80] ss:$8 sm:$0x3] }
 0x118   :  { %v3153_v33 = vpop.permute.xlu1 %792  ;;  %v3155_v32 = vpop.permute.xlu0 %790  ;;  %5168 = vst [vmem:[#allocation70_spill] sm:$0xff] %v3261_v36 }
 0x119   :  { %5151 = vst [vmem:[#allocation53_spill] sm:$0xff] %v3153_v33  ;;  %5152 = vst [vmem:[#allocation54_spill] sm:$0xff] %v3155_v32  ;;  %v3247_v32 = vld [vmem:[#allocation3 + $0x17] ss:$8 sm:$0x3]  ;;  %v238_v33 = vsel %vm230_vm2, %v2901_v11, %v2887_v6  ;;  %v5170_v6 = vrot.slane %v3052_v49, %v3050_v63 }
 0x11a   :  { %1515 = vrot.lane.b32.xlu1 %v2807_v58, %s2709_s2  ;;  %1513 = vrot.lane.b32.xlu0 %v2794_v54, %s2709_s2  ;;  %5165 = vst [vmem:[#allocation67_spill] sm:$0xff] %v3247_v32  ;;  %v3285_v11 = vld [vmem:[#allocation3 + $0x20] ss:$8 sm:$0x3]  ;;  %v190_v32 = vsel %vm183_vm4, %v2881_v4, %v2895_v9 }
 0x11b   :  { %v270_v34 = vmul.f32 %v5170_v6, %v237_v39  ;;  %v5171_v39 = vrot.slane %v3041_v53, %v3047_v61  ;;  %v5172_v6 = vrot.slane %v3041_v53, %v3050_v63  ;;  %v5175_v53 = vrot.slane %v3043_v50, %v3050_v63 }
 0x11c   :  { %v3208_v35 = vpop.permute.xlu1 %799  ;;  %v3210_v41 = vpop.permute.xlu0 %797 }
 0x11d   :  { %5159 = vst [vmem:[#allocation61_spill] sm:$0xff] %v3208_v35  ;;  %5160 = vst [vmem:[#allocation62_spill] sm:$0xff] %v3210_v41  ;;  %v3233_v35 = vld [vmem:[#allocation3 + $0x16] ss:$8 sm:$0x3] }
 0x11e   :  { %5163 = vst [vmem:[#allocation65_spill] sm:$0xff] %v3233_v35  ;;  %1555 = vrot.lane.b32.xlu1 %v2829_v3, %s2710_s12  ;;  %1553 = vrot.lane.b32.xlu0 %v2816_v62, %s2710_s12  ;;  %v3287_v41 = vld [vmem:[#allocation3 + $0x81] ss:$8 sm:$0x3] }
 0x120   :  { %v3257_v47 = vpop.permute.xlu1 %839  ;;  %v3259_v60 = vpop.permute.xlu0 %837 }
 0x121   :  { %5166 = vst [vmem:[#allocation68_spill] sm:$0xff] %v3257_v47  ;;  %5167 = vst [vmem:[#allocation69_spill] sm:$0xff] %v3259_v60  ;;  %v144_v60 = vsel %vm129_vm3, %v2883_v5, %v2889_v7  ;;  %v145_v47 = vsel %vm129_vm3, %v2889_v7, %v2883_v5  ;;  %v191_v5 = vsel %vm183_vm4, %v2895_v9, %v2881_v4  ;;  %v3345_v4 = vld [vmem:[#allocation3 + $0x22] ss:$8 sm:$0x3] }
 0x122   :  { %1562 = vrot.lane.b32.xlu1 %v2807_v58, %s2710_s12  ;;  %1560 = vrot.lane.b32.xlu0 %v2794_v54, %s2710_s12  ;;  %v5169_v7 = vrot.slane %v3052_v49, %v3047_v61  ;;  %v175_v49 = vmul.f32 %v5171_v39, %v145_v47  ;;  %5173 = vst [vmem:[#allocation71_spill] sm:$0xff] %v3345_v4 }
 0x123   :  { %v5174_v47 = vrot.slane %v3043_v50, %v3047_v61 }
 0x124   :  { %v269_v46 = vmul.f32 %v5169_v7, %v238_v33  ;;  %v3318_v36 = vpop.permute.xlu1 %846  ;;  %v3320_v35 = vpop.permute.xlu0 %844  ;;  %v3330_v33 = vld [vmem:[#allocation3 + $0x82] ss:$8 sm:$0x3]  ;;  %v176_v7 = vmul.f32 %v5172_v6, %v144_v60  ;;  %v3355_v60 = vmul.f32 %v5175_v53, %v190_v32  ;;  %v184_v6 = vsel %vm183_vm4, %v2899_v10, %v2907_v13  ;;  %v3377_v13 = vld [vmem:[#allocation3 + $0x83] ss:$8 sm:$0x3] }
 0x125   :  { %v3350_v39 = vmul.f32 %v5174_v47, %v191_v5  ;;  %5176 = vst [vmem:[#allocation72_spill] sm:$0xff] %v3377_v13  ;;  %v5177_v53 = vrot.slane %v3057_v52, %v3047_v61  ;;  %vm982_vm4 = vcmp.lt.s32.totalorder %v3055_v51, 15 }
 0x126   :  { %1602 = vrot.lane.b32.xlu1 %v2829_v3, %s2711_s13  ;;  %1600 = vrot.lane.b32.xlu0 %v2816_v62, %s2711_s13  ;;  %v3365_v1 = vadd.f32 %v269_v46, %v175_v49  ;;  %v3367_v5 = vadd.f32 %v270_v34, %v176_v7  ;;  %v278_v46 = vsel %vm277_vm5, %v2911_v14, %v2919_v16 }
 0x127   :  { %v205_v9 = vmul.f32 %v5177_v53, %v185_v38  ;;  %v279_v34 = vsel %vm277_vm5, %v2919_v16, %v2911_v14  ;;  %v5178_v7 = vrot.slane %v3057_v52, %v3050_v63  ;;  %v130_v38 = vsel %vm129_vm3, %v2893_v8, %v2921_v17 }
 0x128   :  { %v3369_v47 = vpop.permute.xlu1 %886  ;;  %v3371_v32 = vpop.permute.xlu0 %884  ;;  %v131_v53 = vsel %vm129_vm3, %v2921_v17, %v2893_v8  ;;  %v231_v16 = vsel %vm230_vm2, %v2905_v12, %v2913_v15  ;;  %v232_v52 = vsel %vm230_vm2, %v2913_v15, %v2905_v12  ;;  %v5181_v49 = vrot.slane %v3065_v43, %v3050_v63 }
 0x129   :  { %v206_v10 = vmul.f32 %v5178_v7, %v184_v6  ;;  %v3419_v6 = vld [vmem:[#allocation3 + $0x23] ss:$8 sm:$0x3]  ;;  %v5180_v7 = vrot.slane %v3065_v43, %v3047_v61  ;;  %v284_v12 = vsel %vm277_vm5, %v2929_v19, %v2927_v18  ;;  %v285_v15 = vsel %vm277_vm5, %v2927_v18, %v2929_v19 }
 0x12a   :  { %1609 = vrot.lane.b32.xlu1 %v2807_v58, %s2711_s13  ;;  %1607 = vrot.lane.b32.xlu0 %v2794_v54, %s2711_s13  ;;  %5179 = vst [vmem:[#allocation73_spill] sm:$0xff] %v3419_v6  ;;  %v300_v50 = vmul.f32 %v5181_v49, %v278_v46  ;;  %v5182_v43 = vrot.slane %v3067_v42, %v3047_v61  ;;  %v3492_v6 = vld [vmem:[#allocation3 + $0x24] ss:$8 sm:$0x3]  ;;  %vm888_vm2 = vcmp.lt.s32.totalorder %v3055_v51, 17  ;;  %vm935_vm3 = vcmp.lt.s32.totalorder %v3055_v51, 16 }
 0x12b   :  { %v299_v14 = vmul.f32 %v5180_v7, %v279_v34  ;;  %v5183_v34 = vrot.slane %v3067_v42, %v3050_v63  ;;  %v325_v7 = vsel %vm324_vm6, %v2935_v21, %v2933_v20  ;;  %v326_v18 = vsel %vm324_vm6, %v2933_v20, %v2935_v21  ;;  %5190 = vst [vmem:[#allocation74_spill] sm:$0xff] %v3492_v6  ;;  %v5235_v6 = vld [vmem:[#allocation50_spill] sm:$0xff] }
 0x12c   :  { %v3436_v17 = vpop.permute.xlu1 %893  ;;  %v3438_v8 = vpop.permute.xlu0 %891  ;;  %v158_v46 = vmul.f32 %v5182_v43, %v131_v53  ;;  %v5184_v19 = vrot.slane %v3063_v44, %v3047_v61  ;;  %v5185_v53 = vrot.slane %v3063_v44, %v3050_v63  ;;  %v5186_v20 = vrot.slane %v3069_v0, %v3047_v61 }
 0x12d   :  { %v159_v49 = vmul.f32 %v5183_v34, %v130_v38  ;;  %v3465_v34 = vld [vmem:[#allocation3 + $0x84] ss:$8 sm:$0x3]  ;;  %v302_v38 = vadd.f32 %v300_v50, %v206_v10  ;;  %v5191_v50 = vrot.slane %v3091_v48, %v3047_v61  ;;  %vm1029_vm5 = vcmp.lt.s32.totalorder %v3055_v51, 14 }
 0x12e   :  { %v252_v13 = vmul.f32 %v5184_v19, %v232_v52  ;;  %v253_v43 = vmul.f32 %v5185_v53, %v231_v16  ;;  %1649 = vrot.lane.b32.xlu1 %v2829_v3, %s2712_s14  ;;  %v316_v21 = vmul.f32 %v5186_v20, %v285_v15  ;;  %v5187_v52 = vrot.slane %v3069_v0, %v3050_v63 }
 0x12f   :  { %v331_v16 = vsel %vm324_vm6, %v2941_v23, %v2939_v22  ;;  %v332_v19 = vsel %vm324_vm6, %v2939_v22, %v2941_v23  ;;  %1647 = vrot.lane.b32.xlu0 %v2816_v62, %s2712_s14  ;;  %v301_v53 = vadd.f32 %v299_v14, %v205_v9  ;;  %v5188_v15 = vrot.slane %v3080_v40, %v3047_v61 }
 0x130   :  { %v317_v44 = vmul.f32 %v5187_v52, %v284_v12  ;;  %v5189_v0 = vrot.slane %v3080_v40, %v3050_v63  ;;  %v3488_v52 = vpop.permute.xlu1 %933  ;;  %v3490_v42 = vpop.permute.xlu0 %931  ;;  %v254_v4 = vadd.f32 %v252_v13, %v158_v46  ;;  %v255_v22 = vadd.f32 %v253_v43, %v159_v49  ;;  %v1261_v49 = vld [vmem:[#allocation3 + $0x30] ss:$8 sm:$0x3] }
 0x131   :  { %v346_v20 = vmul.f32 %v5188_v15, %v326_v18  ;;  %v363_v10 = vmul.f32 %v5191_v50, %v332_v19  ;;  %v5192_v40 = vrot.slane %v3091_v48, %v3050_v63  ;;  %v372_v13 = vsel %vm371_vm7, %v2947_v25, %v2945_v24  ;;  %v5200_v50 = vld [vmem:[#allocation47_spill] sm:$0xff] }
 0x132   :  { %v347_v12 = vmul.f32 %v5189_v0, %v325_v7  ;;  %v373_v46 = vsel %vm371_vm7, %v2945_v24, %v2947_v25  ;;  %1656 = vrot.lane.b32.xlu1 %v2807_v58, %s2712_s14  ;;  %v318_v7 = vadd.f32 %v316_v21, %v3350_v39  ;;  %v319_v18 = vadd.f32 %v317_v44, %v3355_v60  ;;  %v3541_v0 = vld [vmem:[#allocation3 + $0x25] ss:$8 sm:$0x3] }
 0x133   :  { %v364_v14 = vmul.f32 %v5192_v40, %v331_v16  ;;  %1654 = vrot.lane.b32.xlu0 %v2794_v54, %s2712_s14  ;;  %v3521_v16 = vld [vmem:[#allocation3 + $0x85] ss:$8 sm:$0x3]  ;;  %v348_v24 = vadd.f32 %v346_v20, %v254_v4  ;;  %v378_v39 = vsel %vm371_vm7, %v2953_v27, %v2951_v26  ;;  %v379_v60 = vsel %vm371_vm7, %v2951_v26, %v2953_v27 }
 0x134   :  { %5193 = vst [vmem:[#allocation75_spill] sm:$0xff] %v3521_v16  ;;  %v349_v25 = vadd.f32 %v347_v12, %v255_v22  ;;  %v3531_v21 = vpop.permute.xlu1 %940  ;;  %v5194_v44 = vrot.slane %v3093_v37, %v3047_v61  ;;  %v5195_v4 = vrot.slane %v3093_v37, %v3050_v63  ;;  %v3539_v20 = vpop.permute.xlu0 %938  ;;  %5196 = vst [vmem:[#allocation76_spill] sm:$0xff] %v3541_v0  ;;  %v5227_v16 = vld [vmem:[#allocation49_spill] sm:$0xff]  ;;  %vm1123_vm6 = vcmp.lt.s32.totalorder %v3055_v51, 3 }
 0x135   :  { %v1266_v12 = vrot.slane %v1261_v49, %v3047_v61  ;;  %v1270_v22 = vrot.slane %v1261_v49, %v3050_v63  ;;  %v365_v26 = vadd.f32 %v363_v10, %v3365_v1  ;;  %v366_v27 = vadd.f32 %v364_v14, %v3367_v5  ;;  %v3569_v14 = vld [vmem:[#allocation3 + $0x86] ss:$8 sm:$0x3]  ;;  %v3755_v0 = vld [vmem:[#allocation3 + $0x92] ss:$8 sm:$0x3] }
 0x136   :  { %v393_v19 = vmul.f32 %v5194_v44, %v373_v46  ;;  %v394_v15 = vmul.f32 %v5195_v4, %v372_v13  ;;  %1696 = vrot.lane.b32.xlu1 %v2829_v3, %s2713_s15  ;;  %v5197_v40 = vrot.slane %v3107_v55, %v3047_v61  ;;  %v5198_v46 = vrot.slane %v3107_v55, %v3050_v63 }
 0x137   :  { %v419_v5 = vsel %vm418_vm8, %v2959_v29, %v2957_v28  ;;  %v420_v10 = vsel %vm418_vm8, %v2957_v28, %v2959_v29  ;;  %1694 = vrot.lane.b32.xlu0 %v2816_v62, %s2713_s15  ;;  %v425_v55 = vsel %vm418_vm8, %v2965_v31, %v2963_v30  ;;  %v426_v49 = vsel %vm418_vm8, %v2963_v30, %v2965_v31 }
 0x138   :  { %v410_v13 = vmul.f32 %v5197_v40, %v379_v60  ;;  %v411_v1 = vmul.f32 %v5198_v46, %v378_v39  ;;  %v3580_v39 = vpop.permute.xlu1 %980  ;;  %v3586_v60 = vadd.f32 %v393_v19, %v301_v53  ;;  %v3588_v44 = vadd.f32 %v394_v15, %v302_v38  ;;  %v3590_v4 = vpop.permute.xlu0 %978  ;;  %v3592_v40 = vld [vmem:[#allocation3 + $0x26] ss:$8 sm:$0x3]  ;;  %v1290_v46 = vld [vmem:[#allocation3 + $0x91] ss:$8 sm:$0x3] }
 0x139   :  { %5199 = vst [vmem:[#allocation77_spill] sm:$0xff] %v3592_v40  ;;  %v1275_v30 = vmul.f32 %v1266_v12, %v2809_v59  ;;  %v1276_v31 = vmul.f32 %v1270_v22, %v2822_v2  ;;  %v5201_v37 = vrot.slane %v5200_v50, %v3047_v61  ;;  %v5202_v48 = vrot.slane %v5200_v50, %v3050_v63  ;;  %v5210_v38 = vld [vmem:[#allocation18_spill] sm:$0xff] }
 0x13a   :  { %1703 = vrot.lane.b32.xlu1 %v2807_v58, %s2713_s15  ;;  %v3608_v19 = vadd.f32 %v410_v13, %v318_v7  ;;  %v3610_v2 = vadd.f32 %v411_v1, %v319_v18  ;;  %v5203_v15 = vrot.slane %v3120_v45, %v3047_v61  ;;  %v3627_v13 = vld [vmem:[#allocation3 + $0x87] ss:$8 sm:$0x3]  ;;  %v1295_v1 = vrot.slane %v1290_v46, %v3047_v61 }
 0x13b   :  { %v440_v43 = vmul.f32 %v5201_v37, %v420_v10  ;;  %v441_v53 = vmul.f32 %v5202_v48, %v419_v5  ;;  %v5204_v48 = vrot.slane %v3120_v45, %v3050_v63  ;;  %1701 = vrot.lane.b32.xlu0 %v2794_v54, %s2713_s15  ;;  %5206 = vst [vmem:[#allocation78_spill] sm:$0xff] %v3627_v13  ;;  %v1281_v29 = vrot.slane %v1275_v30, 7  ;;  %v5211_v18 = vld [vmem:[#allocation19_spill] sm:$0xff]  ;;  %v5213_v30 = vld [vmem:[#allocation20_spill] sm:$0xff] }
 0x13c   :  { %v457_v37 = vmul.f32 %v5203_v15, %v426_v49  ;;  %v3621_v5 = vpop.permute.xlu1 %987  ;;  %v1299_v45 = vrot.slane %v1290_v46, %v3050_v63  ;;  %v3631_v10 = vpop.permute.xlu0 %985  ;;  %v5209_v15 = vld [vmem:[#allocation17_spill] sm:$0xff]  ;;  %v1283_v28 = vrot.slane %v1276_v31, 7  ;;  %v466_v9 = vsel %vm465_vm9, %v5211_v18, %v5210_v38 }
 0x13d   :  { %v458_v50 = vmul.f32 %v5204_v48, %v425_v55  ;;  %5205 = vst [vmem:[#allocation47_spill] sm:$0xff] %v3621_v5  ;;  %5207 = vst [vmem:[#allocation79_spill] sm:$0xff] %v3631_v10  ;;  %v5208_v55 = vld [vmem:[#allocation16_spill] sm:$0xff]  ;;  %v1274_v48 = vmul.f32 %v1270_v22, %v5209_v15  ;;  %v3635_v59 = vadd.f32 %v440_v43, %v348_v24  ;;  %v5214_v31 = vld [vmem:[#allocation21_spill] sm:$0xff]  ;;  %vm1217_vm7 = vcmp.lt.s32.totalorder %v3055_v51, 1 }
 0x13e   :  { %v1273_v49 = vmul.f32 %v1266_v12, %v5208_v55  ;;  %v3637_v7 = vadd.f32 %v441_v53, %v349_v25  ;;  %v467_v46 = vsel %vm465_vm9, %v5210_v38, %v5211_v18  ;;  %1743 = vrot.lane.b32.xlu1 %v2829_v3, %s2714_s16  ;;  %v3648_v12 = vadd.f32 %v457_v37, %v365_v26  ;;  %v3657_v25 = vld [vmem:[#allocation3 + $0x27] ss:$8 sm:$0x3]  ;;  %v5216_v38 = vld [vmem:[#allocation13_spill] sm:$0xff]  ;;  %v5218_v55 = vld [vmem:[#allocation48_spill] sm:$0xff] }
 0x13f   :  { %v3650_v22 = vadd.f32 %v458_v50, %v366_v27  ;;  %1741 = vrot.lane.b32.xlu0 %v2816_v62, %s2714_s16  ;;  %5212 = vst [vmem:[#allocation16_spill] sm:$0xff] %v3657_v25  ;;  %v472_v53 = vsel %vm465_vm9, %v5214_v31, %v5213_v30  ;;  %v473_v26 = vsel %vm465_vm9, %v5213_v30, %v5214_v31  ;;  %v5217_v50 = vld [vmem:[#allocation15_spill] sm:$0xff]  ;;  %v3729_v25 = vld [vmem:[#allocation3 + $0x31] ss:$8 sm:$0x3]  ;;  %vm1322_vm8 = vcmp.lt.s32.totalorder %v3055_v51, 127 }
 0x140   :  { %v3668_v27 = vpop.permute.xlu1 %1027  ;;  %v1304_v37 = vmul.f32 %v1295_v1, %v5216_v38  ;;  %v1305_v18 = vmul.f32 %v1299_v45, %v5217_v50  ;;  %v5219_v15 = vrot.slane %v5218_v55, %v3047_v61  ;;  %v5220_v43 = vrot.slane %v5218_v55, %v3050_v63  ;;  %v3678_v13 = vpop.permute.xlu0 %1025  ;;  %v3691_v50 = vld [vmem:[#allocation3 + $0x90] ss:$8 sm:$0x3]  ;;  %5234 = vst [vmem:[#allocation13_spill] sm:$0xff] %v3729_v25 }
 0x141   :  { %5215 = vst [vmem:[#allocation17_spill] sm:$0xff] %v3668_v27  ;;  %5221 = vst [vmem:[#allocation18_spill] sm:$0xff] %v3678_v13  ;;  %v3681_v30 = vsel %vm118_vm1, %v1281_v29, %v1273_v49  ;;  %v3684_v31 = vsel %vm118_vm1, %v1283_v28, %v1274_v48  ;;  %v5225_v55 = vld [vmem:[#allocation12_spill] sm:$0xff]  ;;  %v5228_v29 = vrot.slane %v5227_v16, %v3047_v61  ;;  %vm1076_vm9 = vcmp.lt.s32.totalorder %v3055_v51, 13 }
 0x142   :  { %v487_v24 = vmul.f32 %v5219_v15, %v467_v46  ;;  %v488_v23 = vmul.f32 %v5220_v43, %v466_v9  ;;  %5222 = vst [vmem:[#allocation19_spill] sm:$0xff] %v3681_v30  ;;  %5223 = vst [vmem:[#allocation20_spill] sm:$0xff] %v3684_v31  ;;  %1750 = vrot.lane.b32.xlu1 %v2807_v58, %s2714_s16  ;;  %v1302_v9 = vmul.f32 %v1295_v1, %v5225_v55  ;;  %v5226_v43 = vld [vmem:[#allocation14_spill] sm:$0xff]  ;;  %v5231_v30 = vld [vmem:[#allocation23_spill] sm:$0xff] }
 0x143   :  { %5224 = vst [vmem:[#allocation21_spill] sm:$0xff] %v3691_v50  ;;  %v1303_v15 = vmul.f32 %v1299_v45, %v5226_v43  ;;  %v504_v49 = vmul.f32 %v5228_v29, %v473_v26  ;;  %v5229_v28 = vrot.slane %v5227_v16, %v3050_v63  ;;  %v5230_v31 = vld [vmem:[#allocation22_spill] sm:$0xff]  ;;  %1748 = vrot.lane.b32.xlu0 %v2794_v54, %s2714_s16  ;;  %v5232_v45 = vld [vmem:[#allocation24_spill] sm:$0xff]  ;;  %v5233_v26 = vld [vmem:[#allocation25_spill] sm:$0xff]  ;;  %v1310_v43 = vrot.slane %v1304_v37, 7 }
 0x144   :  { %v513_v38 = vsel %vm512_vm10, %v5231_v30, %v5230_v31  ;;  %v514_v1 = vsel %vm512_vm10, %v5230_v31, %v5231_v30  ;;  %v519_v16 = vsel %vm512_vm10, %v5233_v26, %v5232_v45  ;;  %v3719_v55 = vpop.permute.xlu1 %1034  ;;  %v1312_v29 = vrot.slane %v1305_v18, 7  ;;  %5243 = vst [vmem:[#allocation15_spill] sm:$0xff] %v3755_v0  ;;  %v5318_v50 = vld [vmem:[#allocation67_spill] sm:$0xff] }
 0x145   :  { %v505_v48 = vmul.f32 %v5229_v28, %v472_v53  ;;  %v520_v53 = vsel %vm512_vm10, %v5232_v45, %v5233_v26  ;;  %v489_v30 = vadd.f32 %v487_v24, %v3586_v60  ;;  %v490_v31 = vadd.f32 %v488_v23, %v3588_v44  ;;  %v3723_v28 = vpop.permute.xlu0 %1032  ;;  %v5238_v24 = vld [vmem:[#allocation26_spill] sm:$0xff]  ;;  %v5239_v23 = vld [vmem:[#allocation27_spill] sm:$0xff] }
 0x146   :  { %v5236_v45 = vrot.slane %v5235_v6, %v3047_v61  ;;  %v5237_v37 = vrot.slane %v5235_v6, %v3050_v63  ;;  %v560_v44 = vsel %vm559_vm11, %v5239_v23, %v5238_v24  ;;  %v561_v18 = vsel %vm559_vm11, %v5238_v24, %v5239_v23  ;;  %1790 = vrot.lane.b32.xlu1 %v2829_v3, %s2715_s17 }
 0x147   :  { %v506_v40 = vadd.f32 %v504_v49, %v3608_v19  ;;  %1788 = vrot.lane.b32.xlu0 %v2816_v62, %s2715_s17  ;;  %v3767_v49 = vsel %vm118_vm1, %v1312_v29, %v1303_v15  ;;  %v5260_v19 = vld [vmem:[#allocation33_spill] sm:$0xff]  ;;  %vm1369_vm10 = vcmp.lt.s32.totalorder %v3055_v51, 126 }
 0x148   :  { %v534_v26 = vmul.f32 %v5236_v45, %v514_v1  ;;  %v535_v60 = vmul.f32 %v5237_v37, %v513_v38  ;;  %v507_v1 = vadd.f32 %v505_v48, %v3610_v2  ;;  %v5240_v45 = vld [vmem:[#allocation51_spill] sm:$0xff]  ;;  %v3757_v24 = vpop.permute.xlu1 %1074  ;;  %v3764_v2 = vsel %vm118_vm1, %v1310_v43, %v1302_v9  ;;  %5246 = vst [vmem:[#allocation14_spill] sm:$0xff] %v3767_v49  ;;  %v5247_v48 = vld [vmem:[#allocation52_spill] sm:$0xff] }
 0x149   :  { %v5241_v6 = vrot.slane %v5240_v45, %v3047_v61  ;;  %v5242_v37 = vrot.slane %v5240_v45, %v3050_v63  ;;  %5244 = vst [vmem:[#allocation48_spill] sm:$0xff] %v3757_v24  ;;  %5245 = vst [vmem:[#allocation12_spill] sm:$0xff] %v3764_v2  ;;  %v5249_v45 = vrot.slane %v5247_v48, %v3050_v63  ;;  %v5251_v24 = vld [vmem:[#allocation29_spill] sm:$0xff]  ;;  %v3784_v15 = vpop.permute.xlu0 %1072  ;;  %vm841_vm1 = vcmp.lt.s32.totalorder %v3055_v51, 18 }
 0x14a   :  { %5252 = vst [vmem:[#allocation49_spill] sm:$0xff] %v3784_v15  ;;  %v536_v43 = vadd.f32 %v534_v26, %v3635_v59  ;;  %v537_v29 = vadd.f32 %v535_v60, %v3637_v7  ;;  %1797 = vrot.lane.b32.xlu1 %v2807_v58, %s2715_s17  ;;  %v5256_v26 = vld [vmem:[#allocation55_spill] sm:$0xff] }
 0x14b   :  { %v551_v38 = vmul.f32 %v5241_v6, %v520_v53  ;;  %v552_v46 = vmul.f32 %v5242_v37, %v519_v16  ;;  %v5248_v16 = vrot.slane %v5247_v48, %v3047_v61  ;;  %v582_v6 = vmul.f32 %v5249_v45, %v560_v44  ;;  %v5250_v37 = vld [vmem:[#allocation28_spill] sm:$0xff]  ;;  %v5254_v45 = vld [vmem:[#allocation30_spill] sm:$0xff]  ;;  %1795 = vrot.lane.b32.xlu0 %v2794_v54, %s2715_s17 }
 0x14c   :  { %v566_v23 = vsel %vm559_vm11, %v5251_v24, %v5250_v37  ;;  %v567_v9 = vsel %vm559_vm11, %v5250_v37, %v5251_v24  ;;  %v3793_v48 = vld [vmem:[#allocation3 + $0x32] ss:$8 sm:$0x3]  ;;  %v5255_v37 = vld [vmem:[#allocation31_spill] sm:$0xff]  ;;  %v5257_v60 = vrot.slane %v5256_v26, %v3047_v61  ;;  %vm1170_vm11 = vcmp.lt.s32.totalorder %v3055_v51, 2 }
 0x14d   :  { %v581_v53 = vmul.f32 %v5248_v16, %v561_v18  ;;  %5253 = vst [vmem:[#allocation22_spill] sm:$0xff] %v3793_v48  ;;  %v553_v24 = vadd.f32 %v551_v38, %v3648_v12  ;;  %v554_v16 = vadd.f32 %v552_v46, %v3650_v22  ;;  %v607_v59 = vsel %vm606_vm12, %v5255_v37, %v5254_v45  ;;  %v5259_v38 = vld [vmem:[#allocation32_spill] sm:$0xff] }
 0x14e   :  { %v608_v7 = vsel %vm606_vm12, %v5254_v45, %v5255_v37  ;;  %v598_v12 = vmul.f32 %v5257_v60, %v567_v9  ;;  %v5258_v22 = vrot.slane %v5256_v26, %v3050_v63  ;;  %v613_v18 = vsel %vm606_vm12, %v5260_v19, %v5259_v38  ;;  %v3821_v37 = vpop.permute.xlu1 %1081  ;;  %v3823_v44 = vld [vmem:[#allocation3 + $0x93] ss:$8 sm:$0x3]  ;;  %v3826_v26 = vpop.permute.xlu0 %1079  ;;  %1837 = vrot.lane.b32.xlu1 %v2829_v3, %s2716_s18 }
 0x14f   :  { %v614_v45 = vsel %vm606_vm12, %v5259_v38, %v5260_v19  ;;  %5261 = vst [vmem:[#allocation23_spill] sm:$0xff] %v3821_v37  ;;  %5262 = vst [vmem:[#allocation24_spill] sm:$0xff] %v3823_v44  ;;  %v583_v49 = vadd.f32 %v581_v53, %v489_v30  ;;  %v584_v9 = vadd.f32 %v582_v6, %v490_v31  ;;  %v5266_v30 = vld [vmem:[#allocation34_spill] sm:$0xff]  ;;  %v5267_v31 = vld [vmem:[#allocation35_spill] sm:$0xff]  ;;  %1835 = vrot.lane.b32.xlu0 %v2816_v62, %s2716_s18 }
 0x150   :  { %v599_v46 = vmul.f32 %v5258_v22, %v566_v23  ;;  %5263 = vst [vmem:[#allocation25_spill] sm:$0xff] %v3826_v26  ;;  %v5264_v22 = vrot.slane %v3168_v57, %v3047_v61  ;;  %v5265_v38 = vrot.slane %v3168_v57, %v3050_v63  ;;  %v654_v53 = vsel %vm653_vm13, %v5267_v31, %v5266_v30  ;;  %v3847_v60 = vld [vmem:[#allocation3 + $0x33] ss:$8 sm:$0x3] }
 0x151   :  { %v655_v6 = vsel %vm653_vm13, %v5266_v30, %v5267_v31  ;;  %5268 = vst [vmem:[#allocation50_spill] sm:$0xff] %v3847_v60  ;;  %v3861_v23 = vld [vmem:[#allocation3 + $0x94] ss:$8 sm:$0x3]  ;;  %v600_v48 = vadd.f32 %v598_v12, %v506_v40  ;;  %vm1416_vm12 = vcmp.lt.s32.totalorder %v3055_v51, 125 }
 0x152   :  { %v628_v19 = vmul.f32 %v5264_v22, %v608_v7  ;;  %v629_v2 = vmul.f32 %v5265_v38, %v607_v59  ;;  %v5269_v7 = vld [vmem:[#allocation56_spill] sm:$0xff]  ;;  %5272 = vst [vmem:[#allocation26_spill] sm:$0xff] %v3861_v23  ;;  %v601_v25 = vadd.f32 %v599_v46, %v507_v1  ;;  %v3879_v12 = vpop.permute.xlu0 %1119  ;;  %1844 = vrot.lane.b32.xlu1 %v2807_v58, %s2716_s18 }
 0x153   :  { %v5270_v22 = vrot.slane %v5269_v7, %v3047_v61  ;;  %v5271_v59 = vrot.slane %v5269_v7, %v3050_v63  ;;  %v5273_v26 = vld [vmem:[#allocation36_spill] sm:$0xff]  ;;  %5279 = vst [vmem:[#allocation51_spill] sm:$0xff] %v3879_v12  ;;  %1842 = vrot.lane.b32.xlu0 %v2794_v54, %s2716_s18 }
 0x154   :  { %v3885_v37 = vld [vmem:[#allocation3 + $0x34] ss:$8 sm:$0x3] }
 0x155   :  { %v645_v57 = vmul.f32 %v5270_v22, %v614_v45  ;;  %v646_v38 = vmul.f32 %v5271_v59, %v613_v18  ;;  %v5274_v45 = vld [vmem:[#allocation37_spill] sm:$0xff]  ;;  %v3871_v22 = vpop.permute.xlu1 %1121  ;;  %5280 = vst [vmem:[#allocation52_spill] sm:$0xff] %v3885_v37  ;;  %v5295_v12 = vld [vmem:[#allocation60_spill] sm:$0xff] }
 0x156   :  { %v660_v7 = vsel %vm653_vm13, %v5274_v45, %v5273_v26  ;;  %v661_v18 = vsel %vm653_vm13, %v5273_v26, %v5274_v45  ;;  %5275 = vst [vmem:[#allocation27_spill] sm:$0xff] %v3871_v22  ;;  %v5276_v59 = vld [vmem:[#allocation57_spill] sm:$0xff]  ;;  %v630_v26 = vadd.f32 %v628_v19, %v536_v43  ;;  %v631_v45 = vadd.f32 %v629_v2, %v537_v29  ;;  %v5284_v2 = vld [vmem:[#allocation38_spill] sm:$0xff]  ;;  %v5285_v43 = vld [vmem:[#allocation39_spill] sm:$0xff] }
 0x157   :  { %v5277_v30 = vrot.slane %v5276_v59, %v3047_v61  ;;  %v5278_v40 = vrot.slane %v5276_v59, %v3050_v63  ;;  %v648_v59 = vadd.f32 %v646_v38, %v554_v16  ;;  %v701_v29 = vsel %vm700_vm14, %v5285_v43, %v5284_v2  ;;  %v5289_v19 = vld [vmem:[#allocation44_spill] sm:$0xff]  ;;  %1884 = vrot.lane.b32.xlu1 %v2829_v3, %s2717_s19 }
 0x158   :  { %1882 = vrot.lane.b32.xlu0 %v2816_v62, %s2717_s19  ;;  %v5296_v22 = vrot.slane %v5295_v12, %v3047_v61  ;;  %vm1463_vm13 = vcmp.lt.s32.totalorder %v3055_v51, 115 }
 0x159   :  { %v675_v31 = vmul.f32 %v5277_v30, %v655_v6  ;;  %v676_v1 = vmul.f32 %v5278_v40, %v654_v53  ;;  %v647_v30 = vadd.f32 %v645_v57, %v553_v24  ;;  %v5281_v40 = vld [vmem:[#allocation58_spill] sm:$0xff]  ;;  %v702_v24 = vsel %vm700_vm14, %v5284_v2, %v5285_v43  ;;  %v3907_v16 = vpop.permute.xlu1 %1128  ;;  %v3922_v2 = vpop.permute.xlu0 %1126  ;;  %v5288_v43 = vld [vmem:[#allocation43_spill] sm:$0xff] }
 0x15a   :  { %v5282_v46 = vrot.slane %v5281_v40, %v3047_v61  ;;  %v5283_v44 = vrot.slane %v5281_v40, %v3050_v63  ;;  %v5292_v6 = vld [vmem:[#allocation59_spill] sm:$0xff] }
 0x15b   :  { %v677_v57 = vadd.f32 %v675_v31, %v583_v49  ;;  %v678_v38 = vadd.f32 %v676_v1, %v584_v9  ;;  %v748_v49 = vsel %vm747_vm15, %v5289_v19, %v5288_v43  ;;  %v749_v9 = vsel %vm747_vm15, %v5288_v43, %v5289_v19  ;;  %v5290_v31 = vld [vmem:[#allocation45_spill] sm:$0xff]  ;;  %v5291_v1 = vld [vmem:[#allocation46_spill] sm:$0xff]  ;;  %1891 = vrot.lane.b32.xlu1 %v2807_v58, %s2717_s19 }
 0x15c   :  { %v692_v15 = vmul.f32 %v5282_v46, %v661_v18  ;;  %v693_v60 = vmul.f32 %v5283_v44, %v660_v7  ;;  %v5286_v7 = vld [vmem:[#allocation41_spill] sm:$0xff]  ;;  %v5287_v18 = vld [vmem:[#allocation42_spill] sm:$0xff]  ;;  %v754_v44 = vsel %vm747_vm15, %v5291_v1, %v5290_v31  ;;  %v5293_v37 = vrot.slane %v5292_v6, %v3047_v61  ;;  %1889 = vrot.lane.b32.xlu0 %v2794_v54, %s2717_s19 }
 0x15d   :  { %v707_v46 = vsel %vm700_vm14, %v5287_v18, %v5286_v7  ;;  %v708_v40 = vsel %vm700_vm14, %v5286_v7, %v5287_v18  ;;  %v755_v7 = vsel %vm747_vm15, %v5290_v31, %v5291_v1  ;;  %v5294_v19 = vrot.slane %v5292_v6, %v3050_v63  ;;  %v5301_v6 = vld [vmem:[#allocation63_spill] sm:$0xff] }
 0x15e   :  { %v694_v18 = vadd.f32 %v692_v15, %v600_v48  ;;  %v695_v53 = vadd.f32 %v693_v60, %v601_v25  ;;  %v722_v23 = vmul.f32 %v5293_v37, %v702_v24  ;;  %v739_v0 = vmul.f32 %v5296_v22, %v708_v40  ;;  %v5298_v15 = vld [vmem:[#allocation53_spill] sm:$0xff]  ;;  %v5299_v25 = vld [vmem:[#allocation54_spill] sm:$0xff]  ;;  %v3962_v60 = vpop.permute.xlu1 %1168 }
 0x15f   :  { %v723_v43 = vmul.f32 %v5294_v19, %v701_v29  ;;  %v5297_v31 = vrot.slane %v5295_v12, %v3050_v63  ;;  %v795_v48 = vsel %vm794_vm0, %v5299_v25, %v5298_v15  ;;  %v796_v37 = vsel %vm794_vm0, %v5298_v15, %v5299_v25  ;;  %5300 = vst [vmem:[#allocation28_spill] sm:$0xff] %v3962_v60  ;;  %v3977_v15 = vpop.permute.xlu0 %1166  ;;  %v5308_v25 = vld [vmem:[#allocation61_spill] sm:$0xff]  ;;  %v5309_v60 = vld [vmem:[#allocation62_spill] sm:$0xff] }
 0x160   :  { %v5302_v29 = vrot.slane %v5301_v6, %v3047_v61  ;;  %v5303_v12 = vrot.slane %v5301_v6, %v3050_v63  ;;  %5307 = vst [vmem:[#allocation29_spill] sm:$0xff] %v3977_v15  ;;  %v5310_v6 = vld [vmem:[#allocation68_spill] sm:$0xff]  ;;  %1931 = vrot.lane.b32.xlu1 %v2829_v3, %s2718_s20  ;;  %1929 = vrot.lane.b32.xlu0 %v2816_v62, %s2718_s20  ;;  %vm1510_vm14 = vcmp.lt.s32.totalorder %v3055_v51, 114  ;;  %vm1557_vm15 = vcmp.lt.s32.totalorder %v3055_v51, 113 }
 0x161   :  { %v740_v1 = vmul.f32 %v5297_v31, %v707_v46  ;;  %v5304_v46 = vld [vmem:[#allocation64_spill] sm:$0xff] }
 0x162   :  { %v769_v22 = vmul.f32 %v5302_v29, %v749_v9  ;;  %v770_v24 = vmul.f32 %v5303_v12, %v748_v49  ;;  %v5305_v40 = vrot.slane %v5304_v46, %v3047_v61  ;;  %v5306_v31 = vrot.slane %v5304_v46, %v3050_v63  ;;  %v5312_v12 = vld [vmem:[#allocation65_spill] sm:$0xff] }
 0x163   :  { %v801_v9 = vsel %vm794_vm0, %v5309_v60, %v5308_v25  ;;  %v802_v49 = vsel %vm794_vm0, %v5308_v25, %v5309_v60  ;;  %v5313_v46 = vrot.slane %v5312_v12, %v3047_v61  ;;  %v5314_v60 = vrot.slane %v5312_v12, %v3050_v63  ;;  %v4013_v12 = vpop.permute.xlu1 %1175 }
 0x164   :  { %v786_v19 = vmul.f32 %v5305_v40, %v755_v7  ;;  %v787_v10 = vmul.f32 %v5306_v31, %v754_v44  ;;  %v5311_v7 = vld [vmem:[#allocation69_spill] sm:$0xff]  ;;  %v848_v25 = vsel %vm841_vm1, %v3320_v35, %v3318_v36  ;;  %v742_v15 = vadd.f32 %v740_v1, %v648_v59  ;;  %v5321_v59 = vld [vmem:[#allocation70_spill] sm:$0xff]  ;;  %1938 = vrot.lane.b32.xlu1 %v2807_v58, %s2718_s20 }
 0x165   :  { %v842_v29 = vsel %vm841_vm1, %v5311_v7, %v5310_v6  ;;  %v843_v44 = vsel %vm841_vm1, %v5310_v6, %v5311_v7  ;;  %v816_v40 = vmul.f32 %v5313_v46, %v796_v37  ;;  %v817_v31 = vmul.f32 %v5314_v60, %v795_v48  ;;  %v5315_v48 = vld [vmem:[#allocation66_spill] sm:$0xff]  ;;  %1936 = vrot.lane.b32.xlu0 %v2794_v54, %s2718_s20 }
 0x166   :  { %v849_v6 = vsel %vm841_vm1, %v3318_v36, %v3320_v35  ;;  %v724_v7 = vadd.f32 %v722_v23, %v630_v26  ;;  %v725_v37 = vadd.f32 %v723_v43, %v631_v45  ;;  %v741_v46 = vadd.f32 %v739_v0, %v647_v30  ;;  %v4028_v0 = vpop.permute.xlu0 %1173 }
 0x167   :  { %v5316_v60 = vrot.slane %v5315_v48, %v3047_v61  ;;  %v5317_v13 = vrot.slane %v5315_v48, %v3050_v63  ;;  %v5319_v35 = vrot.slane %v5318_v50, %v3047_v61  ;;  %v5320_v23 = vrot.slane %v5318_v50, %v3050_v63 }
 0x168   :  { %v771_v45 = vadd.f32 %v769_v22, %v677_v57  ;;  %v772_v30 = vadd.f32 %v770_v24, %v678_v38  ;;  %v5322_v43 = vrot.slane %v5321_v59, %v3047_v61  ;;  %v5323_v1 = vrot.slane %v5321_v59, %v3050_v63  ;;  %1978 = vrot.lane.b32.xlu1 %v2829_v3, %s2719_s21 }
 0x169   :  { %v833_v5 = vmul.f32 %v5316_v60, %v802_v49  ;;  %v834_v27 = vmul.f32 %v5317_v13, %v801_v9  ;;  %v863_v36 = vmul.f32 %v5319_v35, %v843_v44  ;;  %v864_v26 = vmul.f32 %v5320_v23, %v842_v29  ;;  %1976 = vrot.lane.b32.xlu0 %v2816_v62, %s2719_s21 }
 0x16a   :  { %v880_v13 = vmul.f32 %v5322_v43, %v849_v6  ;;  %v881_v9 = vmul.f32 %v5323_v1, %v848_v25  ;;  %v788_v50 = vadd.f32 %v786_v19, %v694_v18  ;;  %v789_v49 = vadd.f32 %v787_v10, %v695_v53  ;;  %v4056_v18 = vpop.permute.xlu1 %1215 }
 0x16b   :  { %v818_v29 = vadd.f32 %v816_v40, %v724_v7  ;;  %v819_v44 = vadd.f32 %v817_v31, %v725_v37  ;;  %v889_v57 = vsel %vm888_vm2, %v3371_v32, %v3369_v47  ;;  %v890_v38 = vsel %vm888_vm2, %v3369_v47, %v3371_v32  ;;  %v4058_v31 = vpop.permute.xlu0 %1213 }
 0x16c   :  { %v895_v10 = vsel %vm888_vm2, %v3438_v8, %v3436_v17  ;;  %v896_v53 = vsel %vm888_vm2, %v3436_v17, %v3438_v8  ;;  %v835_v22 = vadd.f32 %v833_v5, %v741_v46  ;;  %v836_v24 = vadd.f32 %v834_v27, %v742_v15  ;;  %1985 = vrot.lane.b32.xlu1 %v2807_v58, %s2719_s21 }
 0x16d   :  { %v865_v19 = vadd.f32 %v863_v36, %v771_v45  ;;  %v866_v40 = vadd.f32 %v864_v26, %v772_v30  ;;  %v882_v25 = vadd.f32 %v880_v13, %v788_v50  ;;  %v883_v47 = vadd.f32 %v881_v9, %v789_v49  ;;  %v5334_v50 = vld [vmem:[#allocation71_spill] sm:$0xff]  ;;  %1983 = vrot.lane.b32.xlu0 %v2794_v54, %s2719_s21 }
 0x16e   :  { %v942_v32 = vsel %vm935_vm3, %v3539_v20, %v3531_v21  ;;  %v943_v8 = vsel %vm935_vm3, %v3531_v21, %v3539_v20  ;;  %v5324_v17 = vrot.slane %v3285_v11, %v3047_v61  ;;  %v5325_v27 = vrot.slane %v3285_v11, %v3050_v63  ;;  %v1223_v48 = vpop.permute.xlu1 %1222 }
 0x16f   :  { %v5326_v6 = vrot.slane %v3287_v41, %v3047_v61  ;;  %v5327_v37 = vrot.slane %v3287_v41, %v3050_v63  ;;  %v936_v21 = vsel %vm935_vm3, %v3490_v42, %v3488_v52  ;;  %v937_v11 = vsel %vm935_vm3, %v3488_v52, %v3490_v42 }
 0x170   :  { %v910_v5 = vmul.f32 %v5324_v17, %v890_v38  ;;  %v911_v15 = vmul.f32 %v5325_v27, %v889_v57  ;;  %v1036_v20 = vsel %vm1029_vm5, %v3723_v28, %v3719_v55  ;;  %v1037_v41 = vsel %vm1029_vm5, %v3719_v55, %v3723_v28  ;;  %v1221_v55 = vpop.permute.xlu0 %1220  ;;  %2025 = vrot.lane.b32.xlu1 %v2829_v3, %s2720_s22 }
 0x171   :  { %v927_v7 = vmul.f32 %v5326_v6, %v896_v53  ;;  %v928_v46 = vmul.f32 %v5327_v37, %v895_v10  ;;  %v5328_v60 = vrot.slane %v3330_v33, %v3047_v61  ;;  %v5329_v36 = vrot.slane %v3330_v33, %v3050_v63  ;;  %v5339_v6 = vld [vmem:[#allocation21_spill] sm:$0xff]  ;;  %2023 = vrot.lane.b32.xlu0 %v2816_v62, %s2720_s22 }
 0x172   :  { %v983_v42 = vsel %vm982_vm4, %v3590_v4, %v3580_v39  ;;  %v984_v52 = vsel %vm982_vm4, %v3580_v39, %v3590_v4  ;;  %v1130_v28 = vsel %vm1123_vm6, %v3922_v2, %v3907_v16  ;;  %v1131_v33 = vsel %vm1123_vm6, %v3907_v16, %v3922_v2  ;;  %v1321_v57 = vpop.permute.xlu1 %1320 }
 0x173   :  { %v974_v35 = vmul.f32 %v5328_v60, %v943_v8  ;;  %v975_v23 = vmul.f32 %v5329_v36, %v942_v32  ;;  %v1224_v26 = vsel %vm1217_vm7, %v1221_v55, %v1223_v48  ;;  %v1225_v45 = vsel %vm1217_vm7, %v1223_v48, %v1221_v55  ;;  %v5342_v48 = vld [vmem:[#allocation17_spill] sm:$0xff]  ;;  %v5343_v60 = vld [vmem:[#allocation18_spill] sm:$0xff]  ;;  %v5344_v55 = vld [vmem:[#allocation47_spill] sm:$0xff] }
 0x174   :  { %v912_v39 = vadd.f32 %v910_v5, %v818_v29  ;;  %v913_v4 = vadd.f32 %v911_v15, %v819_v44  ;;  %v5330_v30 = vrot.slane %v3465_v34, %v3047_v61  ;;  %v5331_v43 = vrot.slane %v3465_v34, %v3050_v63  ;;  %v1319_v17 = vpop.permute.xlu0 %1318  ;;  %2032 = vrot.lane.b32.xlu1 %v2807_v58, %s2720_s22 }
 0x175   :  { %v5332_v16 = vrot.slane %v3302_v56, %v3047_v61  ;;  %v5333_v1 = vrot.slane %v3302_v56, %v3050_v63  ;;  %v5335_v49 = vrot.slane %v5334_v50, %v3047_v61  ;;  %v5336_v34 = vrot.slane %v5334_v50, %v3050_v63  ;;  %2030 = vrot.lane.b32.xlu0 %v2794_v54, %s2720_s22 }
 0x176   :  { %v1068_v59 = vmul.f32 %v5330_v30, %v1037_v41  ;;  %v1069_v13 = vmul.f32 %v5331_v43, %v1036_v20  ;;  %v976_v38 = vadd.f32 %v974_v35, %v882_v25  ;;  %v977_v10 = vadd.f32 %v975_v23, %v883_v47  ;;  %v1328_v41 = vpop.permute.xlu1 %1327 }
 0x177   :  { %v957_v2 = vmul.f32 %v5332_v16, %v937_v11  ;;  %v958_v9 = vmul.f32 %v5333_v1, %v936_v21  ;;  %v1004_v29 = vmul.f32 %v5335_v49, %v984_v52  ;;  %v1005_v44 = vmul.f32 %v5336_v34, %v983_v42  ;;  %v5349_v16 = vld [vmem:[#allocation73_spill] sm:$0xff]  ;;  %v5352_v49 = vld [vmem:[#allocation27_spill] sm:$0xff] }
 0x178   :  { %v5337_v53 = vrot.slane %v3569_v14, %v3047_v61  ;;  %v5338_v8 = vrot.slane %v3569_v14, %v3050_v63  ;;  %v4152_v5 = vadd.f32 %v927_v7, %v835_v22  ;;  %v4154_v27 = vadd.f32 %v928_v46, %v836_v24  ;;  %v1326_v52 = vpop.permute.xlu0 %1325  ;;  %2072 = vrot.lane.b32.xlu1 %v2829_v3, %s2721_s24 }
 0x179   :  { %v4159_v15 = vsel %vm1322_vm8, %v1319_v17, %v1321_v57  ;;  %v4163_v25 = vsel %vm1322_vm8, %v1321_v57, %v1319_v17  ;;  %v1070_v47 = vadd.f32 %v1068_v59, %v976_v38  ;;  %v1071_v14 = vadd.f32 %v1069_v13, %v977_v10  ;;  %v5354_v38 = vld [vmem:[#allocation48_spill] sm:$0xff]  ;;  %v5355_v10 = vld [vmem:[#allocation49_spill] sm:$0xff]  ;;  %2070 = vrot.lane.b32.xlu0 %v2816_v62, %s2721_s24 }
 0x17a   :  { %v1162_v32 = vmul.f32 %v5337_v53, %v1131_v33  ;;  %v1163_v56 = vmul.f32 %v5338_v8, %v1130_v28  ;;  %v5340_v22 = vrot.slane %v5339_v6, %v3047_v61  ;;  %v5341_v24 = vrot.slane %v5339_v6, %v3050_v63  ;;  %v5345_v28 = vld [vmem:[#allocation79_spill] sm:$0xff]  ;;  %v1368_v57 = vpop.permute.xlu1 %1367 }
 0x17b   :  { %v959_v46 = vadd.f32 %v957_v2, %v865_v19  ;;  %v960_v21 = vadd.f32 %v958_v9, %v866_v40  ;;  %v1006_v11 = vadd.f32 %v1004_v29, %v912_v39  ;;  %v1007_v20 = vadd.f32 %v1005_v44, %v913_v4  ;;  %v5346_v4 = vld [vmem:[#allocation15_spill] sm:$0xff] }
 0x17c   :  { %v1256_v7 = vmul.f32 %v5340_v22, %v1225_v45  ;;  %v1257_v37 = vmul.f32 %v5341_v24, %v1224_v26  ;;  %v1030_v35 = vsel %vm1029_vm5, %v5343_v60, %v5342_v48  ;;  %v1031_v36 = vsel %vm1029_vm5, %v5342_v48, %v5343_v60  ;;  %v5353_v29 = vld [vmem:[#allocation51_spill] sm:$0xff]  ;;  %v1366_v17 = vpop.permute.xlu0 %1365  ;;  %v5359_v60 = vld [vmem:[#allocation76_spill] sm:$0xff]  ;;  %2079 = vrot.lane.b32.xlu1 %v2807_v58, %s2721_s24 }
 0x17d   :  { %v1164_v23 = vadd.f32 %v1162_v32, %v1070_v47  ;;  %v1165_v42 = vadd.f32 %v1163_v56, %v1071_v14  ;;  %v989_v19 = vsel %vm982_vm4, %v5345_v28, %v5344_v55  ;;  %v990_v40 = vsel %vm982_vm4, %v5344_v55, %v5345_v28  ;;  %2077 = vrot.lane.b32.xlu0 %v2794_v54, %s2721_s24 }
 0x17e   :  { %v1329_v33 = vsel %vm1322_vm8, %v1326_v52, %v1328_v41  ;;  %v1330_v26 = vsel %vm1322_vm8, %v1328_v41, %v1326_v52  ;;  %v5347_v30 = vrot.slane %v5346_v4, %v3047_v61  ;;  %v5348_v43 = vrot.slane %v5346_v4, %v3050_v63  ;;  %v5362_v52 = vld [vmem:[#allocation74_spill] sm:$0xff] }
 0x17f   :  { %v1258_v45 = vadd.f32 %v1256_v7, %v1164_v23  ;;  %v1259_v39 = vadd.f32 %v1257_v37, %v1165_v42  ;;  %v5350_v2 = vrot.slane %v5349_v16, %v3047_v61  ;;  %v5351_v9 = vrot.slane %v5349_v16, %v3050_v63  ;;  %v5356_v7 = vld [vmem:[#allocation72_spill] sm:$0xff]  ;;  %v5370_v16 = vld [vmem:[#allocation23_spill] sm:$0xff] }
 0x180   :  { %v1361_v59 = vmul.f32 %v5347_v30, %v1329_v33  ;;  %v1362_v13 = vmul.f32 %v5348_v43, %v1330_v26  ;;  %v1124_v34 = vsel %vm1123_vm6, %v5353_v29, %v5352_v49  ;;  %v1125_v44 = vsel %vm1123_vm6, %v5352_v49, %v5353_v29  ;;  %v1375_v33 = vpop.permute.xlu1 %1374  ;;  %v5365_v26 = vld [vmem:[#allocation28_spill] sm:$0xff]  ;;  %2119 = vrot.lane.b32.xlu1 %v2829_v3, %s2722_s25 }
 0x181   :  { %v1051_v1 = vmul.f32 %v5350_v2, %v1031_v36  ;;  %v1052_v50 = vmul.f32 %v5351_v9, %v1030_v35  ;;  %v1077_v53 = vsel %vm1076_vm9, %v5355_v10, %v5354_v38  ;;  %v1078_v32 = vsel %vm1076_vm9, %v5354_v38, %v5355_v10  ;;  %v5371_v2 = vld [vmem:[#allocation25_spill] sm:$0xff]  ;;  %2117 = vrot.lane.b32.xlu0 %v2816_v62, %s2722_s25 }
 0x182   :  { %v4224_v8 = vadd.f32 %v1361_v59, %v1258_v45  ;;  %v4226_v56 = vadd.f32 %v1362_v13, %v1259_v39  ;;  %v1218_v47 = vsel %vm1217_vm7, %v4058_v31, %v4056_v18  ;;  %v1219_v14 = vsel %vm1217_vm7, %v4056_v18, %v4058_v31  ;;  %v5366_v45 = vld [vmem:[#allocation29_spill] sm:$0xff]  ;;  %v1373_v13 = vpop.permute.xlu0 %1372 }
 0x183   :  { %v1370_v6 = vsel %vm1369_vm10, %v1366_v17, %v1368_v57  ;;  %v1371_v22 = vsel %vm1369_vm10, %v1368_v57, %v1366_v17  ;;  %v5357_v24 = vrot.slane %v5356_v7, %v3047_v61  ;;  %v5358_v41 = vrot.slane %v5356_v7, %v3050_v63 }
 0x184   :  { %v5360_v35 = vrot.slane %v5359_v60, %v3047_v61  ;;  %v5361_v31 = vrot.slane %v5359_v60, %v3050_v63  ;;  %v1053_v23 = vadd.f32 %v1051_v1, %v959_v46  ;;  %v1054_v42 = vadd.f32 %v1052_v50, %v960_v21  ;;  %v5367_v21 = vld [vmem:[#allocation16_spill] sm:$0xff]  ;;  %v5378_v60 = vld [vmem:[#allocation75_spill] sm:$0xff]  ;;  %2126 = vrot.lane.b32.xlu1 %v2807_v58, %s2722_s25 }
 0x185   :  { %v1021_v37 = vmul.f32 %v5357_v24, %v990_v40  ;;  %v1022_v48 = vmul.f32 %v5358_v41, %v989_v19  ;;  %v5363_v55 = vrot.slane %v5362_v52, %v3047_v61  ;;  %v5364_v40 = vrot.slane %v5362_v52, %v3050_v63  ;;  %2124 = vrot.lane.b32.xlu0 %v2794_v54, %s2722_s25 }
 0x186   :  { %v1145_v18 = vmul.f32 %v5360_v35, %v1125_v44  ;;  %v1146_v36 = vmul.f32 %v5361_v31, %v1124_v34  ;;  %v1171_v39 = vsel %vm1170_vm11, %v5366_v45, %v5365_v26  ;;  %v1172_v46 = vsel %vm1170_vm11, %v5365_v26, %v5366_v45  ;;  %v5372_v44 = vld [vmem:[#allocation13_spill] sm:$0xff] }
 0x187   :  { %v1098_v28 = vmul.f32 %v5363_v55, %v1078_v32  ;;  %v1099_v19 = vmul.f32 %v5364_v40, %v1077_v53  ;;  %v5368_v4 = vrot.slane %v5367_v21, %v3047_v61  ;;  %v5369_v59 = vrot.slane %v5367_v21, %v3050_v63 }
 0x188   :  { %v1083_v1 = vsel %vm1076_vm9, %v5371_v2, %v5370_v16  ;;  %v1084_v9 = vsel %vm1076_vm9, %v5370_v16, %v5371_v2  ;;  %v4284_v50 = vsel %vm1369_vm10, %v1373_v13, %v1375_v33  ;;  %v4288_v49 = vsel %vm1369_vm10, %v1375_v33, %v1373_v13  ;;  %2166 = vrot.lane.b32.xlu1 %v2829_v3, %s2723_s26 }
 0x189   :  { %v1239_v30 = vmul.f32 %v5368_v4, %v1219_v14  ;;  %v1240_v43 = vmul.f32 %v5369_v59, %v1218_v47  ;;  %v1147_v29 = vadd.f32 %v1145_v18, %v1053_v23  ;;  %v1148_v34 = vadd.f32 %v1146_v36, %v1054_v42  ;;  %v5375_v47 = vld [vmem:[#allocation77_spill] sm:$0xff]  ;;  %2164 = vrot.lane.b32.xlu0 %v2816_v62, %s2723_s26 }
 0x18a   :  { %v5373_v57 = vrot.slane %v5372_v44, %v3047_v61  ;;  %v5374_v10 = vrot.slane %v5372_v44, %v3050_v63  ;;  %v1100_v32 = vadd.f32 %v1098_v28, %v1006_v11  ;;  %v1101_v17 = vadd.f32 %v1099_v19, %v1007_v20  ;;  %v1413_v20 = vpop.permute.xlu0 %1412  ;;  %v5381_v19 = vld [vmem:[#allocation50_spill] sm:$0xff] }
 0x18b   :  { %v5376_v14 = vrot.slane %v5375_v47, %v3047_v61  ;;  %v5377_v24 = vrot.slane %v5375_v47, %v3050_v63  ;;  %v5379_v35 = vrot.slane %v5378_v60, %v3047_v61  ;;  %v1241_v36 = vadd.f32 %v1239_v30, %v1147_v29  ;;  %v5384_v30 = vld [vmem:[#allocation78_spill] sm:$0xff]  ;;  %v1490_v29 = vld [vmem:[#allocation3 + $0x95] ss:$8 sm:$0x3] }
 0x18c   :  { %v1344_v38 = vmul.f32 %v5373_v57, %v4159_v15  ;;  %v1345_v53 = vmul.f32 %v5374_v10, %v4163_v25  ;;  %v1415_v15 = vpop.permute.xlu1 %1414  ;;  %v5380_v25 = vrot.slane %v5378_v60, %v3050_v63  ;;  %v1242_v11 = vadd.f32 %v1240_v43, %v1148_v34  ;;  %2173 = vrot.lane.b32.xlu1 %v2807_v58, %s2723_s26 }
 0x18d   :  { %v1192_v7 = vmul.f32 %v5376_v14, %v1172_v46  ;;  %v1193_v41 = vmul.f32 %v5377_v24, %v1171_v39  ;;  %v1115_v18 = vmul.f32 %v5379_v35, %v1084_v9  ;;  %v1177_v23 = vsel %vm1170_vm11, %v4028_v0, %v4013_v12  ;;  %2171 = vrot.lane.b32.xlu0 %v2794_v54, %s2723_s26 }
 0x18e   :  { %v1116_v31 = vmul.f32 %v5380_v25, %v1083_v1  ;;  %v1178_v42 = vsel %vm1170_vm11, %v4013_v12, %v4028_v0  ;;  %v1417_v52 = vsel %vm1416_vm12, %v1413_v20, %v1415_v15  ;;  %v1418_v55 = vsel %vm1416_vm12, %v1415_v15, %v1413_v20  ;;  %v1420_v9 = vpop.permute.xlu0 %1419 }
 0x18f   :  { %v1346_v28 = vadd.f32 %v1344_v38, %v1241_v36  ;;  %v1347_v40 = vadd.f32 %v1345_v53, %v1242_v11  ;;  %v5382_v33 = vrot.slane %v5381_v19, %v3047_v61  ;;  %v5383_v45 = vrot.slane %v5381_v19, %v3050_v63  ;;  %v5390_v53 = vld [vmem:[#allocation26_spill] sm:$0xff] }
 0x190   :  { %v1023_v12 = vadd.f32 %v1021_v37, %v4152_v5  ;;  %v1024_v0 = vadd.f32 %v1022_v48, %v4154_v27  ;;  %v1194_v46 = vadd.f32 %v1192_v7, %v1100_v32  ;;  %v1195_v21 = vadd.f32 %v1193_v41, %v1101_v17  ;;  %v1422_v4 = vpop.permute.xlu1 %1421  ;;  %v5387_v5 = vld [vmem:[#allocation22_spill] sm:$0xff]  ;;  %v5394_v7 = vld [vmem:[#allocation20_spill] sm:$0xff]  ;;  %2213 = vrot.lane.b32.xlu1 %v2829_v3, %s2724_s27 }
 0x191   :  { %v1438_v26 = vmul.f32 %v5382_v33, %v1417_v52  ;;  %v1439_v39 = vmul.f32 %v5383_v45, %v1418_v55  ;;  %v5385_v59 = vrot.slane %v5384_v30, %v3047_v61  ;;  %v5386_v13 = vrot.slane %v5384_v30, %v3050_v63  ;;  %v5395_v52 = vld [vmem:[#allocation24_spill] sm:$0xff]  ;;  %2211 = vrot.lane.b32.xlu0 %v2816_v62, %s2724_s27 }
 0x192   :  { %v5388_v27 = vrot.slane %v5387_v5, %v3047_v61  ;;  %v5389_v48 = vrot.slane %v5387_v5, %v3050_v63  ;;  %v1423_v44 = vsel %vm1416_vm12, %v1420_v9, %v1422_v4  ;;  %v1424_v57 = vsel %vm1416_vm12, %v1422_v4, %v1420_v9  ;;  %v1460_v36 = vpop.permute.xlu0 %1459 }
 0x193   :  { %v1209_v43 = vmul.f32 %v5385_v59, %v1178_v42  ;;  %v1210_v16 = vmul.f32 %v5386_v13, %v1177_v23  ;;  %v4341_v2 = vadd.f32 %v1438_v26, %v1346_v28  ;;  %v4343_v1 = vadd.f32 %v1439_v39, %v1347_v40  ;;  %v5398_v40 = vld [vmem:[#allocation52_spill] sm:$0xff] }
 0x194   :  { %v1391_v37 = vmul.f32 %v5388_v27, %v1370_v6  ;;  %v1392_v34 = vmul.f32 %v5389_v48, %v1371_v22  ;;  %v1117_v38 = vadd.f32 %v1115_v18, %v1023_v12  ;;  %v1118_v10 = vadd.f32 %v1116_v31, %v1024_v0  ;;  %v5393_v22 = vld [vmem:[#allocation19_spill] sm:$0xff]  ;;  %v1462_v41 = vpop.permute.xlu1 %1461  ;;  %v1520_v39 = vld [vmem:[#allocation3 + $0x35] ss:$8 sm:$0x3]  ;;  %2220 = vrot.lane.b32.xlu1 %v2807_v58, %s2724_s27 }
 0x195   :  { %v5391_v32 = vrot.slane %v5390_v53, %v3047_v61  ;;  %v5392_v6 = vrot.slane %v5390_v53, %v3050_v63  ;;  %v1287_v14 = vadd.f32 %v5393_v22, %v1194_v46  ;;  %v1288_v24 = vadd.f32 %v5394_v7, %v1195_v21  ;;  %v5402_v46 = vld [vmem:[#allocation14_spill] sm:$0xff]  ;;  %v1537_v48 = vld [vmem:[#allocation3 + $0x96] ss:$8 sm:$0x3]  ;;  %2218 = vrot.lane.b32.xlu0 %v2794_v54, %s2724_s27 }
 0x196   :  { %v1495_v15 = vrot.slane %v1490_v29, %v3047_v61  ;;  %v1499_v60 = vrot.slane %v1490_v29, %v3050_v63  ;;  %v1211_v35 = vadd.f32 %v1209_v43, %v1117_v38  ;;  %v1212_v18 = vadd.f32 %v1210_v16, %v1118_v10  ;;  %v1467_v30 = vpop.permute.xlu0 %1466  ;;  %v1567_v22 = vld [vmem:[#allocation3 + $0x36] ss:$8 sm:$0x3] }
 0x197   :  { %v1455_v17 = vmul.f32 %v5391_v32, %v1423_v44  ;;  %v1456_v47 = vmul.f32 %v5392_v6, %v1424_v57  ;;  %v1393_v11 = vadd.f32 %v1391_v37, %v1287_v14  ;;  %v1394_v20 = vadd.f32 %v1392_v34, %v1288_v24 }
 0x198   :  { %v1464_v23 = vsel %vm1463_vm13, %v1460_v36, %v1462_v41  ;;  %v1465_v42 = vsel %vm1463_vm13, %v1462_v41, %v1460_v36  ;;  %v5396_v55 = vrot.slane %v5395_v52, %v3047_v61  ;;  %v5399_v19 = vrot.slane %v5398_v40, %v3047_v61  ;;  %v1469_v12 = vpop.permute.xlu1 %1468  ;;  %v1584_v36 = vld [vmem:[#allocation3 + $0x97] ss:$8 sm:$0x3]  ;;  %2260 = vrot.lane.b32.xlu1 %v2829_v3, %s2725_s28 }
 0x199   :  { %v1457_v25 = vadd.f32 %v1455_v17, %v4224_v8  ;;  %v1458_v31 = vadd.f32 %v1456_v47, %v4226_v56  ;;  %v5397_v8 = vrot.slane %v5395_v52, %v3050_v63  ;;  %v5400_v26 = vrot.slane %v5398_v40, %v3050_v63  ;;  %2258 = vrot.lane.b32.xlu0 %v2816_v62, %s2725_s28 }
 0x19a   :  { %v1408_v28 = vmul.f32 %v5396_v55, %v4284_v50  ;;  %v1485_v33 = vmul.f32 %v5399_v19, %v1464_v23  ;;  %v5401_v50 = vld [vmem:[#allocation12_spill] sm:$0xff]  ;;  %v1317_v21 = vadd.f32 %v5402_v46, %v1212_v18  ;;  %v1470_v59 = vsel %vm1463_vm13, %v1467_v30, %v1469_v12  ;;  %v1507_v57 = vpop.permute.xlu0 %1506 }
 0x19b   :  { %v1409_v56 = vmul.f32 %v5397_v8, %v4288_v49  ;;  %v1486_v45 = vmul.f32 %v5400_v26, %v1465_v42  ;;  %v1316_v0 = vadd.f32 %v5401_v50, %v1211_v35  ;;  %v1471_v43 = vsel %vm1463_vm13, %v1469_v12, %v1467_v30 }
 0x19c   :  { %v1487_v4 = vadd.f32 %v1485_v33, %v1393_v11  ;;  %v1525_v13 = vrot.slane %v1520_v39, %v3047_v61  ;;  %v1529_v16 = vrot.slane %v1520_v39, %v3050_v63  ;;  %v1502_v5 = vmul.f32 %v1495_v15, %v1470_v59  ;;  %v1509_v37 = vpop.permute.xlu1 %1508  ;;  %2267 = vrot.lane.b32.xlu1 %v2807_v58, %s2725_s28 }
 0x19d   :  { %v1488_v49 = vadd.f32 %v1486_v45, %v1394_v20  ;;  %v1410_v9 = vadd.f32 %v1408_v28, %v1316_v0  ;;  %v1411_v29 = vadd.f32 %v1409_v56, %v1317_v21  ;;  %v1503_v27 = vmul.f32 %v1499_v60, %v1471_v43  ;;  %v1631_v21 = vld [vmem:[#allocation3 + $0xa0] ss:$8 sm:$0x3]  ;;  %2265 = vrot.lane.b32.xlu0 %v2794_v54, %s2725_s28 }
 0x19e   :  { %v1511_v38 = vsel %vm1510_vm14, %v1507_v57, %v1509_v37  ;;  %v1512_v10 = vsel %vm1510_vm14, %v1509_v37, %v1507_v57  ;;  %v1542_v17 = vrot.slane %v1537_v48, %v3047_v61  ;;  %v1546_v6 = vrot.slane %v1537_v48, %v3050_v63  ;;  %v1514_v24 = vpop.permute.xlu0 %1513 }
 0x19f   :  { %v1504_v34 = vadd.f32 %v1502_v5, %v1410_v9  ;;  %v1505_v44 = vadd.f32 %v1503_v27, %v1411_v29  ;;  %v1532_v53 = vmul.f32 %v1525_v13, %v1511_v38  ;;  %v1533_v32 = vmul.f32 %v1529_v16, %v1512_v10  ;;  %v1661_v27 = vld [vmem:[#allocation3 + $0x40] ss:$8 sm:$0x3] }
 0x1a0   :  { %v1516_v47 = vpop.permute.xlu1 %1515  ;;  %v1589_v8 = vrot.slane %v1584_v36, %v3047_v61  ;;  %v1593_v56 = vrot.slane %v1584_v36, %v3050_v63  ;;  %vm1604_vm0 = vcmp.lt.s32.totalorder %v3055_v51, 112  ;;  %v1636_v9 = vrot.slane %v1631_v21, %v3047_v61  ;;  %2307 = vrot.lane.b32.xlu1 %v2829_v3, %s2726_s29 }
 0x1a1   :  { %v1534_v14 = vadd.f32 %v1532_v53, %v4341_v2  ;;  %v1535_v7 = vadd.f32 %v1533_v32, %v4343_v1  ;;  %v1517_v41 = vsel %vm1510_vm14, %v1514_v24, %v1516_v47  ;;  %v1518_v15 = vsel %vm1510_vm14, %v1516_v47, %v1514_v24  ;;  %2305 = vrot.lane.b32.xlu0 %v2816_v62, %s2726_s29 }
 0x1a2   :  { %v1549_v60 = vmul.f32 %v1542_v17, %v1517_v41  ;;  %v1550_v35 = vmul.f32 %v1546_v6, %v1518_v15  ;;  %v1572_v2 = vrot.slane %v1567_v22, %v3047_v61  ;;  %v1576_v1 = vrot.slane %v1567_v22, %v3050_v63  ;;  %v1554_v23 = vpop.permute.xlu0 %1553  ;;  %v1678_v6 = vld [vmem:[#allocation3 + $0xa1] ss:$8 sm:$0x3] }
 0x1a3   :  { %v1640_v29 = vrot.slane %v1631_v21, %v3050_v63  ;;  %vm1651_vm1 = vcmp.lt.s32.totalorder %v3055_v51, 111  ;;  %v1666_v53 = vrot.slane %v1661_v27, %v3047_v61  ;;  %v1670_v32 = vrot.slane %v1661_v27, %v3050_v63 }
 0x1a4   :  { %v1556_v18 = vpop.permute.xlu1 %1555  ;;  %v1551_v11 = vadd.f32 %v1549_v60, %v1457_v25  ;;  %v1552_v20 = vadd.f32 %v1550_v35, %v1458_v31  ;;  %v1614_v25 = vld [vmem:[#allocation3 + $0x37] ss:$8 sm:$0x3]  ;;  %2314 = vrot.lane.b32.xlu1 %v2807_v58, %s2726_s29  ;;  %v1683_v60 = vrot.slane %v1678_v6, %v3047_v61  ;;  %v1687_v35 = vrot.slane %v1678_v6, %v3050_v63 }
 0x1a5   :  { %v1558_v42 = vsel %vm1557_vm15, %v1554_v23, %v1556_v18  ;;  %v1559_v52 = vsel %vm1557_vm15, %v1556_v18, %v1554_v23  ;;  %v1619_v50 = vrot.slane %v1614_v25, %v3047_v61  ;;  %v1623_v0 = vrot.slane %v1614_v25, %v3050_v63  ;;  %2312 = vrot.lane.b32.xlu0 %v2794_v54, %s2726_s29 }
 0x1a6   :  { %v1579_v55 = vmul.f32 %v1572_v2, %v1558_v42  ;;  %v1580_v28 = vmul.f32 %v1576_v1, %v1559_v52  ;;  %v1561_v33 = vpop.permute.xlu0 %1560  ;;  %v1708_v1 = vld [vmem:[#allocation3 + $0x41] ss:$8 sm:$0x3]  ;;  %vm1698_vm2 = vcmp.lt.s32.totalorder %v3055_v51, 110  ;;  %vm1745_vm3 = vcmp.lt.s32.totalorder %v3055_v51, 109 }
 0x1a7   :  { %vm1792_vm4 = vcmp.lt.s32.totalorder %v3055_v51, 99  ;;  %vm1839_vm5 = vcmp.lt.s32.totalorder %v3055_v51, 98  ;;  %vm1886_vm6 = vcmp.lt.s32.totalorder %v3055_v51, 97  ;;  %vm1933_vm7 = vcmp.lt.s32.totalorder %v3055_v51, 96 }
 0x1a8   :  { %v1563_v40 = vpop.permute.xlu1 %1562  ;;  %v1581_v31 = vadd.f32 %v1579_v55, %v1487_v4  ;;  %v1582_v19 = vadd.f32 %v1580_v28, %v1488_v49  ;;  %2354 = vrot.lane.b32.xlu1 %v2829_v3, %s2727_s23  ;;  %v1713_v55 = vrot.slane %v1708_v1, %v3047_v61  ;;  %v1717_v28 = vrot.slane %v1708_v1, %v3050_v63 }
 0x1a9   :  { %v1564_v26 = vsel %vm1557_vm15, %v1561_v33, %v1563_v40  ;;  %v1565_v45 = vsel %vm1557_vm15, %v1563_v40, %v1561_v33  ;;  %2352 = vrot.lane.b32.xlu0 %v2816_v62, %s2727_s23  ;;  %vm1980_vm8 = vcmp.lt.s32.totalorder %v3055_v51, 95  ;;  %vm2027_vm9 = vcmp.lt.s32.totalorder %v3055_v51, 94 }
 0x1aa   :  { %v1596_v39 = vmul.f32 %v1589_v8, %v1564_v26  ;;  %v1597_v12 = vmul.f32 %v1593_v56, %v1565_v45  ;;  %v1601_v30 = vpop.permute.xlu0 %1600  ;;  %v1725_v56 = vld [vmem:[#allocation3 + $0xa2] ss:$8 sm:$0x3]  ;;  %vm2074_vm10 = vcmp.lt.s32.totalorder %v3055_v51, 93  ;;  %vm2121_vm11 = vcmp.lt.s32.totalorder %v3055_v51, 83 }
 0x1ab   :  { %vm2168_vm12 = vcmp.lt.s32.totalorder %v3055_v51, 82  ;;  %vm2215_vm13 = vcmp.lt.s32.totalorder %v3055_v51, 81  ;;  %vm2262_vm14 = vcmp.lt.s32.totalorder %v3055_v51, 80  ;;  %vm2309_vm15 = vcmp.lt.s32.totalorder %v3055_v51, 79 }
 0x1ac   :  { %v1603_v46 = vpop.permute.xlu1 %1602  ;;  %v1598_v4 = vadd.f32 %v1596_v39, %v1504_v34  ;;  %v1599_v49 = vadd.f32 %v1597_v12, %v1505_v44  ;;  %2361 = vrot.lane.b32.xlu1 %v2807_v58, %s2727_s23  ;;  %v1730_v39 = vrot.slane %v1725_v56, %v3047_v61  ;;  %v1734_v12 = vrot.slane %v1725_v56, %v3050_v63 }
 0x1ad   :  { %v1605_v59 = vsel %vm1604_vm0, %v1601_v30, %v1603_v46  ;;  %v1606_v43 = vsel %vm1604_vm0, %v1603_v46, %v1601_v30  ;;  %2359 = vrot.lane.b32.xlu0 %v2794_v54, %s2727_s23 }
 0x1ae   :  { %v1626_v13 = vmul.f32 %v1619_v50, %v1605_v59  ;;  %v1627_v16 = vmul.f32 %v1623_v0, %v1606_v43  ;;  %v1608_v34 = vpop.permute.xlu0 %1607  ;;  %v1755_v0 = vld [vmem:[#allocation3 + $0x42] ss:$8 sm:$0x3] }
 0x1b0   :  { %v1610_v5 = vpop.permute.xlu1 %1609  ;;  %v1628_v37 = vadd.f32 %v1626_v13, %v1534_v14  ;;  %v1629_v48 = vadd.f32 %v1627_v16, %v1535_v7  ;;  %2401 = vrot.lane.b32.xlu1 %v2829_v3, %s2728_s30  ;;  %v1760_v13 = vrot.slane %v1755_v0, %v3047_v61  ;;  %v1764_v16 = vrot.slane %v1755_v0, %v3050_v63 }
 0x1b1   :  { %v1611_v44 = vsel %vm1604_vm0, %v1608_v34, %v1610_v5  ;;  %v1612_v57 = vsel %vm1604_vm0, %v1610_v5, %v1608_v34  ;;  %2399 = vrot.lane.b32.xlu0 %v2816_v62, %s2728_s30  ;;  %vm2356_vm0 = vcmp.lt.s32.totalorder %v3055_v51, 78 }
 0x1b2   :  { %v1643_v38 = vmul.f32 %v1636_v9, %v1611_v44  ;;  %v1644_v10 = vmul.f32 %v1640_v29, %v1612_v57  ;;  %v1648_v14 = vpop.permute.xlu0 %1647  ;;  %v1772_v29 = vld [vmem:[#allocation3 + $0xa3] ss:$8 sm:$0x3] }
 0x1b3   :  { %v1777_v62 = vrot.slane %v1772_v29, %v3047_v61  ;;  %v1781_v57 = vrot.slane %v1772_v29, %v3050_v63 }
 0x1b4   :  { %v1650_v17 = vpop.permute.xlu1 %1649  ;;  %v1645_v47 = vadd.f32 %v1643_v38, %v1551_v11  ;;  %v1646_v22 = vadd.f32 %v1644_v10, %v1552_v20  ;;  %2408 = vrot.lane.b32.xlu1 %v2807_v58, %s2728_s30  ;;  %v1802_v10 = vld [vmem:[#allocation3 + $0x43] ss:$8 sm:$0x3] }
 0x1b5   :  { %v1652_v7 = vsel %vm1651_vm1, %v1648_v14, %v1650_v17  ;;  %v1653_v24 = vsel %vm1651_vm1, %v1650_v17, %v1648_v14  ;;  %2406 = vrot.lane.b32.xlu0 %v2794_v54, %s2728_s30  ;;  %v1807_v54 = vrot.slane %v1802_v10, %v3047_v61  ;;  %v1811_v14 = vrot.slane %v1802_v10, %v3050_v63 }
 0x1b6   :  { %v1673_v41 = vmul.f32 %v1666_v53, %v1652_v7  ;;  %v1674_v15 = vmul.f32 %v1670_v32, %v1653_v24  ;;  %v1655_v11 = vpop.permute.xlu0 %1654  ;;  %v1819_v24 = vld [vmem:[#allocation3 + $0xa4] ss:$8 sm:$0x3] }
 0x1b8   :  { %v1657_v2 = vpop.permute.xlu1 %1656  ;;  %v1675_v18 = vadd.f32 %v1673_v41, %v1581_v31  ;;  %v1676_v36 = vadd.f32 %v1674_v15, %v1582_v19 }
 0x1b9   :  { %v1658_v20 = vsel %vm1651_vm1, %v1655_v11, %v1657_v2  ;;  %v1659_v23 = vsel %vm1651_vm1, %v1657_v2, %v1655_v11  ;;  %v1828_v11 = vrot.slane %v1819_v24, %v3050_v63  ;;  %vm2403_vm1 = vcmp.lt.s32.totalorder %v3055_v51, 77 }
 0x1ba   :  { %v1690_v42 = vmul.f32 %v1683_v60, %v1658_v20  ;;  %v1691_v52 = vmul.f32 %v1687_v35, %v1659_v23  ;;  %v1695_v31 = vpop.permute.xlu0 %1694  ;;  %v1849_v23 = vld [vmem:[#allocation3 + $0x44] ss:$8 sm:$0x3]  ;;  %v2453_v51 = vstv %s4983_s0  ;;  %s2730_s0 = smov [#allocation8]  }
 0x1bb   :  { %s2522_s6 = sshll.u32 %s2730_s0, 4  ;;  %s2523_s6 = int_to_ptr.vmem [resolvable:$true] %s2522_s6 }
 0x1bc   :  { %v1697_v8 = vpop.permute.xlu1 %1696  ;;  %v1692_v40 = vadd.f32 %v1690_v42, %v1598_v4  ;;  %v1693_v25 = vadd.f32 %v1691_v52, %v1599_v49  ;;  %s2648_s7 = scalar_lea.vmem %s2523_s6, 256  ;;  %p2653_p3 = scmp.lt.s32.totalorder %s2523_s6, %s2523_s6 }
 0x1bd   :  { %v1699_v19 = vsel %vm1698_vm2, %v1695_v31, %v1697_v8  ;;  %v1700_v33 = vsel %vm1698_vm2, %v1697_v8, %v1695_v31  ;;  %v1858_v31 = vrot.slane %v1849_v23, %v3050_v63  ;;  %p2649_p2 = scmp.ne.s32.totalorder %s2523_s6, %s2648_s7  ;;  %p2654_p4 = scmp.lt.s32.totalorder %s2648_s7, %s2648_s7 }
 0x1be   :  { %v1720_v26 = vmul.f32 %v1713_v55, %v1699_v19  ;;  %v1721_v45 = vmul.f32 %v1717_v28, %v1700_v33  ;;  %v1702_v4 = vpop.permute.xlu0 %1701  ;;  %v1866_v33 = vld [vmem:[#allocation3 + $0xa5] ss:$8 sm:$0x3] }
 0x1bf   :  { %p2655_p5 = por %p2654_p4, %p2653_p3 }
 0x1c0   :  { %v1704_v50 = vpop.permute.xlu1 %1703  ;;  %v1722_v46 = vadd.f32 %v1720_v26, %v1628_v37  ;;  %v1723_v21 = vadd.f32 %v1721_v45, %v1629_v48 }
 0x1c1   :  { %v1705_v49 = vsel %vm1698_vm2, %v1702_v4, %v1704_v50  ;;  %v1706_v30 = vsel %vm1698_vm2, %v1704_v50, %v1702_v4  ;;  %v1875_v4 = vrot.slane %v1866_v33, %v3050_v63  ;;  %p2656_p6 = pnand %p2655_p5, %p2649_p2 }
 0x1c2   :  { %v1737_v59 = vmul.f32 %v1730_v39, %v1705_v49  ;;  %v1738_v43 = vmul.f32 %v1734_v12, %v1706_v30  ;;  %v1742_v37 = vpop.permute.xlu0 %1741  ;;  %v1896_v30 = vld [vmem:[#allocation3 + $0x45] ss:$8 sm:$0x3] }
 0x1c4   :  { %v1744_v9 = vpop.permute.xlu1 %1743  ;;  %v1739_v5 = vadd.f32 %v1737_v59, %v1645_v47  ;;  %v1740_v27 = vadd.f32 %v1738_v43, %v1646_v22 }
 0x1c5   :  { %v1746_v48 = vsel %vm1745_vm3, %v1742_v37, %v1744_v9  ;;  %v1747_v3 = vsel %vm1745_vm3, %v1744_v9, %v1742_v37  ;;  %v1905_v37 = vrot.slane %v1896_v30, %v3050_v63 }
 0x1c6   :  { %v1767_v34 = vmul.f32 %v1760_v13, %v1746_v48  ;;  %v1768_v44 = vmul.f32 %v1764_v16, %v1747_v3  ;;  %v1749_v17 = vpop.permute.xlu0 %1748  ;;  %v1913_v3 = vld [vmem:[#allocation3 + $0xa6] ss:$8 sm:$0x3] }
 0x1c8   :  { %v1751_v38 = vpop.permute.xlu1 %1750  ;;  %v1769_v53 = vadd.f32 %v1767_v34, %v1675_v18  ;;  %v1770_v32 = vadd.f32 %v1768_v44, %v1676_v36  ;;  %v1824_v36 = vrot.slane %v1819_v24, %v3047_v61 }
 0x1c9   :  { %v1752_v6 = vsel %vm1745_vm3, %v1749_v17, %v1751_v38  ;;  %v1753_v47 = vsel %vm1745_vm3, %v1751_v38, %v1749_v17  ;;  %v1922_v17 = vrot.slane %v1913_v3, %v3050_v63 }
 0x1ca   :  { %v1784_v58 = vmul.f32 %v1777_v62, %v1752_v6  ;;  %v1785_v22 = vmul.f32 %v1781_v57, %v1753_v47  ;;  %v1789_v60 = vpop.permute.xlu0 %1788  ;;  %v1943_v47 = vld [vmem:[#allocation3 + $0x46] ss:$8 sm:$0x3] }
 0x1cc   :  { %v1791_v7 = vpop.permute.xlu1 %1790  ;;  %v1786_v41 = vadd.f32 %v1784_v58, %v1692_v40  ;;  %v1787_v15 = vadd.f32 %v1785_v22, %v1693_v25  ;;  %v1854_v25 = vrot.slane %v1849_v23, %v3047_v61 }
 0x1cd   :  { %v1793_v35 = vsel %vm1792_vm4, %v1789_v60, %v1791_v7  ;;  %v1794_v2 = vsel %vm1792_vm4, %v1791_v7, %v1789_v60  ;;  %v1952_v60 = vrot.slane %v1943_v47, %v3050_v63 }
 0x1ce   :  { %v1814_v1 = vmul.f32 %v1807_v54, %v1793_v35  ;;  %v1815_v18 = vmul.f32 %v1811_v14, %v1794_v2  ;;  %v1796_v55 = vpop.permute.xlu0 %1795  ;;  %v1960_v2 = vld [vmem:[#allocation3 + $0xa7] ss:$8 sm:$0x3] }
 0x1d0   :  { %v1798_v20 = vpop.permute.xlu1 %1797  ;;  %v1816_v42 = vadd.f32 %v1814_v1, %v1722_v46  ;;  %v1817_v52 = vadd.f32 %v1815_v18, %v1723_v21  ;;  %v1871_v21 = vrot.slane %v1866_v33, %v3047_v61 }
 0x1d1   :  { %v1799_v28 = vsel %vm1792_vm4, %v1796_v55, %v1798_v20  ;;  %v1800_v8 = vsel %vm1792_vm4, %v1798_v20, %v1796_v55  ;;  %v1969_v55 = vrot.slane %v1960_v2, %v3050_v63 }
 0x1d2   :  { %v1831_v56 = vmul.f32 %v1824_v36, %v1799_v28  ;;  %v1832_v40 = vmul.f32 %v1828_v11, %v1800_v8  ;;  %v1836_v39 = vpop.permute.xlu0 %1835  ;;  %v1990_v8 = vld [vmem:[#allocation3 + $0x47] ss:$8 sm:$0x3] }
 0x1d4   :  { %v1838_v19 = vpop.permute.xlu1 %1837  ;;  %v1833_v26 = vadd.f32 %v1831_v56, %v1739_v5  ;;  %v1834_v45 = vadd.f32 %v1832_v40, %v1740_v27  ;;  %v1901_v27 = vrot.slane %v1896_v30, %v3047_v61 }
 0x1d5   :  { %v1840_v12 = vsel %vm1839_vm5, %v1836_v39, %v1838_v19  ;;  %v1841_v50 = vsel %vm1839_vm5, %v1838_v19, %v1836_v39  ;;  %v1999_v39 = vrot.slane %v1990_v8, %v3050_v63 }
 0x1d6   :  { %v1861_v0 = vmul.f32 %v1854_v25, %v1840_v12  ;;  %v1862_v46 = vmul.f32 %v1858_v31, %v1841_v50  ;;  %v1843_v13 = vpop.permute.xlu0 %1842  ;;  %v2007_v50 = vld [vmem:[#allocation3 + $0xb0] ss:$8 sm:$0x3] }
 0x1d8   :  { %v1845_v49 = vpop.permute.xlu1 %1844  ;;  %v1863_v59 = vadd.f32 %v1861_v0, %v1769_v53  ;;  %v1864_v43 = vadd.f32 %v1862_v46, %v1770_v32  ;;  %v1918_v32 = vrot.slane %v1913_v3, %v3047_v61 }
 0x1d9   :  { %v1846_v16 = vsel %vm1839_vm5, %v1843_v13, %v1845_v49  ;;  %v1847_v9 = vsel %vm1839_vm5, %v1845_v49, %v1843_v13  ;;  %v2016_v13 = vrot.slane %v2007_v50, %v3050_v63 }
 0x1da   :  { %v1878_v29 = vmul.f32 %v1871_v21, %v1846_v16  ;;  %v1879_v5 = vmul.f32 %v1875_v4, %v1847_v9  ;;  %v1883_v62 = vpop.permute.xlu0 %1882 }
 0x1dc   :  { %v1885_v48 = vpop.permute.xlu1 %1884  ;;  %v1880_v34 = vadd.f32 %v1878_v29, %v1786_v41  ;;  %v1881_v44 = vadd.f32 %v1879_v5, %v1787_v15  ;;  %v1948_v15 = vrot.slane %v1943_v47, %v3047_v61 }
 0x1dd   :  { %v1887_v57 = vsel %vm1886_vm6, %v1883_v62, %v1885_v48  ;;  %v1888_v38 = vsel %vm1886_vm6, %v1885_v48, %v1883_v62 }
 0x1de   :  { %v1908_v10 = vmul.f32 %v1901_v27, %v1887_v57  ;;  %v1909_v53 = vmul.f32 %v1905_v37, %v1888_v38  ;;  %v1890_v54 = vpop.permute.xlu0 %1889 }
 0x1e0   :  { %v1892_v6 = vpop.permute.xlu1 %1891  ;;  %v1910_v58 = vadd.f32 %v1908_v10, %v1816_v42  ;;  %v1911_v22 = vadd.f32 %v1909_v53, %v1817_v52  ;;  %v1965_v52 = vrot.slane %v1960_v2, %v3047_v61 }
 0x1e1   :  { %v1893_v14 = vsel %vm1886_vm6, %v1890_v54, %v1892_v6  ;;  %v1894_v7 = vsel %vm1886_vm6, %v1892_v6, %v1890_v54 }
 0x1e2   :  { %v1925_v24 = vmul.f32 %v1918_v32, %v1893_v14  ;;  %v1926_v41 = vmul.f32 %v1922_v17, %v1894_v7  ;;  %v1930_v36 = vpop.permute.xlu0 %1929 }
 0x1e4   :  { %v1932_v35 = vpop.permute.xlu1 %1931  ;;  %v1927_v1 = vadd.f32 %v1925_v24, %v1833_v26  ;;  %v1928_v18 = vadd.f32 %v1926_v41, %v1834_v45  ;;  %v1995_v45 = vrot.slane %v1990_v8, %v3047_v61 }
 0x1e5   :  { %v1934_v11 = vsel %vm1933_vm7, %v1930_v36, %v1932_v35  ;;  %v1935_v20 = vsel %vm1933_vm7, %v1932_v35, %v1930_v36  ;;  %v4610_v35 = vld [vmem:[#allocation3 + $0xb1] ss:$8 sm:$0x3]  ;;  %v4620_v36 = vld [vmem:[#allocation3 + $0x52] ss:$8 sm:$0x3] }
 0x1e6   :  { %v1955_v23 = vmul.f32 %v1948_v15, %v1934_v11  ;;  %v1956_v42 = vmul.f32 %v1952_v60, %v1935_v20  ;;  %v1937_v25 = vpop.permute.xlu0 %1936  ;;  %v2037_v60 = vld [vmem:[#allocation3 + $0x50] ss:$8 sm:$0x3] }
 0x1e7   :  { %v2042_v11 = vrot.slane %v2037_v60, %v3047_v61  ;;  %v2046_v20 = vrot.slane %v2037_v60, %v3050_v63 }
 0x1e8   :  { %v1939_v28 = vpop.permute.xlu1 %1938  ;;  %v4547_v56 = vadd.f32 %v1955_v23, %v1863_v59  ;;  %v4549_v40 = vadd.f32 %v1956_v42, %v1864_v43  ;;  %v2012_v43 = vrot.slane %v2007_v50, %v3047_v61  ;;  %v2059_v23 = vrot.slane %v4610_v35, %v3047_v61  ;;  %v4626_v42 = vld [vmem:[#allocation3 + $0xb3] ss:$8 sm:$0x3]  ;;  %v4653_v50 = vld [vmem:[#allocation3 + $0xb5] ss:$8 sm:$0x3] }
 0x1e9   :  { %v1940_v31 = vsel %vm1933_vm7, %v1937_v25, %v1939_v28  ;;  %v1941_v19 = vsel %vm1933_vm7, %v1939_v28, %v1937_v25  ;;  %v2063_v28 = vrot.slane %v4610_v35, %v3050_v63 }
 0x1ea   :  { %v1972_v33 = vmul.f32 %v1965_v52, %v1940_v31  ;;  %v1973_v26 = vmul.f32 %v1969_v55, %v1941_v19  ;;  %v1977_v21 = vpop.permute.xlu0 %1976  ;;  %v4628_v52 = vld [vmem:[#allocation3 + $0x53] ss:$8 sm:$0x3]  ;;  %v4640_v19 = vld [vmem:[#allocation3 + $0xb4] ss:$8 sm:$0x3] }
 0x1ec   :  { %v1979_v12 = vpop.permute.xlu1 %1978  ;;  %v4558_v0 = vadd.f32 %v1972_v33, %v1880_v34  ;;  %v4560_v46 = vadd.f32 %v1973_v26, %v1881_v44  ;;  %v4642_v33 = vld [vmem:[#allocation3 + $0x54] ss:$8 sm:$0x3] }
 0x1ed   :  { %v1981_v4 = vsel %vm1980_vm8, %v1977_v21, %v1979_v12  ;;  %v1982_v49 = vsel %vm1980_vm8, %v1979_v12, %v1977_v21 }
 0x1ee   :  { %v2002_v30 = vmul.f32 %v1995_v45, %v1981_v4  ;;  %v2003_v59 = vmul.f32 %v1999_v39, %v1982_v49  ;;  %v1984_v5 = vpop.permute.xlu0 %1983  ;;  %v4712_v4 = vld [vmem:[#allocation3 + $0x60] ss:$8 sm:$0x3]  ;;  %v4735_v49 = vld [vmem:[#allocation3 + $0xc1] ss:$8 sm:$0x3] }
 0x1ef   :  { %v2435_v35 = vrot.slane %v4735_v49, %v3047_v61 }
 0x1f0   :  { %v1986_v16 = vpop.permute.xlu1 %1985  ;;  %v4568_v9 = vadd.f32 %v2002_v30, %v1910_v58  ;;  %v4570_v29 = vadd.f32 %v2003_v59, %v1911_v22  ;;  %v4663_v59 = vld [vmem:[#allocation3 + $0x55] ss:$8 sm:$0x3] }
 0x1f1   :  { %v1987_v27 = vsel %vm1980_vm8, %v1984_v5, %v1986_v16  ;;  %v1988_v37 = vsel %vm1980_vm8, %v1986_v16, %v1984_v5  ;;  %v4702_v16 = vld [vmem:[#allocation3 + $0xc0] ss:$8 sm:$0x3] }
 0x1f2   :  { %v2019_v48 = vmul.f32 %v2012_v43, %v1987_v27  ;;  %v2020_v3 = vmul.f32 %v2016_v13, %v1988_v37  ;;  %v2024_v57 = vpop.permute.xlu0 %2023  ;;  %v4665_v43 = vld [vmem:[#allocation3 + $0xb6] ss:$8 sm:$0x3] }
 0x1f4   :  { %v2026_v34 = vpop.permute.xlu1 %2025  ;;  %v4576_v44 = vadd.f32 %v2019_v48, %v1927_v1  ;;  %v4578_v62 = vadd.f32 %v2020_v3, %v1928_v18  ;;  %v4614_v1 = vld [vmem:[#allocation3 + $0x51] ss:$8 sm:$0x3]  ;;  %v4616_v18 = vld [vmem:[#allocation3 + $0xb2] ss:$8 sm:$0x3] }
 0x1f5   :  { %v2089_v8 = vrot.slane %v4614_v1, %v3047_v61  ;;  %v2093_v25 = vrot.slane %v4614_v1, %v3050_v63  ;;  %v2106_v31 = vrot.slane %v4616_v18, %v3047_v61  ;;  %v4678_v48 = vld [vmem:[#allocation3 + $0x56] ss:$8 sm:$0x3]  ;;  %v4680_v3 = vld [vmem:[#allocation3 + $0xb7] ss:$8 sm:$0x3]  ;;  %v2028_v60 = vsel %vm2027_vm9, %v2024_v57, %v2026_v34 }
 0x1f6   :  { %v4582_v10 = vpop.permute.xlu0 %2030  ;;  %v2029_v13 = vsel %vm2027_vm9, %v2026_v34, %v2024_v57  ;;  %v4700_v57 = vld [vmem:[#allocation3 + $0x57] ss:$8 sm:$0x3]  ;;  %v2049_v12 = vmul.f32 %v2042_v11, %v2028_v60  ;;  %v5403_v1 = vrot.slane %v4616_v18, %v3050_v63 }
 0x1f7   :  { %v2050_v34 = vmul.f32 %v2046_v20, %v2029_v13 }
 0x1f8   :  { %v4580_v38 = vpop.permute.xlu1 %2032 }
 0x1f9   :  { %v2034_v39 = vsel %vm2027_vm9, %v4582_v10, %v4580_v38  ;;  %v2035_v21 = vsel %vm2027_vm9, %v4580_v38, %v4582_v10  ;;  %v2052_v13 = vadd.f32 %v2050_v34, %v4549_v40 }
 0x1fa   :  { %v4586_v32 = vpop.permute.xlu0 %2070  ;;  %v2066_v20 = vmul.f32 %v2059_v23, %v2034_v39  ;;  %v2067_v11 = vmul.f32 %v2063_v28, %v2035_v21  ;;  %v2439_v23 = vrot.slane %v4735_v49, %v3050_v63 }
 0x1fc   :  { %v4584_v53 = vpop.permute.xlu1 %2072 }
 0x1fd   :  { %v2075_v38 = vsel %vm2074_vm10, %v4586_v32, %v4584_v53  ;;  %v2076_v10 = vsel %vm2074_vm10, %v4584_v53, %v4586_v32  ;;  %v2051_v32 = vadd.f32 %v2049_v12, %v4547_v56  ;;  %v5404_v12 = vrot.slane %v4620_v36, %v3047_v61 }
 0x1fe   :  { %v4590_v6 = vpop.permute.xlu0 %2077  ;;  %v2096_v28 = vmul.f32 %v2089_v8, %v2075_v38  ;;  %v2097_v39 = vmul.f32 %v2093_v25, %v2076_v10 }
 0x200   :  { %v4588_v17 = vpop.permute.xlu1 %2079 }
 0x201   :  { %v2081_v45 = vsel %vm2074_vm10, %v4590_v6, %v4588_v17  ;;  %v2082_v53 = vsel %vm2074_vm10, %v4588_v17, %v4590_v6 }
 0x202   :  { %v4594_v58 = vpop.permute.xlu0 %2117  ;;  %v2113_v6 = vmul.f32 %v2106_v31, %v2081_v45  ;;  %v2114_v8 = vmul.f32 %v5403_v1, %v2082_v53  ;;  %v2069_v31 = vadd.f32 %v2067_v11, %v4560_v46  ;;  %v5406_v11 = vrot.slane %v4626_v42, %v3047_v61 }
 0x204   :  { %v4592_v47 = vpop.permute.xlu1 %2119  ;;  %v2115_v53 = vadd.f32 %v2113_v6, %v4576_v44 }
 0x205   :  { %v2122_v56 = vsel %vm2121_vm11, %v4594_v58, %v4592_v47  ;;  %v2123_v40 = vsel %vm2121_vm11, %v4592_v47, %v4594_v58  ;;  %v2068_v58 = vadd.f32 %v2066_v20, %v4558_v0  ;;  %v5407_v20 = vrot.slane %v4626_v42, %v3050_v63 }
 0x206   :  { %v4598_v54 = vpop.permute.xlu0 %2124  ;;  %v5411_v42 = vrot.slane %v4640_v19, %v3050_v63 }
 0x208   :  { %v4596_v22 = vpop.permute.xlu1 %2126 }
 0x209   :  { %v2128_v25 = vsel %vm2121_vm11, %v4598_v54, %v4596_v22  ;;  %v2129_v47 = vsel %vm2121_vm11, %v4596_v22, %v4598_v54  ;;  %v2143_v22 = vmul.f32 %v5404_v12, %v2122_v56  ;;  %v5405_v54 = vrot.slane %v4620_v36, %v3050_v63 }
 0x20a   :  { %v4602_v7 = vpop.permute.xlu0 %2164  ;;  %v2160_v36 = vmul.f32 %v5406_v11, %v2128_v25  ;;  %v2161_v38 = vmul.f32 %v5407_v20, %v2129_v47  ;;  %v2116_v56 = vadd.f32 %v2114_v8, %v4578_v62 }
 0x20b   :  { %v2144_v0 = vmul.f32 %v5405_v54, %v2123_v40 }
 0x20c   :  { %v4600_v14 = vpop.permute.xlu1 %2166  ;;  %v2162_v25 = vadd.f32 %v2160_v36, %v2068_v58  ;;  %v2163_v47 = vadd.f32 %v2161_v38, %v2069_v31 }
 0x20d   :  { %v2169_v18 = vsel %vm2168_vm12, %v4602_v7, %v4600_v14  ;;  %v2170_v45 = vsel %vm2168_vm12, %v4600_v14, %v4602_v7  ;;  %v2098_v14 = vadd.f32 %v2096_v28, %v4568_v9  ;;  %v2099_v7 = vadd.f32 %v2097_v39, %v4570_v29 }
 0x20e   :  { %v4606_v41 = vpop.permute.xlu0 %2171  ;;  %v5409_v9 = vrot.slane %v4628_v52, %v3050_v63  ;;  %v5410_v28 = vrot.slane %v4640_v19, %v3047_v61  ;;  %v2146_v6 = vadd.f32 %v2144_v0, %v2052_v13  ;;  %v5416_v0 = vrot.slane %v4663_v59, %v3047_v61 }
 0x210   :  { %v4604_v24 = vpop.permute.xlu1 %2173  ;;  %v2191_v29 = vmul.f32 %v5409_v9, %v2170_v45  ;;  %v5412_v45 = vrot.slane %v4642_v33, %v3047_v61  ;;  %v5419_v9 = vrot.slane %v4678_v48, %v3050_v63 }
 0x211   :  { %v2175_v46 = vsel %vm2168_vm12, %v4606_v41, %v4604_v24  ;;  %v2176_v21 = vsel %vm2168_vm12, %v4604_v24, %v4606_v41  ;;  %v5408_v24 = vrot.slane %v4628_v52, %v3047_v61  ;;  %v2145_v52 = vadd.f32 %v2143_v22, %v2051_v32 }
 0x212   :  { %v4612_v2 = vpop.permute.xlu0 %2211  ;;  %v2207_v39 = vmul.f32 %v5410_v28, %v2175_v46  ;;  %v2208_v40 = vmul.f32 %v5411_v42, %v2176_v21  ;;  %v5414_v22 = vrot.slane %v4653_v50, %v3047_v61  ;;  %v5417_v21 = vrot.slane %v4663_v59, %v3050_v63 }
 0x213   :  { %v2190_v41 = vmul.f32 %v5408_v24, %v2169_v18  ;;  %v2193_v18 = vadd.f32 %v2191_v29, %v2099_v7  ;;  %v5420_v28 = vrot.slane %v4665_v43, %v3047_v61  ;;  %v5421_v42 = vrot.slane %v4665_v43, %v3050_v63 }
 0x214   :  { %v4608_v15 = vpop.permute.xlu1 %2213  ;;  %v2209_v31 = vadd.f32 %v2207_v39, %v2115_v53  ;;  %v2210_v12 = vadd.f32 %v2208_v40, %v2116_v56 }
 0x215   :  { %v2216_v44 = vsel %vm2215_vm13, %v4612_v2, %v4608_v15  ;;  %v2217_v62 = vsel %vm2215_vm13, %v4608_v15, %v4612_v2  ;;  %v2192_v32 = vadd.f32 %v2190_v41, %v2098_v14 }
 0x216   :  { %v4644_v26 = vpop.permute.xlu0 %2218 }
 0x218   :  { %v4630_v55 = vpop.permute.xlu1 %2220 }
 0x219   :  { %v2222_v19 = vsel %vm2215_vm13, %v4644_v26, %v4630_v55  ;;  %v2223_v1 = vsel %vm2215_vm13, %v4630_v55, %v4644_v26  ;;  %v2237_v55 = vmul.f32 %v5412_v45, %v2216_v44  ;;  %v5413_v26 = vrot.slane %v4642_v33, %v3050_v63 }
 0x21a   :  { %v4690_v30 = vpop.permute.xlu0 %2258  ;;  %v2254_v54 = vmul.f32 %v5414_v22, %v2222_v19  ;;  %v5423_v44 = vrot.slane %v4700_v57, %v3050_v63  ;;  %v5424_v19 = vrot.slane %v4680_v3, %v3047_v61  ;;  %v5427_v45 = vrot.slane %v4712_v4, %v3050_v63 }
 0x21b   :  { %v2238_v58 = vmul.f32 %v5413_v26, %v2217_v62  ;;  %v2239_v53 = vadd.f32 %v2237_v55, %v2145_v52 }
 0x21c   :  { %v4676_v37 = vpop.permute.xlu1 %2260  ;;  %v2256_v24 = vadd.f32 %v2254_v54, %v2162_v25 }
 0x21d   :  { %v2263_v15 = vsel %vm2262_vm14, %v4690_v30, %v4676_v37  ;;  %v2264_v2 = vsel %vm2262_vm14, %v4676_v37, %v4690_v30  ;;  %v5415_v30 = vrot.slane %v4653_v50, %v3050_v63 }
 0x21e   :  { %v4725_v5 = vpop.permute.xlu0 %2265  ;;  %v2284_v46 = vmul.f32 %v5416_v0, %v2263_v15  ;;  %v2285_v14 = vmul.f32 %v5417_v21, %v2264_v2 }
 0x21f   :  { %v2255_v37 = vmul.f32 %v5415_v30, %v2223_v1 }
 0x220   :  { %v4723_v27 = vpop.permute.xlu1 %2267 }
 0x221   :  { %v2269_v50 = vsel %vm2262_vm14, %v4725_v5, %v4723_v27  ;;  %v2270_v36 = vsel %vm2262_vm14, %v4723_v27, %v4725_v5  ;;  %v2257_v41 = vadd.f32 %v2255_v37, %v2163_v47  ;;  %v5418_v5 = vrot.slane %v4678_v48, %v3047_v61 }
 0x222   :  { %v2306_v17 = vpop.permute.xlu0 %2305  ;;  %v2301_v39 = vmul.f32 %v5420_v28, %v2269_v50  ;;  %v2302_v40 = vmul.f32 %v5421_v42, %v2270_v36  ;;  %v2287_v48 = vadd.f32 %v2285_v14, %v2193_v18  ;;  %v5426_v18 = vrot.slane %v4712_v4, %v3047_v61 }
 0x223   :  { %v5428_v37 = vrot.slane %v4702_v16, %v3047_v61 }
 0x224   :  { %v2308_v60 = vpop.permute.xlu1 %2307  ;;  %v2303_v26 = vadd.f32 %v2301_v39, %v2209_v31  ;;  %v2729_v39 = vmov 1966171168  }
 0x225   :  { %v2310_v33 = vsel %vm2309_vm15, %v2306_v17, %v2308_v60  ;;  %v2311_v7 = vsel %vm2309_vm15, %v2308_v60, %v2306_v17  ;;  %v2240_v60 = vadd.f32 %v2238_v58, %v2146_v6  ;;  %v2286_v6 = vadd.f32 %v2284_v46, %v2192_v32 }
 0x226   :  { %v2313_v10 = vpop.permute.xlu0 %2312  ;;  %v2331_v27 = vmul.f32 %v5418_v5, %v2310_v33  ;;  %v2332_v29 = vmul.f32 %v5419_v9, %v2311_v7  ;;  %v2304_v58 = vadd.f32 %v2302_v40, %v2210_v12  ;;  %v5429_v46 = vrot.slane %v4702_v16, %v3050_v63 }
 0x227   :  { %v2472_v42 = vunpack.c.l.s4 %v2729_v39 }
 0x228   :  { %v2315_v34 = vpop.permute.xlu1 %2314  ;;  %v2334_v32 = vadd.f32 %v2332_v29, %v2240_v60 }
 0x229   :  { %v2316_v17 = vsel %vm2309_vm15, %v2313_v10, %v2315_v34  ;;  %v2317_v56 = vsel %vm2309_vm15, %v2315_v34, %v2313_v10  ;;  %v5422_v34 = vrot.slane %v4700_v57, %v3047_v61  ;;  %v2473_v40 = vunpack.c.0.s8 %v2472_v42 }
 0x22a   :  { %v2353_v13 = vpop.permute.xlu0 %2352  ;;  %v2348_v1 = vmul.f32 %v5424_v19, %v2316_v17 }
 0x22c   :  { %v2355_v8 = vpop.permute.xlu1 %2354 }
 0x22d   :  { %v2357_v59 = vsel %vm2356_vm0, %v2353_v13, %v2355_v8  ;;  %v2358_v20 = vsel %vm2356_vm0, %v2355_v8, %v2353_v13  ;;  %v5425_v8 = vrot.slane %v4680_v3, %v3050_v63  ;;  %v2333_v13 = vadd.f32 %v2331_v27, %v2239_v53 }
 0x22e   :  { %v2360_v38 = vpop.permute.xlu0 %2359  ;;  %v2378_v10 = vmul.f32 %v5422_v34, %v2357_v59  ;;  %v2379_v62 = vmul.f32 %v5423_v44, %v2358_v20 }
 0x22f   :  { %v2349_v43 = vmul.f32 %v5425_v8, %v2317_v56 }
 0x230   :  { %v2362_v11 = vpop.permute.xlu1 %2361  ;;  %v2380_v22 = vadd.f32 %v2378_v10, %v2286_v6  ;;  %v2381_v54 = vadd.f32 %v2379_v62, %v2287_v48  ;;  %v5430_v10 = vld [vmem:[#allocation40_spill] sm:$0xff] }
 0x231   :  { %v2363_v47 = vsel %vm2356_vm0, %v2360_v38, %v2362_v11  ;;  %v2364_v15 = vsel %vm2356_vm0, %v2362_v11, %v2360_v38  ;;  %v2350_v11 = vadd.f32 %v2348_v1, %v2256_v24  ;;  %v2351_v50 = vadd.f32 %v2349_v43, %v2257_v41 }
 0x232   :  { %v2400_v25 = vpop.permute.xlu0 %2399  ;;  %v2395_v0 = vmul.f32 %v5428_v37, %v2363_v47  ;;  %v2396_v21 = vmul.f32 %v5429_v46, %v2364_v15  ;;  %v2476_v44 = vsub.s32 %v2473_v40, %v5430_v10 }
 0x234   :  { %v2402_v52 = vpop.permute.xlu1 %2401  ;;  %v2397_v20 = vadd.f32 %v2395_v0, %v2303_v26  ;;  %v2398_v38 = vadd.f32 %v2396_v21, %v2304_v58 }
 0x235   :  { %v2404_v57 = vsel %vm2403_vm1, %v2400_v25, %v2402_v52  ;;  %v2405_v2 = vsel %vm2403_vm1, %v2402_v52, %v2400_v25 }
 0x236   :  { %v2425_v3 = vmul.f32 %v5426_v18, %v2404_v57  ;;  %v2426_v55 = vmul.f32 %v5427_v45, %v2405_v2  ;;  %v2407_v7 = vpop.permute.xlu0 %2406  ;;  %v2602_v2 = vld [vmem:[#allocation6] sm:$0xff] }
 0x238   :  { %v2409_v30 = vpop.permute.xlu1 %2408  ;;  %v2427_v14 = vadd.f32 %v2425_v3, %v2333_v13  ;;  %v2428_v33 = vadd.f32 %v2426_v55, %v2334_v32  ;;  %v2603_v32 = vld [vmem:[#allocation6 + $0x8] sm:$0xff] }
 0x239   :  { %v2410_v4 = vsel %vm2403_vm1, %v2407_v7, %v2409_v30  ;;  %v2411_v31 = vsel %vm2403_vm1, %v2409_v30, %v2407_v7 }
 0x23a   :  { %v2446_v12 = vadd.f32 %v2427_v14, %v2380_v22  ;;  %v2447_v36 = vadd.f32 %v2428_v33, %v2381_v54  ;;  %v2442_v59 = vmul.f32 %v2435_v35, %v2410_v4  ;;  %v2443_v16 = vmul.f32 %v2439_v23, %v2411_v31 }
 0x23c   :  { %v2444_v53 = vadd.f32 %v2442_v59, %v2350_v11  ;;  %v2445_v60 = vadd.f32 %v2443_v16, %v2351_v50 }
 0x23e   :  { %v2448_v17 = vadd.f32 %v2444_v53, %v2397_v20  ;;  %v2449_v56 = vadd.f32 %v2445_v60, %v2398_v38 }
 0x240   :  { %v2450_v24 = vadd.f32 %v2448_v17, %v2446_v12  ;;  %v2451_v41 = vadd.f32 %v2449_v56, %v2447_v36 }
 0x242   :  { %v2454_v5 = vadd.f32 %v2453_v51, %v2450_v24  ;;  %v2455_v27 = vadd.f32 %v2453_v51, %v2451_v41 }
 0x244   :  { %v2535_v9 = vmul.f32 -1.442695, %v2454_v5  ;;  %v2536_v35 = vmul.f32 -1.442695, %v2455_v27 }
 0x246   :  { %2594 = vpow2.f32 %v2535_v9 }
 0x247   :  { %2596 = vpow2.f32 %v2536_v35 }
 0x250   :  { %v2595_v49 = vpop.eup %2594 }
 0x251   :  { %v2597_v23 = vpop.eup %2596  ;;  %v2462_v29 = vadd.f32 1.0, %v2595_v49 }
 0x252   :  { %v2463_v28 = vadd.f32 1.0, %v2597_v23 }
 0x253   :  { %2598 = vrcp.f32 %v2462_v29 }
 0x254   :  { %2600 = vrcp.f32 %v2463_v28 }
 0x25d   :  { %v2599_v34 = vpop.eup %2598 }
 0x25e   :  { %v2601_v62 = vpop.eup %2600 }
 0x25f   :  { %v2470_v52 = vcombine.low %v2599_v34, %v2601_v62 }
 0x261   :  { %v2477_v6 = vrot.slane %v2470_v52, %v2476_v44 }
 0x263   :  { %v2478_v48 = vcombine.high %v2477_v6, %v2477_v6  ;;  %v2485_v19 = vrot.slane %v2477_v6, %v2476_v44 }
 0x265   :  { %v2492_v1 = vrot.slane %v2478_v48, %v2476_v44  ;;  %v2496_v8 = vrot.slane %v2485_v19, %v3047_v61  ;;  %v2500_v43 = vrot.slane %v2485_v19, %v3050_v63 }
 0x267   :  { %v2504_v25 = vrot.slane %v2492_v1, %v3047_v61  ;;  %v2508_v47 = vrot.slane %v2492_v1, %v3050_v63  ;;  %v2509_v15 = vcombine.low %v2496_v8, %v2500_v43 }
 0x269   :  { %v2510_v57 = vcombine.low %v2504_v25, %v2508_v47  ;;  %v2513_v13 = vmul.f32 %v2602_v2, %v2509_v15 }
 0x26b   :  { %v2514_v18 = vmul.f32 %v2603_v32, %v2510_v57  ;;  %2515 = vst [vmem:[#allocation8] sm:$0xff] %v2513_v13 }
 0x26d   :  { %2516 = vst [vmem:[#allocation8 + $0x8] sm:$0xff] %v2514_v18 }
 0x26e   :  { %2659 = shalt.err (!%p2656_p6)
}
 0x26f   :  { %s2660_s11 = scalar_lea.hbm %s4986_s3, 256 }
 0x270   :  { %p2661_p7 = scmp.ne.s32.totalorder %s4986_s3, %s2660_s11  ;;  %p2664_p8 = scmp.lt.u32.totalorder %s2660_s11, %s4986_s3 }
 0x272   :  { %p2666_p9 = pnand %p2664_p8, %p2661_p7 }
 0x274   :  { %2669 = shalt.err (!%p2666_p9)
}
 0x275   :  { %2528 = dma.vmem_to_hbm [thread:$0]  %s2523_s6, 256, %s4986_s3, [#allocation5], %s2680_s1, %s2680_s1, %s2681_s9  }
 0x276   :  { %2674 = dma.done.wait [#allocation5], 256  }
 0x277   :  { %2675 = vsyncadd [#allocation5], 4294967040 }
 0x278   :  { %2532 = vsyncpa [#allocation4], 1 }
 0x279   :  { %2533 = vsyncpa [#allocation7], 1 }
 0x27a   :  { %2534 = vsyncpa [#allocation5], 1 }

</bundles_post_ra>
